<compile_context>
chip_gen: v5e
topology: v5e:2x2
jax: 0.10.0
libtpu: 0.0.40
codegen_flags: <defaults>
</compile_context>

<pallas_src>
import functools

import jax
import jax.numpy as jnp
from jax.experimental import pallas as pl
from jax.experimental.pallas import tpu as pltpu


def _round_up(x, m):
    return ((x + m - 1) // m) * m


# ------------------------------ fused kernel ------------------------------

def _encoder_kernel(ids_ref, ftab_ref, wih_ref, whh_ref, bgi_ref, bhn_ref,
                    out_ref, state_ref, gi_scr):
    """Fused embedding + L-layer GRU forward for one batch tile.

    ids_ref  : (T*bt, 1)  int32  time-major token ids for this batch tile
    ftab_ref : (V, 3*Hp)  bf16   embed @ W_ih[0]^T, gate-slab padded
    wih_ref  : (max(L-1,1), Hp, 3*Hp) bf16  W_ih^T for layers 1..L-1
    whh_ref  : (L, Hp, 3*Hp) bf16
    bgi_ref  : (L, 1, 3*Hp) f32   b_ih + [b_hh_r, b_hh_z, 0]   (folded biases)
    bhn_ref  : (L, 1, Hp)   f32   n-gate hidden bias (must stay inside r*(...))
    out_ref  : (T*bt, Hp)   f32   last-layer outputs, time-major; also reused as
                                  the inter-layer activation buffer
    state_ref: (L, bt, Hp)  f32   final hidden state per layer
    gi_scr   : (T*bt, 3*Hp) f32   hoisted input projections for all timesteps
    """
    L, bt, Hp = state_ref.shape
    TB = out_ref.shape[0]
    T = TB // bt
    V = ftab_ref.shape[0]

    # One-hot "gather" of token ids; exact in bf16 and V is tiny, so the
    # embedding lookup is one small MXU matmul fused into layer-0 gates.
    ids = ids_ref[...]                                              # (TB, 1)
    onehot = (ids == jax.lax.broadcasted_iota(jnp.int32, (TB, V), 1)
              ).astype(jnp.bfloat16)

    for l in range(L):
        # ---- input projection for ALL timesteps (hoisted out of recurrence).
        # b_ih and the r/z hidden biases are pre-folded into bgi.
        if l == 0:
            gi_scr[...] = jnp.dot(onehot, ftab_ref[...],
                                  preferred_element_type=jnp.float32) + bgi_ref[0]
        else:
            gi_scr[...] = jnp.dot(out_ref[...].astype(jnp.bfloat16), wih_ref[l - 1],
                                  preferred_element_type=jnp.float32) + bgi_ref[l]

        w_hh = whh_ref[l]                                           # (Hp, 3Hp) bf16
        b_hn = jnp.broadcast_to(bhn_ref[l], (bt, Hp))               # hoisted broadcast

        # ---- sequential recurrence: only h @ W_hh remains on the critical path.
        # h is carried in registers (no per-step VMEM round trip).
        def step(t, h):
            row = pl.multiple_of(t * bt, bt)
            gi = gi_scr[pl.ds(row, bt), :]                          # (bt, 3Hp) f32
            gh = jnp.dot(h.astype(jnp.bfloat16), w_hh,
                         preferred_element_type=jnp.float32)        # (bt, 3Hp) f32
            # PyTorch GRU gate order [r, z, n]; each gate is a whole 128-lane slab.
            r = jax.nn.sigmoid(gi[:, 0:Hp] + gh[:, 0:Hp])
            z = jax.nn.sigmoid(gi[:, Hp:2 * Hp] + gh[:, Hp:2 * Hp])
            n = jnp.tanh(gi[:, 2 * Hp:3 * Hp] + r * (gh[:, 2 * Hp:3 * Hp] + b_hn))
            h_new = (1.0 - z) * n + z * h
            out_ref[pl.ds(row, bt), :] = h_new                      # lane-dense store
            return h_new
        # TODO(synk): interleave 2 independent batch sub-chains per step to raise
        # MXU occupancy once bt is large enough to split.

        h0 = jnp.zeros((bt, Hp), jnp.float32)
        h_fin = jax.lax.fori_loop(0, T, step, h0, unroll=min(T, 8))

        state_ref[l] = h_fin
        # TODO(synk): inter-layer dropout (train-mode only) not implemented; eval path.


# ------------------------------ wrapper -----------------------------------

def encoder_forward(params, X, *, batch_tile=None):
    """X: (B, T) int32 token ids -> (output (T, B, H), state (L, B, H)).

    batch_tile: padded-batch rows per grid step (multiple of 8). Default = whole
    padded batch (grid size 1, best for single-TC v5e/v6e). On v7x with B >= 16,
    pass e.g. Bp // 2 so the "parallel" batch axis shards across both TensorCores.
    """
    B, T = X.shape
    H = int(params["hidden_size"])
    L = int(params["num_layers"])
    Hp = _round_up(H, 128)
    V = params["fused_embed_gates"].shape[0]

    Bp = _round_up(max(B, 8), 8)              # pad batch to sublane multiple
    bt = Bp if batch_tile is None else int(batch_tile)
    assert bt % 8 == 0 and Bp % bt == 0, (Bp, bt)
    nb = Bp // bt

    # Per batch tile, rows are time-major (row = t*bt + local_b).
    X_pad = jnp.pad(X.astype(jnp.int32), ((0, Bp - B), (0, 0)))     # (Bp, T)
    ids = X_pad.reshape(nb, bt, T).transpose(0, 2, 1).reshape(nb * T * bt, 1)

    # Explicit VMEM budget (double-buffered blocks + single-buffered scratch).
    est = 2 * (T * bt * 4                                   # ids
               + V * 3 * Hp * 2                             # fused embed table
               + max(L - 1, 1) * Hp * 3 * Hp * 2            # W_ih rest
               + L * Hp * 3 * Hp * 2                        # W_hh
               + L * 3 * Hp * 4 + L * Hp * 4                # biases
               + T * bt * Hp * 4                            # out block
               + L * bt * Hp * 4)                           # state block
    est += T * bt * 3 * Hp * 4                              # gi scratch
    vmem_limit = int(min(max(2 * est, 16 * 1024 * 1024), 64 * 1024 * 1024))
    # TODO(synk): for long sequences, chunk gi_scr over T (emit_pipeline) instead
    # of materializing all timesteps, to stay inside v7x's 64 MiB VMEM.

    out_flat, state_pad = pl.pallas_call(
        _encoder_kernel,
        grid=(nb,),
        in_specs=[
            pl.BlockSpec((T * bt, 1), lambda i: (i, 0)),
            pl.BlockSpec((V, 3 * Hp), lambda i: (0, 0)),
            pl.BlockSpec(params["w_ih_rest"].shape, lambda i: (0, 0, 0)),
            pl.BlockSpec(params["w_hh"].shape, lambda i: (0, 0, 0)),
            pl.BlockSpec(params["b_gi"].shape, lambda i: (0, 0, 0)),
            pl.BlockSpec(params["b_hn"].shape, lambda i: (0, 0, 0)),
        ],
        out_specs=(
            pl.BlockSpec((T * bt, Hp), lambda i: (i, 0)),
            pl.BlockSpec((L, bt, Hp), lambda i: (0, i, 0)),
        ),
        out_shape=(
            jax.ShapeDtypeStruct((nb * T * bt, Hp), jnp.float32),
            jax.ShapeDtypeStruct((L, Bp, Hp), jnp.float32),
        ),
        scratch_shapes=[pltpu.VMEM((T * bt, 3 * Hp), jnp.float32)],
        compiler_params=pltpu.CompilerParams(
            dimension_semantics=("parallel",),
            vmem_limit_bytes=vmem_limit,
        ),
    )(ids, params["fused_embed_gates"], params["w_ih_rest"],
      params["w_hh"], params["b_gi"], params["b_hn"])

    output = (out_flat.reshape(nb, T, bt, Hp)
              .transpose(1, 0, 2, 3)
              .reshape(T, Bp, Hp)[:, :B, :H])                       # (T, B, H)
    state = state_pad[:, :B, :H]                                    # (L, B, H)
    return output, state


# ------------------------------ parameters --------------------------------

def _pad_gates(x, H, Hp):
    """(..., 3H) -> (..., 3Hp): each H-wide gate placed at the base of its own
    Hp(=128k)-lane slab so in-kernel gate slices are whole, lane-aligned vregs."""
    pads = [(0, 0)] * (x.ndim - 1) + [(0, Hp - H)]
    return jnp.concatenate(
        [jnp.pad(x[..., g * H:(g + 1) * H], pads) for g in range(3)], axis=-1)


def init_params(key, char_len, embedding_dim, hidden_size, num_layers):
    H, L, E, V = hidden_size, num_layers, embedding_dim, char_len
    Hp = _round_up(H, 128)
    bound = 1.0 / (H ** 0.5)

    key, ke = jax.random.split(key)
    embed = jax.random.normal(ke, (V, E), jnp.float32)

    w_ih, w_hh, b_ih, b_hh = [], [], [], []
    for l in range(L):
        in_sz = E if l == 0 else H
        key, k1, k2, k3, k4 = jax.random.split(key, 5)
        w_ih.append(jax.random.uniform(k1, (3 * H, in_sz), jnp.float32, -bound, bound))
        w_hh.append(jax.random.uniform(k2, (3 * H, H), jnp.float32, -bound, bound))
        b_ih.append(jax.random.uniform(k3, (1, 3 * H), jnp.float32, -bound, bound))
        b_hh.append(jax.random.uniform(k4, (1, 3 * H), jnp.float32, -bound, bound))

    # Embedding folded into layer-0 gate space, one-time f32 precompute at HIGHEST
    # precision, stored bf16 for the MXU:  onehot(X) @ (embed @ W_ih0^T)
    fused = jnp.dot(embed, w_ih[0].T, precision=jax.lax.Precision.HIGHEST)   # (V, 3H)
    fused_embed_gates = _pad_gates(fused, H, Hp).astype(jnp.bfloat16)        # (V, 3Hp)

    def pack_w(w):   # (3H, In) -> (Hp, 3Hp) bf16 with zero row/gate padding
        wt = _pad_gates(w.T, H, Hp)                              # (In, 3Hp)
        wt = jnp.pad(wt, ((0, Hp - wt.shape[0]), (0, 0)))        # (Hp, 3Hp)
        return wt.astype(jnp.bfloat16)

    w_hh_packed = jnp.stack([pack_w(w) for w in w_hh])                       # (L, Hp, 3Hp)
    if L > 1:
        w_ih_rest = jnp.stack([pack_w(w) for w in w_ih[1:]])                 # (L-1, Hp, 3Hp)
    else:
        w_ih_rest = jnp.zeros((1, Hp, 3 * Hp), jnp.bfloat16)                 # unused dummy

    # Fold b_ih + [b_hh_r, b_hh_z, 0] into the hoisted gi bias; keep only the
    # n-gate hidden bias (inside r*(...)) for the time loop.
    b_gi, b_hn = [], []
    for l in range(L):
        hh = b_hh[l]
        rz0 = jnp.concatenate([hh[:, :2 * H], jnp.zeros((1, H), jnp.float32)], axis=-1)
        b_gi.append(_pad_gates(b_ih[l] + rz0, H, Hp))                        # (1, 3Hp)
        b_hn.append(jnp.pad(hh[:, 2 * H:], ((0, 0), (0, Hp - H))))           # (1, Hp)

    return {
        "hidden_size": H,
        "num_layers": L,
        # raw per-layer params (used by the pure-JAX reference)
        "embed": embed,
        "w_ih_list": w_ih, "w_hh_list": w_hh, "b_ih_list": b_ih, "b_hh_list": b_hh,
        # kernel-ready packed params
        "fused_embed_gates": fused_embed_gates,
        "w_ih_rest": w_ih_rest,
        "w_hh": w_hh_packed,
        "b_gi": jnp.stack(b_gi),
        "b_hn": jnp.stack(b_hn),
    }


# --------------------------- pure-JAX reference ----------------------------

def encoder_reference(params, X):
    B, T = X.shape
    H = params["hidden_size"]
    L = params["num_layers"]
    inp = params["embed"][X].transpose(1, 0, 2)            # (T, B, E)
    states = []
    for l in range(L):
        w_ih = params["w_ih_list"][l]
        w_hh = params["w_hh_list"][l]
        b_ih = params["b_ih_list"][l]
        b_hh = params["b_hh_list"][l]
        h = jnp.zeros((B, H), jnp.float32)
        outs = []
        for t in range(T):
            gi = inp[t] @ w_ih.T + b_ih
            gh = h @ w_hh.T + b_hh
            r = jax.nn.sigmoid(gi[:, :H] + gh[:, :H])
            z = jax.nn.sigmoid(gi[:, H:2 * H] + gh[:, H:2 * H])
            n = jnp.tanh(gi[:, 2 * H:] + r * gh[:, 2 * H:])
            h = (1.0 - z) * n + z * h
            outs.append(h)
        inp = jnp.stack(outs)
        states.append(h)
    return inp, jnp.stack(states)


# ---------------------------------- main -----------------------------------

if __name__ == "__main__":
    # args: char_len=16, embedding_dim=8, hidden_size=32, num_layers=2, dropout=0.0
    CHAR_LEN, EMBED_DIM, HIDDEN, NUM_LAYERS = 16, 8, 32, 2
    B, T = 2, 8

    key = jax.random.PRNGKey(0)
    key, kx, kp = jax.random.split(key, 3)
    X = jax.random.randint(kx, (B, T), 0, CHAR_LEN, dtype=jnp.int32)
    params = init_params(kp, CHAR_LEN, EMBED_DIM, HIDDEN, NUM_LAYERS)

    fwd = jax.jit(functools.partial(encoder_forward, params))
    output, state = jax.block_until_ready(fwd(X))

    assert output.shape == (T, B, HIDDEN), output.shape
    assert state.shape == (NUM_LAYERS, B, HIDDEN), state.shape
    assert output.dtype == jnp.float32 and state.dtype == jnp.float32
    assert bool(jnp.all(jnp.isfinite(output))) and bool(jnp.all(jnp.isfinite(state)))

    # Correctness vs pure-JAX f32 reference (tolerance covers bf16 MXU operands).
    ref_out, ref_state = encoder_reference(params, X)
    err = max(float(jnp.max(jnp.abs(output - ref_out))),
              float(jnp.max(jnp.abs(state - ref_state))))
    assert err < 5e-2, f"max abs err {err}"

    print("KERNEL_OK")
</pallas_src>

<mosaic_0001>
module attributes {stable_mosaic.version = 11 : i64} {
  func.func @_encoder_kernel(%arg0: i32, %arg1: memref<64x1xi32, #tpu.memory_space<vmem>>, %arg2: memref<16x384xbf16, #tpu.memory_space<vmem>>, %arg3: memref<1x128x384xbf16, #tpu.memory_space<vmem>>, %arg4: memref<2x128x384xbf16, #tpu.memory_space<vmem>>, %arg5: memref<2x1x384xf32, #tpu.memory_space<vmem>>, %arg6: memref<2x1x128xf32, #tpu.memory_space<vmem>>, %arg7: memref<64x128xf32, #tpu.memory_space<vmem>>, %arg8: memref<2x8x128xf32, #tpu.memory_space<vmem>>, %arg9: memref<64x384xf32, #tpu.memory_space<vmem>>) attributes {dimension_semantics = [#tpu.dimension_semantics<parallel>], iteration_bounds = array<i64: 1>, scalar_prefetch = 0 : i64, scratch_operands = 1 : i64, tpu.core_type = #tpu.core_type<tc>, window_params = [{transform_indices = @transform_0, window_bounds = array<i64: 64, 1>}, {pipeline_mode = #tpu.pipeline_mode<synchronous>, transform_indices = @transform_1, window_bounds = array<i64: 16, 384>}, {pipeline_mode = #tpu.pipeline_mode<synchronous>, transform_indices = @transform_2, window_bounds = array<i64: 1, 128, 384>}, {pipeline_mode = #tpu.pipeline_mode<synchronous>, transform_indices = @transform_3, window_bounds = array<i64: 2, 128, 384>}, {pipeline_mode = #tpu.pipeline_mode<synchronous>, transform_indices = @transform_4, window_bounds = array<i64: 2, 1, 384>}, {pipeline_mode = #tpu.pipeline_mode<synchronous>, transform_indices = @transform_5, window_bounds = array<i64: 2, 1, 128>}, {transform_indices = @transform_6, window_bounds = array<i64: 64, 128>}, {transform_indices = @transform_7, window_bounds = array<i64: 2, 8, 128>}]} {
    %c0 = arith.constant 0 : index
    %c0_0 = arith.constant 0 : index
    %0 = vector.load %arg1[%c0, %c0_0] : memref<64x1xi32, #tpu.memory_space<vmem>>, vector<64x1xi32>
    %1 = tpu.iota {dimensions = array<i32: 1>} : vector<64x16xi32>
    %2 = vector.broadcast %0 : vector<64x1xi32> to vector<64x16xi32>
    %3 = arith.cmpi eq, %2, %1 : vector<64x16xi32>
    %4 = arith.extui %3 : vector<64x16xi1> to vector<64x16xi32>
    %5 = arith.sitofp %4 : vector<64x16xi32> to vector<64x16xf32>
    %6 = arith.truncf %5 : vector<64x16xf32> to vector<64x16xbf16>
    %c0_1 = arith.constant 0 : index
    %c0_2 = arith.constant 0 : index
    %7 = vector.load %arg2[%c0_1, %c0_2] : memref<16x384xbf16, #tpu.memory_space<vmem>>, vector<16x384xbf16>
    %cst = arith.constant dense<0.000000e+00> : vector<64x384xf32>
    %8 = tpu.matmul %6, %7, %cst {dimension_numbers = #tpu.dot_dimension_numbers<[1], [0], [0], [1], [0, 0, 1, 1], [], []>} : vector<64x16xbf16>, vector<16x384xbf16>, vector<64x384xf32> -> vector<64x384xf32>
    %c0_3 = arith.constant 0 : index
    %c0_4 = arith.constant 0 : index
    %c0_5 = arith.constant 0 : index
    %9 = vector.load %arg5[%c0_3, %c0_4, %c0_5] : memref<2x1x384xf32, #tpu.memory_space<vmem>>, vector<1x1x384xf32>
    %10 = vector.shape_cast %9 : vector<1x1x384xf32> to vector<1x384xf32>
    %11 = vector.broadcast %10 : vector<1x384xf32> to vector<64x384xf32>
    %12 = arith.addf %8, %11 : vector<64x384xf32>
    %c0_6 = arith.constant 0 : index
    %c0_7 = arith.constant 0 : index
    %13 = vector.load %arg9[%c0_6, %c0_7] : memref<64x384xf32, #tpu.memory_space<vmem>>, vector<64x384xf32>
    tpu.vector_store %arg9[%c0_6, %c0_7], %12 {strides = array<i32>} : memref<64x384xf32, #tpu.memory_space<vmem>>, vector<64x384xf32>,
    %c0_8 = arith.constant 0 : index
    %c0_9 = arith.constant 0 : index
    %c0_10 = arith.constant 0 : index
    %14 = vector.load %arg4[%c0_8, %c0_9, %c0_10] : memref<2x128x384xbf16, #tpu.memory_space<vmem>>, vector<1x128x384xbf16>
    %15 = vector.shape_cast %14 : vector<1x128x384xbf16> to vector<128x384xbf16>
    %c0_11 = arith.constant 0 : index
    %c0_12 = arith.constant 0 : index
    %c0_13 = arith.constant 0 : index
    %16 = vector.load %arg6[%c0_11, %c0_12, %c0_13] : memref<2x1x128xf32, #tpu.memory_space<vmem>>, vector<1x1x128xf32>
    %17 = vector.shape_cast %16 : vector<1x1x128xf32> to vector<1x128xf32>
    %18 = vector.shape_cast %17 : vector<1x128xf32> to vector<1x128xf32>
    %19 = vector.broadcast %18 : vector<1x128xf32> to vector<8x128xf32>
    %cst_14 = arith.constant 0.000000e+00 : f32
    %20 = vector.broadcast %cst_14 : f32 to vector<8x128xf32>
    %c0_i32 = arith.constant 0 : i32
    %c8_i32 = arith.constant 8 : i32
    %21 = arith.muli %c0_i32, %c8_i32 : i32
    %22 = tpu.assume_multiple %21, 8 : i32
    %23 = arith.index_cast %22 : i32 to index
    %c0_15 = arith.constant 0 : index
    %24 = vector.load %arg9[%23, %c0_15] : memref<64x384xf32, #tpu.memory_space<vmem>>, vector<8x384xf32>
    %25 = arith.truncf %20 : vector<8x128xf32> to vector<8x128xbf16>
    %cst_16 = arith.constant dense<0.000000e+00> : vector<8x384xf32>
    %26 = tpu.matmul %25, %15, %cst_16 {dimension_numbers = #tpu.dot_dimension_numbers<[1], [0], [0], [1], [0, 0, 1, 1], [], []>} : vector<8x128xbf16>, vector<128x384xbf16>, vector<8x384xf32> -> vector<8x384xf32>
    %27 = vector.extract_strided_slice %24 {offsets = [0, 0], sizes = [8, 128], strides = [1, 1]} : vector<8x384xf32> to vector<8x128xf32>
    %28 = vector.extract_strided_slice %26 {offsets = [0, 0], sizes = [8, 128], strides = [1, 1]} : vector<8x384xf32> to vector<8x128xf32>
    %29 = arith.addf %27, %28 : vector<8x128xf32>
    %30 = arith.negf %29 : vector<8x128xf32>
    %31 = math.exp %30 : vector<8x128xf32>
    %cst_17 = arith.constant 1.000000e+00 : f32
    %32 = vector.broadcast %cst_17 : f32 to vector<8x128xf32>
    %33 = arith.addf %32, %31 : vector<8x128xf32>
    %34 = arith.divf %32, %33 : vector<8x128xf32>
    %35 = vector.extract_strided_slice %24 {offsets = [0, 128], sizes = [8, 128], strides = [1, 1]} : vector<8x384xf32> to vector<8x128xf32>
    %36 = vector.extract_strided_slice %26 {offsets = [0, 128], sizes = [8, 128], strides = [1, 1]} : vector<8x384xf32> to vector<8x128xf32>
    %37 = arith.addf %35, %36 : vector<8x128xf32>
    %38 = arith.negf %37 : vector<8x128xf32>
    %39 = math.exp %38 : vector<8x128xf32>
    %cst_18 = arith.constant 1.000000e+00 : f32
    %40 = vector.broadcast %cst_18 : f32 to vector<8x128xf32>
    %41 = arith.addf %40, %39 : vector<8x128xf32>
    %42 = arith.divf %40, %41 : vector<8x128xf32>
    %43 = vector.extract_strided_slice %24 {offsets = [0, 256], sizes = [8, 128], strides = [1, 1]} : vector<8x384xf32> to vector<8x128xf32>
    %44 = vector.extract_strided_slice %26 {offsets = [0, 256], sizes = [8, 128], strides = [1, 1]} : vector<8x384xf32> to vector<8x128xf32>
    %45 = arith.addf %44, %19 : vector<8x128xf32>
    %46 = arith.mulf %34, %45 : vector<8x128xf32>
    %47 = arith.addf %43, %46 : vector<8x128xf32>
    %48 = math.tanh %47 : vector<8x128xf32>
    %cst_19 = arith.constant 1.000000e+00 : f32
    %49 = vector.broadcast %cst_19 : f32 to vector<8x128xf32>
    %50 = arith.subf %49, %42 : vector<8x128xf32>
    %51 = arith.mulf %50, %48 : vector<8x128xf32>
    %52 = arith.mulf %42, %20 : vector<8x128xf32>
    %53 = arith.addf %51, %52 : vector<8x128xf32>
    %54 = arith.index_cast %22 : i32 to index
    %c0_20 = arith.constant 0 : index
    %55 = vector.load %arg7[%54, %c0_20] : memref<64x128xf32, #tpu.memory_space<vmem>>, vector<8x128xf32>
    tpu.vector_store %arg7[%54, %c0_20], %53 {strides = array<i32>} : memref<64x128xf32, #tpu.memory_space<vmem>>, vector<8x128xf32>,
    %c1_i32 = arith.constant 1 : i32
    %c8_i32_21 = arith.constant 8 : i32
    %56 = arith.muli %c1_i32, %c8_i32_21 : i32
    %57 = tpu.assume_multiple %56, 8 : i32
    %58 = arith.index_cast %57 : i32 to index
    %c0_22 = arith.constant 0 : index
    %59 = vector.load %arg9[%58, %c0_22] : memref<64x384xf32, #tpu.memory_space<vmem>>, vector<8x384xf32>
    %60 = arith.truncf %53 : vector<8x128xf32> to vector<8x128xbf16>
    %cst_23 = arith.constant dense<0.000000e+00> : vector<8x384xf32>
    %61 = tpu.matmul %60, %15, %cst_23 {dimension_numbers = #tpu.dot_dimension_numbers<[1], [0], [0], [1], [0, 0, 1, 1], [], []>} : vector<8x128xbf16>, vector<128x384xbf16>, vector<8x384xf32> -> vector<8x384xf32>
    %62 = vector.extract_strided_slice %59 {offsets = [0, 0], sizes = [8, 128], strides = [1, 1]} : vector<8x384xf32> to vector<8x128xf32>
    %63 = vector.extract_strided_slice %61 {offsets = [0, 0], sizes = [8, 128], strides = [1, 1]} : vector<8x384xf32> to vector<8x128xf32>
    %64 = arith.addf %62, %63 : vector<8x128xf32>
    %65 = arith.negf %64 : vector<8x128xf32>
    %66 = math.exp %65 : vector<8x128xf32>
    %cst_24 = arith.constant 1.000000e+00 : f32
    %67 = vector.broadcast %cst_24 : f32 to vector<8x128xf32>
    %68 = arith.addf %67, %66 : vector<8x128xf32>
    %69 = arith.divf %67, %68 : vector<8x128xf32>
    %70 = vector.extract_strided_slice %59 {offsets = [0, 128], sizes = [8, 128], strides = [1, 1]} : vector<8x384xf32> to vector<8x128xf32>
    %71 = vector.extract_strided_slice %61 {offsets = [0, 128], sizes = [8, 128], strides = [1, 1]} : vector<8x384xf32> to vector<8x128xf32>
    %72 = arith.addf %70, %71 : vector<8x128xf32>
    %73 = arith.negf %72 : vector<8x128xf32>
    %74 = math.exp %73 : vector<8x128xf32>
    %cst_25 = arith.constant 1.000000e+00 : f32
    %75 = vector.broadcast %cst_25 : f32 to vector<8x128xf32>
    %76 = arith.addf %75, %74 : vector<8x128xf32>
    %77 = arith.divf %75, %76 : vector<8x128xf32>
    %78 = vector.extract_strided_slice %59 {offsets = [0, 256], sizes = [8, 128], strides = [1, 1]} : vector<8x384xf32> to vector<8x128xf32>
    %79 = vector.extract_strided_slice %61 {offsets = [0, 256], sizes = [8, 128], strides = [1, 1]} : vector<8x384xf32> to vector<8x128xf32>
    %80 = arith.addf %79, %19 : vector<8x128xf32>
    %81 = arith.mulf %69, %80 : vector<8x128xf32>
    %82 = arith.addf %78, %81 : vector<8x128xf32>
    %83 = math.tanh %82 : vector<8x128xf32>
    %cst_26 = arith.constant 1.000000e+00 : f32
    %84 = vector.broadcast %cst_26 : f32 to vector<8x128xf32>
    %85 = arith.subf %84, %77 : vector<8x128xf32>
    %86 = arith.mulf %85, %83 : vector<8x128xf32>
    %87 = arith.mulf %77, %53 : vector<8x128xf32>
    %88 = arith.addf %86, %87 : vector<8x128xf32>
    %89 = arith.index_cast %57 : i32 to index
    %c0_27 = arith.constant 0 : index
    %90 = vector.load %arg7[%89, %c0_27] : memref<64x128xf32, #tpu.memory_space<vmem>>, vector<8x128xf32>
    tpu.vector_store %arg7[%89, %c0_27], %88 {strides = array<i32>} : memref<64x128xf32, #tpu.memory_space<vmem>>, vector<8x128xf32>,
    %c2_i32 = arith.constant 2 : i32
    %c8_i32_28 = arith.constant 8 : i32
    %91 = arith.muli %c2_i32, %c8_i32_28 : i32
    %92 = tpu.assume_multiple %91, 8 : i32
    %93 = arith.index_cast %92 : i32 to index
    %c0_29 = arith.constant 0 : index
    %94 = vector.load %arg9[%93, %c0_29] : memref<64x384xf32, #tpu.memory_space<vmem>>, vector<8x384xf32>
    %95 = arith.truncf %88 : vector<8x128xf32> to vector<8x128xbf16>
    %cst_30 = arith.constant dense<0.000000e+00> : vector<8x384xf32>
    %96 = tpu.matmul %95, %15, %cst_30 {dimension_numbers = #tpu.dot_dimension_numbers<[1], [0], [0], [1], [0, 0, 1, 1], [], []>} : vector<8x128xbf16>, vector<128x384xbf16>, vector<8x384xf32> -> vector<8x384xf32>
    %97 = vector.extract_strided_slice %94 {offsets = [0, 0], sizes = [8, 128], strides = [1, 1]} : vector<8x384xf32> to vector<8x128xf32>
    %98 = vector.extract_strided_slice %96 {offsets = [0, 0], sizes = [8, 128], strides = [1, 1]} : vector<8x384xf32> to vector<8x128xf32>
    %99 = arith.addf %97, %98 : vector<8x128xf32>
    %100 = arith.negf %99 : vector<8x128xf32>
    %101 = math.exp %100 : vector<8x128xf32>
    %cst_31 = arith.constant 1.000000e+00 : f32
    %102 = vector.broadcast %cst_31 : f32 to vector<8x128xf32>
    %103 = arith.addf %102, %101 : vector<8x128xf32>
    %104 = arith.divf %102, %103 : vector<8x128xf32>
    %105 = vector.extract_strided_slice %94 {offsets = [0, 128], sizes = [8, 128], strides = [1, 1]} : vector<8x384xf32> to vector<8x128xf32>
    %106 = vector.extract_strided_slice %96 {offsets = [0, 128], sizes = [8, 128], strides = [1, 1]} : vector<8x384xf32> to vector<8x128xf32>
    %107 = arith.addf %105, %106 : vector<8x128xf32>
    %108 = arith.negf %107 : vector<8x128xf32>
    %109 = math.exp %108 : vector<8x128xf32>
    %cst_32 = arith.constant 1.000000e+00 : f32
    %110 = vector.broadcast %cst_32 : f32 to vector<8x128xf32>
    %111 = arith.addf %110, %109 : vector<8x128xf32>
    %112 = arith.divf %110, %111 : vector<8x128xf32>
    %113 = vector.extract_strided_slice %94 {offsets = [0, 256], sizes = [8, 128], strides = [1, 1]} : vector<8x384xf32> to vector<8x128xf32>
    %114 = vector.extract_strided_slice %96 {offsets = [0, 256], sizes = [8, 128], strides = [1, 1]} : vector<8x384xf32> to vector<8x128xf32>
    %115 = arith.addf %114, %19 : vector<8x128xf32>
    %116 = arith.mulf %104, %115 : vector<8x128xf32>
    %117 = arith.addf %113, %116 : vector<8x128xf32>
    %118 = math.tanh %117 : vector<8x128xf32>
    %cst_33 = arith.constant 1.000000e+00 : f32
    %119 = vector.broadcast %cst_33 : f32 to vector<8x128xf32>
    %120 = arith.subf %119, %112 : vector<8x128xf32>
    %121 = arith.mulf %120, %118 : vector<8x128xf32>
    %122 = arith.mulf %112, %88 : vector<8x128xf32>
    %123 = arith.addf %121, %122 : vector<8x128xf32>
    %124 = arith.index_cast %92 : i32 to index
    %c0_34 = arith.constant 0 : index
    %125 = vector.load %arg7[%124, %c0_34] : memref<64x128xf32, #tpu.memory_space<vmem>>, vector<8x128xf32>
    tpu.vector_store %arg7[%124, %c0_34], %123 {strides = array<i32>} : memref<64x128xf32, #tpu.memory_space<vmem>>, vector<8x128xf32>,
    %c3_i32 = arith.constant 3 : i32
    %c8_i32_35 = arith.constant 8 : i32
    %126 = arith.muli %c3_i32, %c8_i32_35 : i32
    %127 = tpu.assume_multiple %126, 8 : i32
    %128 = arith.index_cast %127 : i32 to index
    %c0_36 = arith.constant 0 : index
    %129 = vector.load %arg9[%128, %c0_36] : memref<64x384xf32, #tpu.memory_space<vmem>>, vector<8x384xf32>
    %130 = arith.truncf %123 : vector<8x128xf32> to vector<8x128xbf16>
    %cst_37 = arith.constant dense<0.000000e+00> : vector<8x384xf32>
    %131 = tpu.matmul %130, %15, %cst_37 {dimension_numbers = #tpu.dot_dimension_numbers<[1], [0], [0], [1], [0, 0, 1, 1], [], []>} : vector<8x128xbf16>, vector<128x384xbf16>, vector<8x384xf32> -> vector<8x384xf32>
    %132 = vector.extract_strided_slice %129 {offsets = [0, 0], sizes = [8, 128], strides = [1, 1]} : vector<8x384xf32> to vector<8x128xf32>
    %133 = vector.extract_strided_slice %131 {offsets = [0, 0], sizes = [8, 128], strides = [1, 1]} : vector<8x384xf32> to vector<8x128xf32>
    %134 = arith.addf %132, %133 : vector<8x128xf32>
    %135 = arith.negf %134 : vector<8x128xf32>
    %136 = math.exp %135 : vector<8x128xf32>
    %cst_38 = arith.constant 1.000000e+00 : f32
    %137 = vector.broadcast %cst_38 : f32 to vector<8x128xf32>
    %138 = arith.addf %137, %136 : vector<8x128xf32>
    %139 = arith.divf %137, %138 : vector<8x128xf32>
    %140 = vector.extract_strided_slice %129 {offsets = [0, 128], sizes = [8, 128], strides = [1, 1]} : vector<8x384xf32> to vector<8x128xf32>
    %141 = vector.extract_strided_slice %131 {offsets = [0, 128], sizes = [8, 128], strides = [1, 1]} : vector<8x384xf32> to vector<8x128xf32>
    %142 = arith.addf %140, %141 : vector<8x128xf32>
    %143 = arith.negf %142 : vector<8x128xf32>
    %144 = math.exp %143 : vector<8x128xf32>
    %cst_39 = arith.constant 1.000000e+00 : f32
    %145 = vector.broadcast %cst_39 : f32 to vector<8x128xf32>
    %146 = arith.addf %145, %144 : vector<8x128xf32>
    %147 = arith.divf %145, %146 : vector<8x128xf32>
    %148 = vector.extract_strided_slice %129 {offsets = [0, 256], sizes = [8, 128], strides = [1, 1]} : vector<8x384xf32> to vector<8x128xf32>
    %149 = vector.extract_strided_slice %131 {offsets = [0, 256], sizes = [8, 128], strides = [1, 1]} : vector<8x384xf32> to vector<8x128xf32>
    %150 = arith.addf %149, %19 : vector<8x128xf32>
    %151 = arith.mulf %139, %150 : vector<8x128xf32>
    %152 = arith.addf %148, %151 : vector<8x128xf32>
    %153 = math.tanh %152 : vector<8x128xf32>
    %cst_40 = arith.constant 1.000000e+00 : f32
    %154 = vector.broadcast %cst_40 : f32 to vector<8x128xf32>
    %155 = arith.subf %154, %147 : vector<8x128xf32>
    %156 = arith.mulf %155, %153 : vector<8x128xf32>
    %157 = arith.mulf %147, %123 : vector<8x128xf32>
    %158 = arith.addf %156, %157 : vector<8x128xf32>
    %159 = arith.index_cast %127 : i32 to index
    %c0_41 = arith.constant 0 : index
    %160 = vector.load %arg7[%159, %c0_41] : memref<64x128xf32, #tpu.memory_space<vmem>>, vector<8x128xf32>
    tpu.vector_store %arg7[%159, %c0_41], %158 {strides = array<i32>} : memref<64x128xf32, #tpu.memory_space<vmem>>, vector<8x128xf32>,
    %c4_i32 = arith.constant 4 : i32
    %c8_i32_42 = arith.constant 8 : i32
    %161 = arith.muli %c4_i32, %c8_i32_42 : i32
    %162 = tpu.assume_multiple %161, 8 : i32
    %163 = arith.index_cast %162 : i32 to index
    %c0_43 = arith.constant 0 : index
    %164 = vector.load %arg9[%163, %c0_43] : memref<64x384xf32, #tpu.memory_space<vmem>>, vector<8x384xf32>
    %165 = arith.truncf %158 : vector<8x128xf32> to vector<8x128xbf16>
    %cst_44 = arith.constant dense<0.000000e+00> : vector<8x384xf32>
    %166 = tpu.matmul %165, %15, %cst_44 {dimension_numbers = #tpu.dot_dimension_numbers<[1], [0], [0], [1], [0, 0, 1, 1], [], []>} : vector<8x128xbf16>, vector<128x384xbf16>, vector<8x384xf32> -> vector<8x384xf32>
    %167 = vector.extract_strided_slice %164 {offsets = [0, 0], sizes = [8, 128], strides = [1, 1]} : vector<8x384xf32> to vector<8x128xf32>
    %168 = vector.extract_strided_slice %166 {offsets = [0, 0], sizes = [8, 128], strides = [1, 1]} : vector<8x384xf32> to vector<8x128xf32>
    %169 = arith.addf %167, %168 : vector<8x128xf32>
    %170 = arith.negf %169 : vector<8x128xf32>
    %171 = math.exp %170 : vector<8x128xf32>
    %cst_45 = arith.constant 1.000000e+00 : f32
    %172 = vector.broadcast %cst_45 : f32 to vector<8x128xf32>
    %173 = arith.addf %172, %171 : vector<8x128xf32>
    %174 = arith.divf %172, %173 : vector<8x128xf32>
    %175 = vector.extract_strided_slice %164 {offsets = [0, 128], sizes = [8, 128], strides = [1, 1]} : vector<8x384xf32> to vector<8x128xf32>
    %176 = vector.extract_strided_slice %166 {offsets = [0, 128], sizes = [8, 128], strides = [1, 1]} : vector<8x384xf32> to vector<8x128xf32>
    %177 = arith.addf %175, %176 : vector<8x128xf32>
    %178 = arith.negf %177 : vector<8x128xf32>
    %179 = math.exp %178 : vector<8x128xf32>
    %cst_46 = arith.constant 1.000000e+00 : f32
    %180 = vector.broadcast %cst_46 : f32 to vector<8x128xf32>
    %181 = arith.addf %180, %179 : vector<8x128xf32>
    %182 = arith.divf %180, %181 : vector<8x128xf32>
    %183 = vector.extract_strided_slice %164 {offsets = [0, 256], sizes = [8, 128], strides = [1, 1]} : vector<8x384xf32> to vector<8x128xf32>
    %184 = vector.extract_strided_slice %166 {offsets = [0, 256], sizes = [8, 128], strides = [1, 1]} : vector<8x384xf32> to vector<8x128xf32>
    %185 = arith.addf %184, %19 : vector<8x128xf32>
    %186 = arith.mulf %174, %185 : vector<8x128xf32>
    %187 = arith.addf %183, %186 : vector<8x128xf32>
    %188 = math.tanh %187 : vector<8x128xf32>
    %cst_47 = arith.constant 1.000000e+00 : f32
    %189 = vector.broadcast %cst_47 : f32 to vector<8x128xf32>
    %190 = arith.subf %189, %182 : vector<8x128xf32>
    %191 = arith.mulf %190, %188 : vector<8x128xf32>
    %192 = arith.mulf %182, %158 : vector<8x128xf32>
    %193 = arith.addf %191, %192 : vector<8x128xf32>
    %194 = arith.index_cast %162 : i32 to index
    %c0_48 = arith.constant 0 : index
    %195 = vector.load %arg7[%194, %c0_48] : memref<64x128xf32, #tpu.memory_space<vmem>>, vector<8x128xf32>
    tpu.vector_store %arg7[%194, %c0_48], %193 {strides = array<i32>} : memref<64x128xf32, #tpu.memory_space<vmem>>, vector<8x128xf32>,
    %c5_i32 = arith.constant 5 : i32
    %c8_i32_49 = arith.constant 8 : i32
    %196 = arith.muli %c5_i32, %c8_i32_49 : i32
    %197 = tpu.assume_multiple %196, 8 : i32
    %198 = arith.index_cast %197 : i32 to index
    %c0_50 = arith.constant 0 : index
    %199 = vector.load %arg9[%198, %c0_50] : memref<64x384xf32, #tpu.memory_space<vmem>>, vector<8x384xf32>
    %200 = arith.truncf %193 : vector<8x128xf32> to vector<8x128xbf16>
    %cst_51 = arith.constant dense<0.000000e+00> : vector<8x384xf32>
    %201 = tpu.matmul %200, %15, %cst_51 {dimension_numbers = #tpu.dot_dimension_numbers<[1], [0], [0], [1], [0, 0, 1, 1], [], []>} : vector<8x128xbf16>, vector<128x384xbf16>, vector<8x384xf32> -> vector<8x384xf32>
    %202 = vector.extract_strided_slice %199 {offsets = [0, 0], sizes = [8, 128], strides = [1, 1]} : vector<8x384xf32> to vector<8x128xf32>
    %203 = vector.extract_strided_slice %201 {offsets = [0, 0], sizes = [8, 128], strides = [1, 1]} : vector<8x384xf32> to vector<8x128xf32>
    %204 = arith.addf %202, %203 : vector<8x128xf32>
    %205 = arith.negf %204 : vector<8x128xf32>
    %206 = math.exp %205 : vector<8x128xf32>
    %cst_52 = arith.constant 1.000000e+00 : f32
    %207 = vector.broadcast %cst_52 : f32 to vector<8x128xf32>
    %208 = arith.addf %207, %206 : vector<8x128xf32>
    %209 = arith.divf %207, %208 : vector<8x128xf32>
    %210 = vector.extract_strided_slice %199 {offsets = [0, 128], sizes = [8, 128], strides = [1, 1]} : vector<8x384xf32> to vector<8x128xf32>
    %211 = vector.extract_strided_slice %201 {offsets = [0, 128], sizes = [8, 128], strides = [1, 1]} : vector<8x384xf32> to vector<8x128xf32>
    %212 = arith.addf %210, %211 : vector<8x128xf32>
    %213 = arith.negf %212 : vector<8x128xf32>
    %214 = math.exp %213 : vector<8x128xf32>
    %cst_53 = arith.constant 1.000000e+00 : f32
    %215 = vector.broadcast %cst_53 : f32 to vector<8x128xf32>
    %216 = arith.addf %215, %214 : vector<8x128xf32>
    %217 = arith.divf %215, %216 : vector<8x128xf32>
    %218 = vector.extract_strided_slice %199 {offsets = [0, 256], sizes = [8, 128], strides = [1, 1]} : vector<8x384xf32> to vector<8x128xf32>
    %219 = vector.extract_strided_slice %201 {offsets = [0, 256], sizes = [8, 128], strides = [1, 1]} : vector<8x384xf32> to vector<8x128xf32>
    %220 = arith.addf %219, %19 : vector<8x128xf32>
    %221 = arith.mulf %209, %220 : vector<8x128xf32>
    %222 = arith.addf %218, %221 : vector<8x128xf32>
    %223 = math.tanh %222 : vector<8x128xf32>
    %cst_54 = arith.constant 1.000000e+00 : f32
    %224 = vector.broadcast %cst_54 : f32 to vector<8x128xf32>
    %225 = arith.subf %224, %217 : vector<8x128xf32>
    %226 = arith.mulf %225, %223 : vector<8x128xf32>
    %227 = arith.mulf %217, %193 : vector<8x128xf32>
    %228 = arith.addf %226, %227 : vector<8x128xf32>
    %229 = arith.index_cast %197 : i32 to index
    %c0_55 = arith.constant 0 : index
    %230 = vector.load %arg7[%229, %c0_55] : memref<64x128xf32, #tpu.memory_space<vmem>>, vector<8x128xf32>
    tpu.vector_store %arg7[%229, %c0_55], %228 {strides = array<i32>} : memref<64x128xf32, #tpu.memory_space<vmem>>, vector<8x128xf32>,
    %c6_i32 = arith.constant 6 : i32
    %c8_i32_56 = arith.constant 8 : i32
    %231 = arith.muli %c6_i32, %c8_i32_56 : i32
    %232 = tpu.assume_multiple %231, 8 : i32
    %233 = arith.index_cast %232 : i32 to index
    %c0_57 = arith.constant 0 : index
    %234 = vector.load %arg9[%233, %c0_57] : memref<64x384xf32, #tpu.memory_space<vmem>>, vector<8x384xf32>
    %235 = arith.truncf %228 : vector<8x128xf32> to vector<8x128xbf16>
    %cst_58 = arith.constant dense<0.000000e+00> : vector<8x384xf32>
    %236 = tpu.matmul %235, %15, %cst_58 {dimension_numbers = #tpu.dot_dimension_numbers<[1], [0], [0], [1], [0, 0, 1, 1], [], []>} : vector<8x128xbf16>, vector<128x384xbf16>, vector<8x384xf32> -> vector<8x384xf32>
    %237 = vector.extract_strided_slice %234 {offsets = [0, 0], sizes = [8, 128], strides = [1, 1]} : vector<8x384xf32> to vector<8x128xf32>
    %238 = vector.extract_strided_slice %236 {offsets = [0, 0], sizes = [8, 128], strides = [1, 1]} : vector<8x384xf32> to vector<8x128xf32>
    %239 = arith.addf %237, %238 : vector<8x128xf32>
    %240 = arith.negf %239 : vector<8x128xf32>
    %241 = math.exp %240 : vector<8x128xf32>
    %cst_59 = arith.constant 1.000000e+00 : f32
    %242 = vector.broadcast %cst_59 : f32 to vector<8x128xf32>
    %243 = arith.addf %242, %241 : vector<8x128xf32>
    %244 = arith.divf %242, %243 : vector<8x128xf32>
    %245 = vector.extract_strided_slice %234 {offsets = [0, 128], sizes = [8, 128], strides = [1, 1]} : vector<8x384xf32> to vector<8x128xf32>
    %246 = vector.extract_strided_slice %236 {offsets = [0, 128], sizes = [8, 128], strides = [1, 1]} : vector<8x384xf32> to vector<8x128xf32>
    %247 = arith.addf %245, %246 : vector<8x128xf32>
    %248 = arith.negf %247 : vector<8x128xf32>
    %249 = math.exp %248 : vector<8x128xf32>
    %cst_60 = arith.constant 1.000000e+00 : f32
    %250 = vector.broadcast %cst_60 : f32 to vector<8x128xf32>
    %251 = arith.addf %250, %249 : vector<8x128xf32>
    %252 = arith.divf %250, %251 : vector<8x128xf32>
    %253 = vector.extract_strided_slice %234 {offsets = [0, 256], sizes = [8, 128], strides = [1, 1]} : vector<8x384xf32> to vector<8x128xf32>
    %254 = vector.extract_strided_slice %236 {offsets = [0, 256], sizes = [8, 128], strides = [1, 1]} : vector<8x384xf32> to vector<8x128xf32>
    %255 = arith.addf %254, %19 : vector<8x128xf32>
    %256 = arith.mulf %244, %255 : vector<8x128xf32>
    %257 = arith.addf %253, %256 : vector<8x128xf32>
    %258 = math.tanh %257 : vector<8x128xf32>
    %cst_61 = arith.constant 1.000000e+00 : f32
    %259 = vector.broadcast %cst_61 : f32 to vector<8x128xf32>
    %260 = arith.subf %259, %252 : vector<8x128xf32>
    %261 = arith.mulf %260, %258 : vector<8x128xf32>
    %262 = arith.mulf %252, %228 : vector<8x128xf32>
    %263 = arith.addf %261, %262 : vector<8x128xf32>
    %264 = arith.index_cast %232 : i32 to index
    %c0_62 = arith.constant 0 : index
    %265 = vector.load %arg7[%264, %c0_62] : memref<64x128xf32, #tpu.memory_space<vmem>>, vector<8x128xf32>
    tpu.vector_store %arg7[%264, %c0_62], %263 {strides = array<i32>} : memref<64x128xf32, #tpu.memory_space<vmem>>, vector<8x128xf32>,
    %c7_i32 = arith.constant 7 : i32
    %c8_i32_63 = arith.constant 8 : i32
    %266 = arith.muli %c7_i32, %c8_i32_63 : i32
    %267 = tpu.assume_multiple %266, 8 : i32
    %268 = arith.index_cast %267 : i32 to index
    %c0_64 = arith.constant 0 : index
    %269 = vector.load %arg9[%268, %c0_64] : memref<64x384xf32, #tpu.memory_space<vmem>>, vector<8x384xf32>
    %270 = arith.truncf %263 : vector<8x128xf32> to vector<8x128xbf16>
    %cst_65 = arith.constant dense<0.000000e+00> : vector<8x384xf32>
    %271 = tpu.matmul %270, %15, %cst_65 {dimension_numbers = #tpu.dot_dimension_numbers<[1], [0], [0], [1], [0, 0, 1, 1], [], []>} : vector<8x128xbf16>, vector<128x384xbf16>, vector<8x384xf32> -> vector<8x384xf32>
    %272 = vector.extract_strided_slice %269 {offsets = [0, 0], sizes = [8, 128], strides = [1, 1]} : vector<8x384xf32> to vector<8x128xf32>
    %273 = vector.extract_strided_slice %271 {offsets = [0, 0], sizes = [8, 128], strides = [1, 1]} : vector<8x384xf32> to vector<8x128xf32>
    %274 = arith.addf %272, %273 : vector<8x128xf32>
    %275 = arith.negf %274 : vector<8x128xf32>
    %276 = math.exp %275 : vector<8x128xf32>
    %cst_66 = arith.constant 1.000000e+00 : f32
    %277 = vector.broadcast %cst_66 : f32 to vector<8x128xf32>
    %278 = arith.addf %277, %276 : vector<8x128xf32>
    %279 = arith.divf %277, %278 : vector<8x128xf32>
    %280 = vector.extract_strided_slice %269 {offsets = [0, 128], sizes = [8, 128], strides = [1, 1]} : vector<8x384xf32> to vector<8x128xf32>
    %281 = vector.extract_strided_slice %271 {offsets = [0, 128], sizes = [8, 128], strides = [1, 1]} : vector<8x384xf32> to vector<8x128xf32>
    %282 = arith.addf %280, %281 : vector<8x128xf32>
    %283 = arith.negf %282 : vector<8x128xf32>
    %284 = math.exp %283 : vector<8x128xf32>
    %cst_67 = arith.constant 1.000000e+00 : f32
    %285 = vector.broadcast %cst_67 : f32 to vector<8x128xf32>
    %286 = arith.addf %285, %284 : vector<8x128xf32>
    %287 = arith.divf %285, %286 : vector<8x128xf32>
    %288 = vector.extract_strided_slice %269 {offsets = [0, 256], sizes = [8, 128], strides = [1, 1]} : vector<8x384xf32> to vector<8x128xf32>
    %289 = vector.extract_strided_slice %271 {offsets = [0, 256], sizes = [8, 128], strides = [1, 1]} : vector<8x384xf32> to vector<8x128xf32>
    %290 = arith.addf %289, %19 : vector<8x128xf32>
    %291 = arith.mulf %279, %290 : vector<8x128xf32>
    %292 = arith.addf %288, %291 : vector<8x128xf32>
    %293 = math.tanh %292 : vector<8x128xf32>
    %cst_68 = arith.constant 1.000000e+00 : f32
    %294 = vector.broadcast %cst_68 : f32 to vector<8x128xf32>
    %295 = arith.subf %294, %287 : vector<8x128xf32>
    %296 = arith.mulf %295, %293 : vector<8x128xf32>
    %297 = arith.mulf %287, %263 : vector<8x128xf32>
    %298 = arith.addf %296, %297 : vector<8x128xf32>
    %299 = arith.index_cast %267 : i32 to index
    %c0_69 = arith.constant 0 : index
    %300 = vector.load %arg7[%299, %c0_69] : memref<64x128xf32, #tpu.memory_space<vmem>>, vector<8x128xf32>
    tpu.vector_store %arg7[%299, %c0_69], %298 {strides = array<i32>} : memref<64x128xf32, #tpu.memory_space<vmem>>, vector<8x128xf32>,
    %c8_i32_70 = arith.constant 8 : i32
    %c0_71 = arith.constant 0 : index
    %c0_72 = arith.constant 0 : index
    %c0_73 = arith.constant 0 : index
    %301 = vector.load %arg8[%c0_71, %c0_72, %c0_73] : memref<2x8x128xf32, #tpu.memory_space<vmem>>, vector<1x8x128xf32>
    %302 = vector.shape_cast %301 : vector<1x8x128xf32> to vector<8x128xf32>
    %303 = vector.shape_cast %298 : vector<8x128xf32> to vector<1x8x128xf32>
    tpu.vector_store %arg8[%c0_71, %c0_72, %c0_73], %303 {strides = array<i32>} : memref<2x8x128xf32, #tpu.memory_space<vmem>>, vector<1x8x128xf32>,
    %c0_74 = arith.constant 0 : index
    %c0_75 = arith.constant 0 : index
    %304 = vector.load %arg7[%c0_74, %c0_75] : memref<64x128xf32, #tpu.memory_space<vmem>>, vector<64x128xf32>
    %305 = arith.truncf %304 : vector<64x128xf32> to vector<64x128xbf16>
    %c0_76 = arith.constant 0 : index
    %c0_77 = arith.constant 0 : index
    %c0_78 = arith.constant 0 : index
    %306 = vector.load %arg3[%c0_76, %c0_77, %c0_78] : memref<1x128x384xbf16, #tpu.memory_space<vmem>>, vector<1x128x384xbf16>
    %307 = vector.shape_cast %306 : vector<1x128x384xbf16> to vector<128x384xbf16>
    %cst_79 = arith.constant dense<0.000000e+00> : vector<64x384xf32>
    %308 = tpu.matmul %305, %307, %cst_79 {dimension_numbers = #tpu.dot_dimension_numbers<[1], [0], [0], [1], [0, 0, 1, 1], [], []>} : vector<64x128xbf16>, vector<128x384xbf16>, vector<64x384xf32> -> vector<64x384xf32>
    %c1 = arith.constant 1 : index
    %c0_80 = arith.constant 0 : index
    %c0_81 = arith.constant 0 : index
    %309 = vector.load %arg5[%c1, %c0_80, %c0_81] : memref<2x1x384xf32, #tpu.memory_space<vmem>>, vector<1x1x384xf32>
    %310 = vector.shape_cast %309 : vector<1x1x384xf32> to vector<1x384xf32>
    %311 = vector.broadcast %310 : vector<1x384xf32> to vector<64x384xf32>
    %312 = arith.addf %308, %311 : vector<64x384xf32>
    %c0_82 = arith.constant 0 : index
    %c0_83 = arith.constant 0 : index
    %313 = vector.load %arg9[%c0_82, %c0_83] : memref<64x384xf32, #tpu.memory_space<vmem>>, vector<64x384xf32>
    tpu.vector_store %arg9[%c0_82, %c0_83], %312 {strides = array<i32>} : memref<64x384xf32, #tpu.memory_space<vmem>>, vector<64x384xf32>,
    %c1_84 = arith.constant 1 : index
    %c0_85 = arith.constant 0 : index
    %c0_86 = arith.constant 0 : index
    %314 = vector.load %arg4[%c1_84, %c0_85, %c0_86] : memref<2x128x384xbf16, #tpu.memory_space<vmem>>, vector<1x128x384xbf16>
    %315 = vector.shape_cast %314 : vector<1x128x384xbf16> to vector<128x384xbf16>
    %c1_87 = arith.constant 1 : index
    %c0_88 = arith.constant 0 : index
    %c0_89 = arith.constant 0 : index
    %316 = vector.load %arg6[%c1_87, %c0_88, %c0_89] : memref<2x1x128xf32, #tpu.memory_space<vmem>>, vector<1x1x128xf32>
    %317 = vector.shape_cast %316 : vector<1x1x128xf32> to vector<1x128xf32>
    %318 = vector.shape_cast %317 : vector<1x128xf32> to vector<1x128xf32>
    %319 = vector.broadcast %318 : vector<1x128xf32> to vector<8x128xf32>
    %cst_90 = arith.constant 0.000000e+00 : f32
    %320 = vector.broadcast %cst_90 : f32 to vector<8x128xf32>
    %c0_i32_91 = arith.constant 0 : i32
    %c8_i32_92 = arith.constant 8 : i32
    %321 = arith.muli %c0_i32_91, %c8_i32_92 : i32
    %322 = tpu.assume_multiple %321, 8 : i32
    %323 = arith.index_cast %322 : i32 to index
    %c0_93 = arith.constant 0 : index
    %324 = vector.load %arg9[%323, %c0_93] : memref<64x384xf32, #tpu.memory_space<vmem>>, vector<8x384xf32>
    %325 = arith.truncf %320 : vector<8x128xf32> to vector<8x128xbf16>
    %cst_94 = arith.constant dense<0.000000e+00> : vector<8x384xf32>
    %326 = tpu.matmul %325, %315, %cst_94 {dimension_numbers = #tpu.dot_dimension_numbers<[1], [0], [0], [1], [0, 0, 1, 1], [], []>} : vector<8x128xbf16>, vector<128x384xbf16>, vector<8x384xf32> -> vector<8x384xf32>
    %327 = vector.extract_strided_slice %324 {offsets = [0, 0], sizes = [8, 128], strides = [1, 1]} : vector<8x384xf32> to vector<8x128xf32>
    %328 = vector.extract_strided_slice %326 {offsets = [0, 0], sizes = [8, 128], strides = [1, 1]} : vector<8x384xf32> to vector<8x128xf32>
    %329 = arith.addf %327, %328 : vector<8x128xf32>
    %330 = arith.negf %329 : vector<8x128xf32>
    %331 = math.exp %330 : vector<8x128xf32>
    %cst_95 = arith.constant 1.000000e+00 : f32
    %332 = vector.broadcast %cst_95 : f32 to vector<8x128xf32>
    %333 = arith.addf %332, %331 : vector<8x128xf32>
    %334 = arith.divf %332, %333 : vector<8x128xf32>
    %335 = vector.extract_strided_slice %324 {offsets = [0, 128], sizes = [8, 128], strides = [1, 1]} : vector<8x384xf32> to vector<8x128xf32>
    %336 = vector.extract_strided_slice %326 {offsets = [0, 128], sizes = [8, 128], strides = [1, 1]} : vector<8x384xf32> to vector<8x128xf32>
    %337 = arith.addf %335, %336 : vector<8x128xf32>
    %338 = arith.negf %337 : vector<8x128xf32>
    %339 = math.exp %338 : vector<8x128xf32>
    %cst_96 = arith.constant 1.000000e+00 : f32
    %340 = vector.broadcast %cst_96 : f32 to vector<8x128xf32>
    %341 = arith.addf %340, %339 : vector<8x128xf32>
    %342 = arith.divf %340, %341 : vector<8x128xf32>
    %343 = vector.extract_strided_slice %324 {offsets = [0, 256], sizes = [8, 128], strides = [1, 1]} : vector<8x384xf32> to vector<8x128xf32>
    %344 = vector.extract_strided_slice %326 {offsets = [0, 256], sizes = [8, 128], strides = [1, 1]} : vector<8x384xf32> to vector<8x128xf32>
    %345 = arith.addf %344, %319 : vector<8x128xf32>
    %346 = arith.mulf %334, %345 : vector<8x128xf32>
    %347 = arith.addf %343, %346 : vector<8x128xf32>
    %348 = math.tanh %347 : vector<8x128xf32>
    %cst_97 = arith.constant 1.000000e+00 : f32
    %349 = vector.broadcast %cst_97 : f32 to vector<8x128xf32>
    %350 = arith.subf %349, %342 : vector<8x128xf32>
    %351 = arith.mulf %350, %348 : vector<8x128xf32>
    %352 = arith.mulf %342, %320 : vector<8x128xf32>
    %353 = arith.addf %351, %352 : vector<8x128xf32>
    %354 = arith.index_cast %322 : i32 to index
    %c0_98 = arith.constant 0 : index
    %355 = vector.load %arg7[%354, %c0_98] : memref<64x128xf32, #tpu.memory_space<vmem>>, vector<8x128xf32>
    tpu.vector_store %arg7[%354, %c0_98], %353 {strides = array<i32>} : memref<64x128xf32, #tpu.memory_space<vmem>>, vector<8x128xf32>,
    %c1_i32_99 = arith.constant 1 : i32
    %c8_i32_100 = arith.constant 8 : i32
    %356 = arith.muli %c1_i32_99, %c8_i32_100 : i32
    %357 = tpu.assume_multiple %356, 8 : i32
    %358 = arith.index_cast %357 : i32 to index
    %c0_101 = arith.constant 0 : index
    %359 = vector.load %arg9[%358, %c0_101] : memref<64x384xf32, #tpu.memory_space<vmem>>, vector<8x384xf32>
    %360 = arith.truncf %353 : vector<8x128xf32> to vector<8x128xbf16>
    %cst_102 = arith.constant dense<0.000000e+00> : vector<8x384xf32>
    %361 = tpu.matmul %360, %315, %cst_102 {dimension_numbers = #tpu.dot_dimension_numbers<[1], [0], [0], [1], [0, 0, 1, 1], [], []>} : vector<8x128xbf16>, vector<128x384xbf16>, vector<8x384xf32> -> vector<8x384xf32>
    %362 = vector.extract_strided_slice %359 {offsets = [0, 0], sizes = [8, 128], strides = [1, 1]} : vector<8x384xf32> to vector<8x128xf32>
    %363 = vector.extract_strided_slice %361 {offsets = [0, 0], sizes = [8, 128], strides = [1, 1]} : vector<8x384xf32> to vector<8x128xf32>
    %364 = arith.addf %362, %363 : vector<8x128xf32>
    %365 = arith.negf %364 : vector<8x128xf32>
    %366 = math.exp %365 : vector<8x128xf32>
    %cst_103 = arith.constant 1.000000e+00 : f32
    %367 = vector.broadcast %cst_103 : f32 to vector<8x128xf32>
    %368 = arith.addf %367, %366 : vector<8x128xf32>
    %369 = arith.divf %367, %368 : vector<8x128xf32>
    %370 = vector.extract_strided_slice %359 {offsets = [0, 128], sizes = [8, 128], strides = [1, 1]} : vector<8x384xf32> to vector<8x128xf32>
    %371 = vector.extract_strided_slice %361 {offsets = [0, 128], sizes = [8, 128], strides = [1, 1]} : vector<8x384xf32> to vector<8x128xf32>
    %372 = arith.addf %370, %371 : vector<8x128xf32>
    %373 = arith.negf %372 : vector<8x128xf32>
    %374 = math.exp %373 : vector<8x128xf32>
    %cst_104 = arith.constant 1.000000e+00 : f32
    %375 = vector.broadcast %cst_104 : f32 to vector<8x128xf32>
    %376 = arith.addf %375, %374 : vector<8x128xf32>
    %377 = arith.divf %375, %376 : vector<8x128xf32>
    %378 = vector.extract_strided_slice %359 {offsets = [0, 256], sizes = [8, 128], strides = [1, 1]} : vector<8x384xf32> to vector<8x128xf32>
    %379 = vector.extract_strided_slice %361 {offsets = [0, 256], sizes = [8, 128], strides = [1, 1]} : vector<8x384xf32> to vector<8x128xf32>
    %380 = arith.addf %379, %319 : vector<8x128xf32>
    %381 = arith.mulf %369, %380 : vector<8x128xf32>
    %382 = arith.addf %378, %381 : vector<8x128xf32>
    %383 = math.tanh %382 : vector<8x128xf32>
    %cst_105 = arith.constant 1.000000e+00 : f32
    %384 = vector.broadcast %cst_105 : f32 to vector<8x128xf32>
    %385 = arith.subf %384, %377 : vector<8x128xf32>
    %386 = arith.mulf %385, %383 : vector<8x128xf32>
    %387 = arith.mulf %377, %353 : vector<8x128xf32>
    %388 = arith.addf %386, %387 : vector<8x128xf32>
    %389 = arith.index_cast %357 : i32 to index
    %c0_106 = arith.constant 0 : index
    %390 = vector.load %arg7[%389, %c0_106] : memref<64x128xf32, #tpu.memory_space<vmem>>, vector<8x128xf32>
    tpu.vector_store %arg7[%389, %c0_106], %388 {strides = array<i32>} : memref<64x128xf32, #tpu.memory_space<vmem>>, vector<8x128xf32>,
    %c2_i32_107 = arith.constant 2 : i32
    %c8_i32_108 = arith.constant 8 : i32
    %391 = arith.muli %c2_i32_107, %c8_i32_108 : i32
    %392 = tpu.assume_multiple %391, 8 : i32
    %393 = arith.index_cast %392 : i32 to index
    %c0_109 = arith.constant 0 : index
    %394 = vector.load %arg9[%393, %c0_109] : memref<64x384xf32, #tpu.memory_space<vmem>>, vector<8x384xf32>
    %395 = arith.truncf %388 : vector<8x128xf32> to vector<8x128xbf16>
    %cst_110 = arith.constant dense<0.000000e+00> : vector<8x384xf32>
    %396 = tpu.matmul %395, %315, %cst_110 {dimension_numbers = #tpu.dot_dimension_numbers<[1], [0], [0], [1], [0, 0, 1, 1], [], []>} : vector<8x128xbf16>, vector<128x384xbf16>, vector<8x384xf32> -> vector<8x384xf32>
    %397 = vector.extract_strided_slice %394 {offsets = [0, 0], sizes = [8, 128], strides = [1, 1]} : vector<8x384xf32> to vector<8x128xf32>
    %398 = vector.extract_strided_slice %396 {offsets = [0, 0], sizes = [8, 128], strides = [1, 1]} : vector<8x384xf32> to vector<8x128xf32>
    %399 = arith.addf %397, %398 : vector<8x128xf32>
    %400 = arith.negf %399 : vector<8x128xf32>
    %401 = math.exp %400 : vector<8x128xf32>
    %cst_111 = arith.constant 1.000000e+00 : f32
    %402 = vector.broadcast %cst_111 : f32 to vector<8x128xf32>
    %403 = arith.addf %402, %401 : vector<8x128xf32>
    %404 = arith.divf %402, %403 : vector<8x128xf32>
    %405 = vector.extract_strided_slice %394 {offsets = [0, 128], sizes = [8, 128], strides = [1, 1]} : vector<8x384xf32> to vector<8x128xf32>
    %406 = vector.extract_strided_slice %396 {offsets = [0, 128], sizes = [8, 128], strides = [1, 1]} : vector<8x384xf32> to vector<8x128xf32>
    %407 = arith.addf %405, %406 : vector<8x128xf32>
    %408 = arith.negf %407 : vector<8x128xf32>
    %409 = math.exp %408 : vector<8x128xf32>
    %cst_112 = arith.constant 1.000000e+00 : f32
    %410 = vector.broadcast %cst_112 : f32 to vector<8x128xf32>
    %411 = arith.addf %410, %409 : vector<8x128xf32>
    %412 = arith.divf %410, %411 : vector<8x128xf32>
    %413 = vector.extract_strided_slice %394 {offsets = [0, 256], sizes = [8, 128], strides = [1, 1]} : vector<8x384xf32> to vector<8x128xf32>
    %414 = vector.extract_strided_slice %396 {offsets = [0, 256], sizes = [8, 128], strides = [1, 1]} : vector<8x384xf32> to vector<8x128xf32>
    %415 = arith.addf %414, %319 : vector<8x128xf32>
    %416 = arith.mulf %404, %415 : vector<8x128xf32>
    %417 = arith.addf %413, %416 : vector<8x128xf32>
    %418 = math.tanh %417 : vector<8x128xf32>
    %cst_113 = arith.constant 1.000000e+00 : f32
    %419 = vector.broadcast %cst_113 : f32 to vector<8x128xf32>
    %420 = arith.subf %419, %412 : vector<8x128xf32>
    %421 = arith.mulf %420, %418 : vector<8x128xf32>
    %422 = arith.mulf %412, %388 : vector<8x128xf32>
    %423 = arith.addf %421, %422 : vector<8x128xf32>
    %424 = arith.index_cast %392 : i32 to index
    %c0_114 = arith.constant 0 : index
    %425 = vector.load %arg7[%424, %c0_114] : memref<64x128xf32, #tpu.memory_space<vmem>>, vector<8x128xf32>
    tpu.vector_store %arg7[%424, %c0_114], %423 {strides = array<i32>} : memref<64x128xf32, #tpu.memory_space<vmem>>, vector<8x128xf32>,
    %c3_i32_115 = arith.constant 3 : i32
    %c8_i32_116 = arith.constant 8 : i32
    %426 = arith.muli %c3_i32_115, %c8_i32_116 : i32
    %427 = tpu.assume_multiple %426, 8 : i32
    %428 = arith.index_cast %427 : i32 to index
    %c0_117 = arith.constant 0 : index
    %429 = vector.load %arg9[%428, %c0_117] : memref<64x384xf32, #tpu.memory_space<vmem>>, vector<8x384xf32>
    %430 = arith.truncf %423 : vector<8x128xf32> to vector<8x128xbf16>
    %cst_118 = arith.constant dense<0.000000e+00> : vector<8x384xf32>
    %431 = tpu.matmul %430, %315, %cst_118 {dimension_numbers = #tpu.dot_dimension_numbers<[1], [0], [0], [1], [0, 0, 1, 1], [], []>} : vector<8x128xbf16>, vector<128x384xbf16>, vector<8x384xf32> -> vector<8x384xf32>
    %432 = vector.extract_strided_slice %429 {offsets = [0, 0], sizes = [8, 128], strides = [1, 1]} : vector<8x384xf32> to vector<8x128xf32>
    %433 = vector.extract_strided_slice %431 {offsets = [0, 0], sizes = [8, 128], strides = [1, 1]} : vector<8x384xf32> to vector<8x128xf32>
    %434 = arith.addf %432, %433 : vector<8x128xf32>
    %435 = arith.negf %434 : vector<8x128xf32>
    %436 = math.exp %435 : vector<8x128xf32>
    %cst_119 = arith.constant 1.000000e+00 : f32
    %437 = vector.broadcast %cst_119 : f32 to vector<8x128xf32>
    %438 = arith.addf %437, %436 : vector<8x128xf32>
    %439 = arith.divf %437, %438 : vector<8x128xf32>
    %440 = vector.extract_strided_slice %429 {offsets = [0, 128], sizes = [8, 128], strides = [1, 1]} : vector<8x384xf32> to vector<8x128xf32>
    %441 = vector.extract_strided_slice %431 {offsets = [0, 128], sizes = [8, 128], strides = [1, 1]} : vector<8x384xf32> to vector<8x128xf32>
    %442 = arith.addf %440, %441 : vector<8x128xf32>
    %443 = arith.negf %442 : vector<8x128xf32>
    %444 = math.exp %443 : vector<8x128xf32>
    %cst_120 = arith.constant 1.000000e+00 : f32
    %445 = vector.broadcast %cst_120 : f32 to vector<8x128xf32>
    %446 = arith.addf %445, %444 : vector<8x128xf32>
    %447 = arith.divf %445, %446 : vector<8x128xf32>
    %448 = vector.extract_strided_slice %429 {offsets = [0, 256], sizes = [8, 128], strides = [1, 1]} : vector<8x384xf32> to vector<8x128xf32>
    %449 = vector.extract_strided_slice %431 {offsets = [0, 256], sizes = [8, 128], strides = [1, 1]} : vector<8x384xf32> to vector<8x128xf32>
    %450 = arith.addf %449, %319 : vector<8x128xf32>
    %451 = arith.mulf %439, %450 : vector<8x128xf32>
    %452 = arith.addf %448, %451 : vector<8x128xf32>
    %453 = math.tanh %452 : vector<8x128xf32>
    %cst_121 = arith.constant 1.000000e+00 : f32
    %454 = vector.broadcast %cst_121 : f32 to vector<8x128xf32>
    %455 = arith.subf %454, %447 : vector<8x128xf32>
    %456 = arith.mulf %455, %453 : vector<8x128xf32>
    %457 = arith.mulf %447, %423 : vector<8x128xf32>
    %458 = arith.addf %456, %457 : vector<8x128xf32>
    %459 = arith.index_cast %427 : i32 to index
    %c0_122 = arith.constant 0 : index
    %460 = vector.load %arg7[%459, %c0_122] : memref<64x128xf32, #tpu.memory_space<vmem>>, vector<8x128xf32>
    tpu.vector_store %arg7[%459, %c0_122], %458 {strides = array<i32>} : memref<64x128xf32, #tpu.memory_space<vmem>>, vector<8x128xf32>,
    %c4_i32_123 = arith.constant 4 : i32
    %c8_i32_124 = arith.constant 8 : i32
    %461 = arith.muli %c4_i32_123, %c8_i32_124 : i32
    %462 = tpu.assume_multiple %461, 8 : i32
    %463 = arith.index_cast %462 : i32 to index
    %c0_125 = arith.constant 0 : index
    %464 = vector.load %arg9[%463, %c0_125] : memref<64x384xf32, #tpu.memory_space<vmem>>, vector<8x384xf32>
    %465 = arith.truncf %458 : vector<8x128xf32> to vector<8x128xbf16>
    %cst_126 = arith.constant dense<0.000000e+00> : vector<8x384xf32>
    %466 = tpu.matmul %465, %315, %cst_126 {dimension_numbers = #tpu.dot_dimension_numbers<[1], [0], [0], [1], [0, 0, 1, 1], [], []>} : vector<8x128xbf16>, vector<128x384xbf16>, vector<8x384xf32> -> vector<8x384xf32>
    %467 = vector.extract_strided_slice %464 {offsets = [0, 0], sizes = [8, 128], strides = [1, 1]} : vector<8x384xf32> to vector<8x128xf32>
    %468 = vector.extract_strided_slice %466 {offsets = [0, 0], sizes = [8, 128], strides = [1, 1]} : vector<8x384xf32> to vector<8x128xf32>
    %469 = arith.addf %467, %468 : vector<8x128xf32>
    %470 = arith.negf %469 : vector<8x128xf32>
    %471 = math.exp %470 : vector<8x128xf32>
    %cst_127 = arith.constant 1.000000e+00 : f32
    %472 = vector.broadcast %cst_127 : f32 to vector<8x128xf32>
    %473 = arith.addf %472, %471 : vector<8x128xf32>
    %474 = arith.divf %472, %473 : vector<8x128xf32>
    %475 = vector.extract_strided_slice %464 {offsets = [0, 128], sizes = [8, 128], strides = [1, 1]} : vector<8x384xf32> to vector<8x128xf32>
    %476 = vector.extract_strided_slice %466 {offsets = [0, 128], sizes = [8, 128], strides = [1, 1]} : vector<8x384xf32> to vector<8x128xf32>
    %477 = arith.addf %475, %476 : vector<8x128xf32>
    %478 = arith.negf %477 : vector<8x128xf32>
    %479 = math.exp %478 : vector<8x128xf32>
    %cst_128 = arith.constant 1.000000e+00 : f32
    %480 = vector.broadcast %cst_128 : f32 to vector<8x128xf32>
    %481 = arith.addf %480, %479 : vector<8x128xf32>
    %482 = arith.divf %480, %481 : vector<8x128xf32>
    %483 = vector.extract_strided_slice %464 {offsets = [0, 256], sizes = [8, 128], strides = [1, 1]} : vector<8x384xf32> to vector<8x128xf32>
    %484 = vector.extract_strided_slice %466 {offsets = [0, 256], sizes = [8, 128], strides = [1, 1]} : vector<8x384xf32> to vector<8x128xf32>
    %485 = arith.addf %484, %319 : vector<8x128xf32>
    %486 = arith.mulf %474, %485 : vector<8x128xf32>
    %487 = arith.addf %483, %486 : vector<8x128xf32>
    %488 = math.tanh %487 : vector<8x128xf32>
    %cst_129 = arith.constant 1.000000e+00 : f32
    %489 = vector.broadcast %cst_129 : f32 to vector<8x128xf32>
    %490 = arith.subf %489, %482 : vector<8x128xf32>
    %491 = arith.mulf %490, %488 : vector<8x128xf32>
    %492 = arith.mulf %482, %458 : vector<8x128xf32>
    %493 = arith.addf %491, %492 : vector<8x128xf32>
    %494 = arith.index_cast %462 : i32 to index
    %c0_130 = arith.constant 0 : index
    %495 = vector.load %arg7[%494, %c0_130] : memref<64x128xf32, #tpu.memory_space<vmem>>, vector<8x128xf32>
    tpu.vector_store %arg7[%494, %c0_130], %493 {strides = array<i32>} : memref<64x128xf32, #tpu.memory_space<vmem>>, vector<8x128xf32>,
    %c5_i32_131 = arith.constant 5 : i32
    %c8_i32_132 = arith.constant 8 : i32
    %496 = arith.muli %c5_i32_131, %c8_i32_132 : i32
    %497 = tpu.assume_multiple %496, 8 : i32
    %498 = arith.index_cast %497 : i32 to index
    %c0_133 = arith.constant 0 : index
    %499 = vector.load %arg9[%498, %c0_133] : memref<64x384xf32, #tpu.memory_space<vmem>>, vector<8x384xf32>
    %500 = arith.truncf %493 : vector<8x128xf32> to vector<8x128xbf16>
    %cst_134 = arith.constant dense<0.000000e+00> : vector<8x384xf32>
    %501 = tpu.matmul %500, %315, %cst_134 {dimension_numbers = #tpu.dot_dimension_numbers<[1], [0], [0], [1], [0, 0, 1, 1], [], []>} : vector<8x128xbf16>, vector<128x384xbf16>, vector<8x384xf32> -> vector<8x384xf32>
    %502 = vector.extract_strided_slice %499 {offsets = [0, 0], sizes = [8, 128], strides = [1, 1]} : vector<8x384xf32> to vector<8x128xf32>
    %503 = vector.extract_strided_slice %501 {offsets = [0, 0], sizes = [8, 128], strides = [1, 1]} : vector<8x384xf32> to vector<8x128xf32>
    %504 = arith.addf %502, %503 : vector<8x128xf32>
    %505 = arith.negf %504 : vector<8x128xf32>
    %506 = math.exp %505 : vector<8x128xf32>
    %cst_135 = arith.constant 1.000000e+00 : f32
    %507 = vector.broadcast %cst_135 : f32 to vector<8x128xf32>
    %508 = arith.addf %507, %506 : vector<8x128xf32>
    %509 = arith.divf %507, %508 : vector<8x128xf32>
    %510 = vector.extract_strided_slice %499 {offsets = [0, 128], sizes = [8, 128], strides = [1, 1]} : vector<8x384xf32> to vector<8x128xf32>
    %511 = vector.extract_strided_slice %501 {offsets = [0, 128], sizes = [8, 128], strides = [1, 1]} : vector<8x384xf32> to vector<8x128xf32>
    %512 = arith.addf %510, %511 : vector<8x128xf32>
    %513 = arith.negf %512 : vector<8x128xf32>
    %514 = math.exp %513 : vector<8x128xf32>
    %cst_136 = arith.constant 1.000000e+00 : f32
    %515 = vector.broadcast %cst_136 : f32 to vector<8x128xf32>
    %516 = arith.addf %515, %514 : vector<8x128xf32>
    %517 = arith.divf %515, %516 : vector<8x128xf32>
    %518 = vector.extract_strided_slice %499 {offsets = [0, 256], sizes = [8, 128], strides = [1, 1]} : vector<8x384xf32> to vector<8x128xf32>
    %519 = vector.extract_strided_slice %501 {offsets = [0, 256], sizes = [8, 128], strides = [1, 1]} : vector<8x384xf32> to vector<8x128xf32>
    %520 = arith.addf %519, %319 : vector<8x128xf32>
    %521 = arith.mulf %509, %520 : vector<8x128xf32>
    %522 = arith.addf %518, %521 : vector<8x128xf32>
    %523 = math.tanh %522 : vector<8x128xf32>
    %cst_137 = arith.constant 1.000000e+00 : f32
    %524 = vector.broadcast %cst_137 : f32 to vector<8x128xf32>
    %525 = arith.subf %524, %517 : vector<8x128xf32>
    %526 = arith.mulf %525, %523 : vector<8x128xf32>
    %527 = arith.mulf %517, %493 : vector<8x128xf32>
    %528 = arith.addf %526, %527 : vector<8x128xf32>
    %529 = arith.index_cast %497 : i32 to index
    %c0_138 = arith.constant 0 : index
    %530 = vector.load %arg7[%529, %c0_138] : memref<64x128xf32, #tpu.memory_space<vmem>>, vector<8x128xf32>
    tpu.vector_store %arg7[%529, %c0_138], %528 {strides = array<i32>} : memref<64x128xf32, #tpu.memory_space<vmem>>, vector<8x128xf32>,
    %c6_i32_139 = arith.constant 6 : i32
    %c8_i32_140 = arith.constant 8 : i32
    %531 = arith.muli %c6_i32_139, %c8_i32_140 : i32
    %532 = tpu.assume_multiple %531, 8 : i32
    %533 = arith.index_cast %532 : i32 to index
    %c0_141 = arith.constant 0 : index
    %534 = vector.load %arg9[%533, %c0_141] : memref<64x384xf32, #tpu.memory_space<vmem>>, vector<8x384xf32>
    %535 = arith.truncf %528 : vector<8x128xf32> to vector<8x128xbf16>
    %cst_142 = arith.constant dense<0.000000e+00> : vector<8x384xf32>
    %536 = tpu.matmul %535, %315, %cst_142 {dimension_numbers = #tpu.dot_dimension_numbers<[1], [0], [0], [1], [0, 0, 1, 1], [], []>} : vector<8x128xbf16>, vector<128x384xbf16>, vector<8x384xf32> -> vector<8x384xf32>
    %537 = vector.extract_strided_slice %534 {offsets = [0, 0], sizes = [8, 128], strides = [1, 1]} : vector<8x384xf32> to vector<8x128xf32>
    %538 = vector.extract_strided_slice %536 {offsets = [0, 0], sizes = [8, 128], strides = [1, 1]} : vector<8x384xf32> to vector<8x128xf32>
    %539 = arith.addf %537, %538 : vector<8x128xf32>
    %540 = arith.negf %539 : vector<8x128xf32>
    %541 = math.exp %540 : vector<8x128xf32>
    %cst_143 = arith.constant 1.000000e+00 : f32
    %542 = vector.broadcast %cst_143 : f32 to vector<8x128xf32>
    %543 = arith.addf %542, %541 : vector<8x128xf32>
    %544 = arith.divf %542, %543 : vector<8x128xf32>
    %545 = vector.extract_strided_slice %534 {offsets = [0, 128], sizes = [8, 128], strides = [1, 1]} : vector<8x384xf32> to vector<8x128xf32>
    %546 = vector.extract_strided_slice %536 {offsets = [0, 128], sizes = [8, 128], strides = [1, 1]} : vector<8x384xf32> to vector<8x128xf32>
    %547 = arith.addf %545, %546 : vector<8x128xf32>
    %548 = arith.negf %547 : vector<8x128xf32>
    %549 = math.exp %548 : vector<8x128xf32>
    %cst_144 = arith.constant 1.000000e+00 : f32
    %550 = vector.broadcast %cst_144 : f32 to vector<8x128xf32>
    %551 = arith.addf %550, %549 : vector<8x128xf32>
    %552 = arith.divf %550, %551 : vector<8x128xf32>
    %553 = vector.extract_strided_slice %534 {offsets = [0, 256], sizes = [8, 128], strides = [1, 1]} : vector<8x384xf32> to vector<8x128xf32>
    %554 = vector.extract_strided_slice %536 {offsets = [0, 256], sizes = [8, 128], strides = [1, 1]} : vector<8x384xf32> to vector<8x128xf32>
    %555 = arith.addf %554, %319 : vector<8x128xf32>
    %556 = arith.mulf %544, %555 : vector<8x128xf32>
    %557 = arith.addf %553, %556 : vector<8x128xf32>
    %558 = math.tanh %557 : vector<8x128xf32>
    %cst_145 = arith.constant 1.000000e+00 : f32
    %559 = vector.broadcast %cst_145 : f32 to vector<8x128xf32>
    %560 = arith.subf %559, %552 : vector<8x128xf32>
    %561 = arith.mulf %560, %558 : vector<8x128xf32>
    %562 = arith.mulf %552, %528 : vector<8x128xf32>
    %563 = arith.addf %561, %562 : vector<8x128xf32>
    %564 = arith.index_cast %532 : i32 to index
    %c0_146 = arith.constant 0 : index
    %565 = vector.load %arg7[%564, %c0_146] : memref<64x128xf32, #tpu.memory_space<vmem>>, vector<8x128xf32>
    tpu.vector_store %arg7[%564, %c0_146], %563 {strides = array<i32>} : memref<64x128xf32, #tpu.memory_space<vmem>>, vector<8x128xf32>,
    %c7_i32_147 = arith.constant 7 : i32
    %c8_i32_148 = arith.constant 8 : i32
    %566 = arith.muli %c7_i32_147, %c8_i32_148 : i32
    %567 = tpu.assume_multiple %566, 8 : i32
    %568 = arith.index_cast %567 : i32 to index
    %c0_149 = arith.constant 0 : index
    %569 = vector.load %arg9[%568, %c0_149] : memref<64x384xf32, #tpu.memory_space<vmem>>, vector<8x384xf32>
    %570 = arith.truncf %563 : vector<8x128xf32> to vector<8x128xbf16>
    %cst_150 = arith.constant dense<0.000000e+00> : vector<8x384xf32>
    %571 = tpu.matmul %570, %315, %cst_150 {dimension_numbers = #tpu.dot_dimension_numbers<[1], [0], [0], [1], [0, 0, 1, 1], [], []>} : vector<8x128xbf16>, vector<128x384xbf16>, vector<8x384xf32> -> vector<8x384xf32>
    %572 = vector.extract_strided_slice %569 {offsets = [0, 0], sizes = [8, 128], strides = [1, 1]} : vector<8x384xf32> to vector<8x128xf32>
    %573 = vector.extract_strided_slice %571 {offsets = [0, 0], sizes = [8, 128], strides = [1, 1]} : vector<8x384xf32> to vector<8x128xf32>
    %574 = arith.addf %572, %573 : vector<8x128xf32>
    %575 = arith.negf %574 : vector<8x128xf32>
    %576 = math.exp %575 : vector<8x128xf32>
    %cst_151 = arith.constant 1.000000e+00 : f32
    %577 = vector.broadcast %cst_151 : f32 to vector<8x128xf32>
    %578 = arith.addf %577, %576 : vector<8x128xf32>
    %579 = arith.divf %577, %578 : vector<8x128xf32>
    %580 = vector.extract_strided_slice %569 {offsets = [0, 128], sizes = [8, 128], strides = [1, 1]} : vector<8x384xf32> to vector<8x128xf32>
    %581 = vector.extract_strided_slice %571 {offsets = [0, 128], sizes = [8, 128], strides = [1, 1]} : vector<8x384xf32> to vector<8x128xf32>
    %582 = arith.addf %580, %581 : vector<8x128xf32>
    %583 = arith.negf %582 : vector<8x128xf32>
    %584 = math.exp %583 : vector<8x128xf32>
    %cst_152 = arith.constant 1.000000e+00 : f32
    %585 = vector.broadcast %cst_152 : f32 to vector<8x128xf32>
    %586 = arith.addf %585, %584 : vector<8x128xf32>
    %587 = arith.divf %585, %586 : vector<8x128xf32>
    %588 = vector.extract_strided_slice %569 {offsets = [0, 256], sizes = [8, 128], strides = [1, 1]} : vector<8x384xf32> to vector<8x128xf32>
    %589 = vector.extract_strided_slice %571 {offsets = [0, 256], sizes = [8, 128], strides = [1, 1]} : vector<8x384xf32> to vector<8x128xf32>
    %590 = arith.addf %589, %319 : vector<8x128xf32>
    %591 = arith.mulf %579, %590 : vector<8x128xf32>
    %592 = arith.addf %588, %591 : vector<8x128xf32>
    %593 = math.tanh %592 : vector<8x128xf32>
    %cst_153 = arith.constant 1.000000e+00 : f32
    %594 = vector.broadcast %cst_153 : f32 to vector<8x128xf32>
    %595 = arith.subf %594, %587 : vector<8x128xf32>
    %596 = arith.mulf %595, %593 : vector<8x128xf32>
    %597 = arith.mulf %587, %563 : vector<8x128xf32>
    %598 = arith.addf %596, %597 : vector<8x128xf32>
    %599 = arith.index_cast %567 : i32 to index
    %c0_154 = arith.constant 0 : index
    %600 = vector.load %arg7[%599, %c0_154] : memref<64x128xf32, #tpu.memory_space<vmem>>, vector<8x128xf32>
    tpu.vector_store %arg7[%599, %c0_154], %598 {strides = array<i32>} : memref<64x128xf32, #tpu.memory_space<vmem>>, vector<8x128xf32>,
    %c8_i32_155 = arith.constant 8 : i32
    %c1_156 = arith.constant 1 : index
    %c0_157 = arith.constant 0 : index
    %c0_158 = arith.constant 0 : index
    %601 = vector.load %arg8[%c1_156, %c0_157, %c0_158] : memref<2x8x128xf32, #tpu.memory_space<vmem>>, vector<1x8x128xf32>
    %602 = vector.shape_cast %601 : vector<1x8x128xf32> to vector<8x128xf32>
    %603 = vector.shape_cast %598 : vector<8x128xf32> to vector<1x8x128xf32>
    tpu.vector_store %arg8[%c1_156, %c0_157, %c0_158], %603 {strides = array<i32>} : memref<2x8x128xf32, #tpu.memory_space<vmem>>, vector<1x8x128xf32>,
    return
  }
  func.func @transform_0(%arg0: i32) -> (i32, i32) {
    %c0_i32 = arith.constant 0 : i32
    %c0_i32_0 = arith.constant 0 : i32
    return %arg0, %c0_i32 : i32, i32
  }
  func.func @transform_1(%arg0: i32) -> (i32, i32) {
    %c0_i32 = arith.constant 0 : i32
    %c0_i32_0 = arith.constant 0 : i32
    %c0_i32_1 = arith.constant 0 : i32
    return %c0_i32, %c0_i32_0 : i32, i32
  }
  func.func @transform_2(%arg0: i32) -> (i32, i32, i32) {
    %c0_i32 = arith.constant 0 : i32
    %c0_i32_0 = arith.constant 0 : i32
    %c0_i32_1 = arith.constant 0 : i32
    %c0_i32_2 = arith.constant 0 : i32
    return %c0_i32, %c0_i32_0, %c0_i32_1 : i32, i32, i32
  }
  func.func @transform_3(%arg0: i32) -> (i32, i32, i32) {
    %c0_i32 = arith.constant 0 : i32
    %c0_i32_0 = arith.constant 0 : i32
    %c0_i32_1 = arith.constant 0 : i32
    %c0_i32_2 = arith.constant 0 : i32
    return %c0_i32, %c0_i32_0, %c0_i32_1 : i32, i32, i32
  }
  func.func @transform_4(%arg0: i32) -> (i32, i32, i32) {
    %c0_i32 = arith.constant 0 : i32
    %c0_i32_0 = arith.constant 0 : i32
    %c0_i32_1 = arith.constant 0 : i32
    %c0_i32_2 = arith.constant 0 : i32
    return %c0_i32, %c0_i32_0, %c0_i32_1 : i32, i32, i32
  }
  func.func @transform_5(%arg0: i32) -> (i32, i32, i32) {
    %c0_i32 = arith.constant 0 : i32
    %c0_i32_0 = arith.constant 0 : i32
    %c0_i32_1 = arith.constant 0 : i32
    %c0_i32_2 = arith.constant 0 : i32
    return %c0_i32, %c0_i32_0, %c0_i32_1 : i32, i32, i32
  }
  func.func @transform_6(%arg0: i32) -> (i32, i32) {
    %c0_i32 = arith.constant 0 : i32
    %c0_i32_0 = arith.constant 0 : i32
    return %arg0, %c0_i32 : i32, i32
  }
  func.func @transform_7(%arg0: i32) -> (i32, i32, i32) {
    %c0_i32 = arith.constant 0 : i32
    %c0_i32_0 = arith.constant 0 : i32
    %c0_i32_1 = arith.constant 0 : i32
    return %c0_i32, %arg0, %c0_i32_0 : i32, i32, i32
  }
}

</mosaic_0001>

<bundles_post_ra>
// kernel: encoder_forward.1
= control target key start
LH: loop header
LB: loop body
LE: loop exit
PB: predicated region body
PF: predicated region fallthrough
CT: control target
= control target key end

     0   :  { %13 = vsyncpa [#allocation4], 0  ;;  %s4075_s0 = inlined_call_operand.vmem [shape: s32[64,1], index: 0, kind: input, shape index: {}]   ;;  %s4076_s1 = inlined_call_operand.vmem [shape: bf16[16,384], index: 1, kind: input, shape index: {}]   ;;  %s4077_s2 = inlined_call_operand.hbm [shape: bf16[1,128,384], index: 2, kind: input, shape index: {}]   ;;  %s4078_s3 = inlined_call_operand.hbm [shape: bf16[2,128,384], index: 3, kind: input, shape index: {}]   ;;  %s4079_s4 = inlined_call_operand.vmem [shape: f32[2,1,384], index: 4, kind: input, shape index: {}]   ;;  %s4080_s5 = inlined_call_operand.vmem [shape: f32[2,1,128], index: 5, kind: input, shape index: {}]   ;;  %s4081_s6 = inlined_call_operand.vmem [shape: f32[64,128], index: 6, kind: output, shape index: {0}]   ;;  %s4082_s7 = inlined_call_operand.vmem [shape: f32[2,8,128], index: 7, kind: output, shape index: {1}]  }
   0x1   :  { %s23_s26 = sshll.u32 %s4077_s2, 4  ;;  %s24_s26 = int_to_ptr.hbm [resolvable:$true] %s23_s26 }
   0x2   :  { %14 = vsyncpa [#allocation6], 0  ;;  %s3084_s27 = smov [#allocation3]   ;;  %s36_s8 = sshll.u32 %s4078_s3, 4  ;;  %s37_s8 = int_to_ptr.hbm [resolvable:$true] %s36_s8 }
   0x3   :  { %s25_s28 = sshll.u32 %s3084_s27, 4  ;;  %s3085_s9 = smov 192   ;;  %s26_s28 = int_to_ptr.vmem [resolvable:$true] %s25_s28 }
   0x4   :  { %s3086_s10 = smov 12   ;;  %s3087_s11 = smov [#allocation5]  }
   0x5   :  { %31 = dma.hbm_to_vmem [thread:$0]  %s24_s26, 3072, %s26_s28, [#allocation4], %s3085_s9, %s3085_s9, %s3086_s10  }
   0x6   :  { %s38_s12 = sshll.u32 %s3087_s11, 4  ;;  %s39_s12 = int_to_ptr.vmem [resolvable:$true] %s38_s12 }
   0x7   :  { %44 = dma.hbm_to_vmem [thread:$0]  %s37_s8, 6144, %s39_s12, [#allocation6], %s3085_s9, %s3085_s9, %s3086_s10  }
   0x8   :  { %3080 = dma.done.wait [#allocation4], 3072  }
   0x9   :  { %3081 = vsyncadd [#allocation4], 4294964224 }
   0xa   :  { %3082 = dma.done.wait [#allocation6], 6144  }
   0xb   :  { %3083 = vsyncadd [#allocation6], 4294961152  ;;  %v4083_v0 = vmov 0   ;;  %v60_v1 = vld [vmem:[%s4075_s0 + $0x10] sm:$0xff]  ;;  %v58_v2 = vld [vmem:[%s4075_s0] sm:$0xff]  ;;  %vm148_vm2 = vcmask 130048  }
   0xc   :  { %2866 = vset.pattern.permute.xlu1 %v4083_v0  ;;  %2865 = vset.pattern.permute.xlu0 %v4083_v0  ;;  %v62_v3 = vld [vmem:[%s4075_s0 + $0x20] sm:$0xff]  ;;  %v2533_v4 = vld [vmem:[#allocation5 + $0xa8] sm:$0xf]  ;;  %v2809_v5 = vld [vmem:[#allocation5 + $0xb0] sm:$0xf0] }
   0xd   :  { %2867 = vset.pattern.permute.xlu2 %v4083_v0  ;;  %75 = vperm.xlu1 %2866, %v60_v1   ;;  %v2521_v6 = vld [vmem:[#allocation5 + $0x90] sm:$0xf]  ;;  %v2806_v7 = vld [vmem:[#allocation5 + $0x98] sm:$0xf0]  ;;  %v3148_v8 = vor.u32 %v2809_v5, %v2533_v4  ;;  %v59_v10 = vld [vmem:[%s4075_s0 + $0x8] sm:$0xff] }
   0xe   :  { %69 = vperm.xlu0 %2865, %v58_v2   ;;  %81 = vperm.xlu2 %2867, %v62_v3   ;;  %v61_v9 = vld [vmem:[%s4075_s0 + $0x18] sm:$0xff]  ;;  %v3157_v11 = vor.u32 %v2806_v7, %v2521_v6  ;;  %v2803_v13 = vld [vmem:[#allocation5 + $0x80] sm:$0xf0]  ;;  %v63_v14 = vld [vmem:[%s4075_s0 + $0x28] sm:$0xff] }
   0xf   :  { %442 = vmatpush.bf16.msra.mxu3 %v3148_v8  ;;  %v2509_v12 = vld [vmem:[#allocation5 + $0x78] sm:$0xf]  ;;  %v2497_v16 = vld [vmem:[#allocation5 + $0x60] sm:$0xf]  ;;  %v2800_v17 = vld [vmem:[#allocation5 + $0x68] sm:$0xf0] }
  0x10   :  { %v3163_v15 = vor.u32 %v2803_v13, %v2509_v12  ;;  %v65_v18 = vld [vmem:[%s4075_s0 + $0x38] sm:$0xff]  ;;  %v64_v19 = vld [vmem:[%s4075_s0 + $0x30] sm:$0xff]  ;;  %v3172_v20 = vor.u32 %v2800_v17, %v2497_v16  ;;  %v2485_v21 = vld [vmem:[#allocation5 + $0x48] sm:$0xf] }
  0x11   :  { %v2797_v22 = vld [vmem:[#allocation5 + $0x50] sm:$0xf0]  ;;  %v2473_v24 = vld [vmem:[#allocation5 + $0x30] sm:$0xf]  ;;  %v2794_v25 = vld [vmem:[#allocation5 + $0x38] sm:$0xf0] }
  0x12   :  { %v3175_v23 = vor.u32 %v2797_v22, %v2485_v21  ;;  %v3178_v26 = vor.u32 %v2794_v25, %v2473_v24  ;;  %v2461_v27 = vld [vmem:[#allocation5 + $0x18] sm:$0xf]  ;;  %v2791_v28 = vld [vmem:[#allocation5 + $0x20] sm:$0xf0]  ;;  %v2449_v30 = vld [vmem:[#allocation5] sm:$0xf] }
  0x13   :  { %443 = vmatpush.bf16.msra.mxu3 %v3157_v11  ;;  %v3181_v29 = vor.u32 %v2791_v28, %v2461_v27  ;;  %v2788_v31 = vld [vmem:[#allocation5 + $0x8] sm:$0xf0]  ;;  %v2535_v33 = vld [vmem:[#allocation5 + $0xb4] sm:$0xf0]  ;;  %v2805_v36 = vld [vmem:[#allocation5 + $0x94] sm:$0xf] }
  0x14   :  { %v2808_v32 = vld [vmem:[#allocation5 + $0xac] sm:$0xf]  ;;  %v3184_v34 = vor.u32 %v2788_v31, %v2449_v30  ;;  %v2523_v37 = vld [vmem:[#allocation5 + $0x9c] sm:$0xf0]  ;;  %v2802_v39 = vld [vmem:[#allocation5 + $0x7c] sm:$0xf] }
  0x15   :  { %78 = vperm.xlu1 %2866, %v61_v9   ;;  %v3186_v35 = vor.u32 %v2808_v32, %v2535_v33  ;;  %v3190_v38 = vor.u32 %v2805_v36, %v2523_v37  ;;  %v2511_v40 = vld [vmem:[#allocation5 + $0x84] sm:$0xf0]  ;;  %v2799_v42 = vld [vmem:[#allocation5 + $0x64] sm:$0xf]  ;;  %v2499_v43 = vld [vmem:[#allocation5 + $0x6c] sm:$0xf0] }
  0x16   :  { %72 = vperm.xlu0 %2865, %v59_v10   ;;  %84 = vperm.xlu2 %2867, %v63_v14   ;;  %v3194_v41 = vor.u32 %v2802_v39, %v2511_v40  ;;  %v3197_v44 = vor.u32 %v2799_v42, %v2499_v43  ;;  %v2796_v45 = vld [vmem:[#allocation5 + $0x4c] sm:$0xf]  ;;  %v2487_v46 = vld [vmem:[#allocation5 + $0x54] sm:$0xf0]  ;;  %v2793_v48 = vld [vmem:[#allocation5 + $0x34] sm:$0xf]  ;;  %v66_v14 = vlaneseq }
  0x17   :  { %444 = vmatpush.bf16.msra.mxu3 %v3163_v15  ;;  %v3200_v47 = vor.u32 %v2796_v45, %v2487_v46  ;;  %v2475_v49 = vld [vmem:[#allocation5 + $0x3c] sm:$0xf0]  ;;  %v2790_v51 = vld [vmem:[#allocation5 + $0x1c] sm:$0xf]  ;;  %v2463_v52 = vld [vmem:[#allocation5 + $0x24] sm:$0xf0] }
  0x18   :  { %v3203_v50 = vor.u32 %v2793_v48, %v2475_v49  ;;  %v3206_v53 = vor.u32 %v2790_v51, %v2463_v52  ;;  %v2787_v54 = vld [vmem:[#allocation5 + $0x4] sm:$0xf]  ;;  %v2451_v55 = vld [vmem:[#allocation5 + $0xc] sm:$0xf0]  ;;  %v2425_v57 = vld [vmem:[%s4076_s1] sm:$0xf] }
  0x19   :  { %v3209_v56 = vor.u32 %v2787_v54, %v2451_v55  ;;  %v2785_v58 = vld [vmem:[%s4076_s1 + $0x8] sm:$0xf0]  ;;  %v2784_v59 = vld [vmem:[%s4076_s1 + $0x4] sm:$0xf]  ;;  %v2427_v61 = vld [vmem:[%s4076_s1 + $0xc] sm:$0xf0] }
  0x1a   :  { %v2426_v60 = vor.u32 %v2785_v58, %v2425_v57  ;;  %v2433_v62 = vld [vmem:[%s4076_s1 + $0x8] sm:$0xf]  ;;  %v2786_v63 = vld [vmem:[%s4076_s1 + $0x10] sm:$0xf0]  ;;  %v2430_v1 = vor.u32 %v2784_v59, %v2427_v61  ;;  %v2541_v3 = vld [vmem:[#allocation5 + $0xb0] sm:$0xf] }
  0x1b   :  { %445 = vmatpush.bf16.msra.mxu3 %v3172_v20  ;;  %v2434_v2 = vor.u32 %v2786_v63, %v2433_v62  ;;  %v2810_v4 = vld [vmem:[#allocation5 + $0xb8] sm:$0xf0]  ;;  %v2529_v6 = vld [vmem:[#allocation5 + $0x98] sm:$0xf]  ;;  %v2807_v7 = vld [vmem:[#allocation5 + $0xa0] sm:$0xf0] }
  0x1c   :  { %168 = vmatpush.bf16.msra.mxu0 %v2426_v60  ;;  %197 = vmatpush.bf16.msra.mxu1 %v2430_v1  ;;  %v3233_v5 = vor.u32 %v2810_v4, %v2541_v3  ;;  %v3239_v9 = vor.u32 %v2807_v7, %v2529_v6  ;;  %v2517_v10 = vld [vmem:[#allocation5 + $0x80] sm:$0xf]  ;;  %v2804_v12 = vld [vmem:[#allocation5 + $0x88] sm:$0xf0]  ;;  %v2505_v13 = vld [vmem:[#allocation5 + $0x68] sm:$0xf] }
  0x1d   :  { %90 = vperm.xlu1 %2866, %v65_v18   ;;  %226 = vmatpush.bf16.msra.mxu2 %v2434_v2  ;;  %v3249_v16 = vor.u32 %v2804_v12, %v2517_v10  ;;  %v2801_v17 = vld [vmem:[#allocation5 + $0x70] sm:$0xf0]  ;;  %v3257_v21 = vand.u32 127, %v66_v14  ;;  %v3089_v25 = vmov 0.0   ;;  %v2493_v31 = vld [vmem:[#allocation5 + $0x50] sm:$0xf] }
  0x1e   :  { %87 = vperm.xlu0 %2865, %v64_v19   ;;  %v3254_v19 = vor.u32 %v2801_v17, %v2505_v13  ;;  %v2798_v32 = vld [vmem:[#allocation5 + $0x58] sm:$0xf0]  ;;  %v2481_v33 = vld [vmem:[#allocation5 + $0x38] sm:$0xf]  ;;  %v2795_v37 = vld [vmem:[#allocation5 + $0x40] sm:$0xf0] }
  0x1f   :  { %446 = vmatpush.bf16.msra.mxu3 %v3175_v23  ;;  %v3273_v36 = vor.u32 %v2798_v32, %v2493_v31  ;;  %v3277_v39 = vor.u32 %v2795_v37, %v2481_v33  ;;  %v2469_v48 = vld [vmem:[#allocation5 + $0x20] sm:$0xf]  ;;  %v2792_v49 = vld [vmem:[#allocation5 + $0x28] sm:$0xf0]  ;;  %v2457_v51 = vld [vmem:[#allocation5 + $0x8] sm:$0xf] }
  0x20   :  { %537 = vmatpush.bf16.msrb.mxu1 %v3148_v8  ;;  %468 = vmatpush.bf16.msrb.mxu0 %v3233_v5  ;;  %v3296_v52 = vor.u32 %v2792_v49, %v2469_v48  ;;  %v2789_v54 = vld [vmem:[#allocation5 + $0x10] sm:$0xf0]  ;;  %v124_v13 = vld [vmem:[%s4079_s4] sm:$0x7] }
  0x21   :  { %550 = vmatpush.bf16.msrb.mxu2 %v3186_v35  ;;  %v3300_v55 = vor.u32 %v2789_v54, %v2457_v51 }
  0x23   :  { %447 = vmatpush.bf16.msra.mxu3 %v3178_v26 }
  0x24   :  { %538 = vmatpush.bf16.msrb.mxu1 %v3157_v11  ;;  %469 = vmatpush.bf16.msrb.mxu0 %v3239_v9 }
  0x25   :  { %551 = vmatpush.bf16.msrb.mxu2 %v3190_v38 }
  0x27   :  { %448 = vmatpush.bf16.msra.mxu3 %v3181_v29 }
  0x28   :  { %539 = vmatpush.bf16.msrb.mxu1 %v3163_v15  ;;  %470 = vmatpush.bf16.msrb.mxu0 %v3249_v16 }
  0x29   :  { %552 = vmatpush.bf16.msrb.mxu2 %v3194_v41 }
  0x2b   :  { %449 = vmatpush.bf16.msra.mxu3 %v3184_v34 }
  0x2c   :  { %540 = vmatpush.bf16.msrb.mxu1 %v3172_v20  ;;  %471 = vmatpush.bf16.msrb.mxu0 %v3254_v19 }
  0x2d   :  { %553 = vmatpush.bf16.msrb.mxu2 %v3197_v44 }
  0x2e   :  { %450 = vmatmul.bf16.vlgmr.msra.gmra.mxu3 %v4083_v0 }
  0x2f   :  { %455 = vmatpush.bf16.msrb.mxu3 %v3186_v35 }
  0x30   :  { %541 = vmatpush.bf16.msrb.mxu1 %v3175_v23  ;;  %472 = vmatpush.bf16.msrb.mxu0 %v3273_v36 }
  0x31   :  { %554 = vmatpush.bf16.msrb.mxu2 %v3200_v47 }
  0x33   :  { %456 = vmatpush.bf16.msrb.mxu3 %v3190_v38 }
  0x34   :  { %542 = vmatpush.bf16.msrb.mxu1 %v3178_v26  ;;  %473 = vmatpush.bf16.msrb.mxu0 %v3277_v39 }
  0x35   :  { %555 = vmatpush.bf16.msrb.mxu2 %v3203_v50 }
  0x37   :  { %457 = vmatpush.bf16.msrb.mxu3 %v3194_v41 }
  0x38   :  { %543 = vmatpush.bf16.msrb.mxu1 %v3181_v29  ;;  %474 = vmatpush.bf16.msrb.mxu0 %v3296_v52 }
  0x39   :  { %556 = vmatpush.bf16.msrb.mxu2 %v3206_v53 }
  0x3b   :  { %458 = vmatpush.bf16.msrb.mxu3 %v3197_v44 }
  0x3c   :  { %544 = vmatpush.bf16.msrb.mxu1 %v3184_v34  ;;  %475 = vmatpush.bf16.msrb.mxu0 %v3300_v55 }
  0x3d   :  { %557 = vmatpush.bf16.msrb.mxu2 %v3209_v56 }
  0x3f   :  { %459 = vmatpush.bf16.msrb.mxu3 %v3200_v47 }
  0x43   :  { %460 = vmatpush.bf16.msrb.mxu3 %v3203_v50 }
  0x47   :  { %461 = vmatpush.bf16.msrb.mxu3 %v3206_v53 }
  0x4b   :  { %462 = vmatpush.bf16.msrb.mxu3 %v3209_v56 }
  0x4e   :  { %463 = vmatmul.bf16.vlgmr.msrb.gmra.mxu3 %v4083_v0 }
  0x4f   :  { %563 = vmatpush.bf16.msra.mxu3 %v3233_v5 }
  0x53   :  { %564 = vmatpush.bf16.msra.mxu3 %v3239_v9 }
  0x57   :  { %565 = vmatpush.bf16.msra.mxu3 %v3249_v16 }
  0x5b   :  { %566 = vmatpush.bf16.msra.mxu3 %v3254_v19 }
  0x5f   :  { %567 = vmatpush.bf16.msra.mxu3 %v3273_v36 }
  0x63   :  { %568 = vmatpush.bf16.msra.mxu3 %v3277_v39 }
  0x67   :  { %569 = vmatpush.bf16.msra.mxu3 %v3296_v52 }
  0x68   :  { %v82_v45 = vpop.permute.xlu2 %81 }
  0x69   :  { %vm96_vm5 = vcmp.eq.s32.totalorder %v82_v45, %v3257_v21 }
  0x6a   :  { %v2419_v58 = vsel %vm96_vm5, 1.0, %v3089_v25 }
  0x6b   :  { %570 = vmatpush.bf16.msra.mxu3 %v3300_v55 }
  0x6f   :  { %729 = vmatpush.bf16.msrb.mxu3 %v3148_v8 }
  0x70   :  { %v85_v57 = vpop.permute.xlu2 %84 }
  0x71   :  { %vm97_vm6 = vcmp.eq.s32.totalorder %v85_v57, %v3257_v21 }
  0x72   :  { %v2420_v59 = vsel %vm97_vm6, 1.0, %v3089_v25 }
  0x73   :  { %v118_v60 = vpack.c.bf16 %v2420_v59, %v2419_v58  ;;  %730 = vmatpush.bf16.msrb.mxu3 %v3157_v11 }
  0x77   :  { %731 = vmatpush.bf16.msrb.mxu3 %v3163_v15 }
  0x7b   :  { %732 = vmatpush.bf16.msrb.mxu3 %v3172_v20 }
  0x7f   :  { %v76_v24 = vpop.permute.xlu1 %75  ;;  %733 = vmatpush.bf16.msrb.mxu3 %v3175_v23 }
  0x80   :  { %v70_v18 = vpop.permute.xlu0 %69  ;;  %vm94_vm3 = vcmp.eq.s32.totalorder %v76_v24, %v3257_v21 }
  0x81   :  { %vm92_vm0 = vcmp.eq.s32.totalorder %v70_v18, %v3257_v21  ;;  %v2417_v42 = vsel %vm94_vm3, 1.0, %v3089_v25 }
  0x82   :  { %v2415_v27 = vsel %vm92_vm0, 1.0, %v3089_v25 }
  0x83   :  { %734 = vmatpush.bf16.msrb.mxu3 %v3178_v26 }
  0x87   :  { %v79_v40 = vpop.permute.xlu1 %78  ;;  %735 = vmatpush.bf16.msrb.mxu3 %v3181_v29 }
  0x88   :  { %v73_v22 = vpop.permute.xlu0 %72  ;;  %vm95_vm4 = vcmp.eq.s32.totalorder %v79_v40, %v3257_v21  ;;  %v3373_v40 = vperm.slane %v124_v13, 2 }
  0x89   :  { %vm93_vm1 = vcmp.eq.s32.totalorder %v73_v22, %v3257_v21  ;;  %v2418_v43 = vsel %vm95_vm4, 1.0, %v3089_v25 }
  0x8a   :  { %v2416_v28 = vsel %vm93_vm1, 1.0, %v3089_v25  ;;  %v117_v46 = vpack.c.bf16 %v2418_v43, %v2417_v42 }
  0x8b   :  { %v116_v30 = vpack.c.bf16 %v2416_v28, %v2415_v27  ;;  %736 = vmatpush.bf16.msrb.mxu3 %v3184_v34 }
  0x8d   :  { %2435 = vmatmul.msk.bf16.vlgmr.msra.gmra.mxu0 %vm148_vm2, %v116_v30  ;;  %2439 = vmatmul.msk.bf16.vlgmr.msra.gmra.mxu1 %vm148_vm2, %v116_v30 }
  0x8e   :  { %2443 = vmatmul.msk.bf16.vlgmr.msra.gmra.mxu2 %vm148_vm2, %v116_v30  ;;  %646 = vmatpush.bf16.msra.mxu1 %v3186_v35 }
  0x8f   :  { %659 = vmatpush.bf16.msra.mxu2 %v3233_v5  ;;  %633 = vmatpush.bf16.msra.mxu0 %v3148_v8  ;;  %v91_v61 = vpop.permute.xlu1 %90 }
  0x90   :  { %v88_v62 = vpop.permute.xlu0 %87  ;;  %vm99_vm7 = vcmp.eq.s32.totalorder %v91_v61, %v3257_v21 }
  0x91   :  { %vm98_vm8 = vcmp.eq.s32.totalorder %v88_v62, %v3257_v21  ;;  %v2422_v1 = vsel %vm99_vm7, 1.0, %v3089_v25  ;;  %v3359_v21 = vperm.slane %v124_v13, 0 }
  0x92   :  { %647 = vmatpush.bf16.msra.mxu1 %v3190_v38  ;;  %v2421_v2 = vsel %vm98_vm8, 1.0, %v3089_v25  ;;  %v3364_v25 = vperm.slane %v124_v13, 1 }
  0x93   :  { %660 = vmatpush.bf16.msra.mxu2 %v3239_v9  ;;  %634 = vmatpush.bf16.msra.mxu0 %v3157_v11  ;;  %v119_v3 = vpack.c.bf16 %v2422_v1, %v2421_v2 }
  0x96   :  { %648 = vmatpush.bf16.msra.mxu1 %v3194_v41 }
  0x97   :  { %661 = vmatpush.bf16.msra.mxu2 %v3249_v16  ;;  %635 = vmatpush.bf16.msra.mxu0 %v3163_v15 }
  0x9a   :  { %649 = vmatpush.bf16.msra.mxu1 %v3197_v44 }
  0x9b   :  { %662 = vmatpush.bf16.msra.mxu2 %v3254_v19  ;;  %636 = vmatpush.bf16.msra.mxu0 %v3172_v20 }
  0x9d   :  { %2436 = vmatmul.msk.bf16.gmra.mxu0 %vm148_vm2, %v117_v46  ;;  %2440 = vmatmul.msk.bf16.gmra.mxu1 %vm148_vm2, %v117_v46 }
  0x9e   :  { %2444 = vmatmul.msk.bf16.gmra.mxu2 %vm148_vm2, %v117_v46  ;;  %650 = vmatpush.bf16.msra.mxu1 %v3200_v47 }
  0x9f   :  { %663 = vmatpush.bf16.msra.mxu2 %v3273_v36  ;;  %637 = vmatpush.bf16.msra.mxu0 %v3175_v23 }
  0xa2   :  { %651 = vmatpush.bf16.msra.mxu1 %v3203_v50 }
  0xa3   :  { %664 = vmatpush.bf16.msra.mxu2 %v3277_v39  ;;  %638 = vmatpush.bf16.msra.mxu0 %v3178_v26 }
  0xa6   :  { %652 = vmatpush.bf16.msra.mxu1 %v3206_v53 }
  0xa7   :  { %665 = vmatpush.bf16.msra.mxu2 %v3296_v52  ;;  %639 = vmatpush.bf16.msra.mxu0 %v3181_v29 }
  0xaa   :  { %653 = vmatpush.bf16.msra.mxu1 %v3209_v56 }
  0xab   :  { %666 = vmatpush.bf16.msra.mxu2 %v3300_v55  ;;  %640 = vmatpush.bf16.msra.mxu0 %v3184_v34 }
  0xad   :  { %2437 = vmatmul.msk.bf16.gmra.mxu0 %vm148_vm2, %v118_v60  ;;  %2441 = vmatmul.msk.bf16.gmra.mxu1 %vm148_vm2, %v118_v60 }
  0xae   :  { %2445 = vmatmul.msk.bf16.gmra.mxu2 %vm148_vm2, %v118_v60 }
  0xb1   :  { %v451_v63 = vpop.f32.mrf.mxu3 }
  0xb9   :  { %v453_v4 = vpop.f32.mrf.mxu3 }
  0xbd   :  { %2438 = vmatmul.msk.bf16.gmra.mxu0 %vm148_vm2, %v119_v3  ;;  %2442 = vmatmul.msk.bf16.gmra.mxu1 %vm148_vm2, %v119_v3 }
  0xbe   :  { %2446 = vmatmul.msk.bf16.gmra.mxu2 %vm148_vm2, %v119_v3 }
  0xcd   :  { %476 = vmatmul.bf16.vlgmr.msrb.gmra.mxu0 %v4083_v0 }
  0xce   :  { %742 = vmatpush.bf16.msrb.mxu0 %v3186_v35 }
  0xd1   :  { %v464_v6 = vpop.f32.mrf.mxu3 }
  0xd2   :  { %743 = vmatpush.bf16.msrb.mxu0 %v3190_v38 }
  0xd6   :  { %744 = vmatpush.bf16.msrb.mxu0 %v3194_v41 }
  0xd9   :  { %v466_v7 = vpop.f32.mrf.mxu3 }
  0xda   :  { %745 = vmatpush.bf16.msrb.mxu0 %v3197_v44 }
  0xde   :  { %746 = vmatpush.bf16.msrb.mxu0 %v3200_v47 }
  0xe2   :  { %747 = vmatpush.bf16.msrb.mxu0 %v3203_v50 }
  0xe6   :  { %748 = vmatpush.bf16.msrb.mxu0 %v3206_v53 }
  0xea   :  { %749 = vmatpush.bf16.msrb.mxu0 %v3209_v56 }
 0x10a   :  { %v170_v10 = vpop.f32.mrf.mxu0  ;;  %v199_v12 = vpop.f32.mrf.mxu1 }
 0x10b   :  { %v171_v22 = vadd.f32 %v170_v10, %v3359_v21  ;;  %v200_v33 = vadd.f32 %v199_v12, %v3364_v25 }
 0x10d   :  { %v481_v30 = vadd.f32 %v451_v63, %v171_v22  ;;  %v501_v43 = vadd.f32 %v464_v6, %v200_v33 }
 0x10f   :  { %v2543_v37 = vmul.f32 -1.442695, %v481_v30  ;;  %v2544_v49 = vmul.f32 -1.442695, %v501_v43 }
 0x111   :  { %v3353_v14 = vpop.f32.mrf.mxu2  ;;  %2870 = vpow2.f32 %v2543_v37 }
 0x112   :  { %v3355_v17 = vpop.f32.mrf.mxu0  ;;  %v3357_v18 = vpop.f32.mrf.mxu1  ;;  %2872 = vpow2.f32 %v2544_v49 }
 0x117   :  { %v2871_v51 = vpop.eup %2870 }
 0x118   :  { %v485_v61 = vadd.f32 1.0, %v2871_v51  ;;  %v2873_v62 = vpop.eup %2872 }
 0x119   :  { %v3362_v24 = vpop.f32.mrf.mxu2  ;;  %v505_v4 = vadd.f32 1.0, %v2873_v62  ;;  %v3413_v62 = vld [vmem:[%s4080_s5] ss:$0 sm:$0xff] }
 0x11a   :  { %v175_v27 = vpop.f32.mrf.mxu0  ;;  %v204_v28 = vpop.f32.mrf.mxu1  ;;  %2874 = vrcp.f32 %v485_v61  ;;  %vm491_vm10 = vweird.f32 %v485_v61 }
 0x11b   :  { %v3367_v31 = vadd.f32 %v175_v27, %v3359_v21  ;;  %v3370_v32 = vadd.f32 %v204_v28, %v3364_v25  ;;  %2876 = vrcp.f32 %v505_v4  ;;  %vm511_vm14 = vweird.f32 %v505_v4 }
 0x120   :  { %v2875_v6 = vpop.eup %2874 }
 0x121   :  { %v233_v42 = vpop.f32.mrf.mxu2  ;;  %v487_v10 = vmul.f32 %v2875_v6, %v485_v61  ;;  %v2877_v28 = vpop.eup %2876  ;;  %vm492_vm9 = vweird.f32 %v2875_v6 }
 0x122   :  { %v3376_v45 = vadd.f32 %v233_v42, %v3373_v40  ;;  %v3378_v46 = vpop.f32.mrf.mxu0  ;;  %v3380_v48 = vpop.f32.mrf.mxu1  ;;  %v507_v33 = vmul.f32 %v2877_v28, %v505_v4  ;;  %vm493_vm11 = vmor %vm491_vm10, %vm492_vm9  ;;  %vm512_vm13 = vweird.f32 %v2877_v28 }
 0x123   :  { %v488_v30 = vsub.f32 1.0, %v487_v10  ;;  %vm513_vm15 = vmor %vm511_vm14, %vm512_vm13 }
 0x124   :  { %v508_v51 = vsub.f32 1.0, %v507_v33 }
 0x125   :  { %v489_v42 = vmul.f32 %v2875_v6, %v488_v30 }
 0x126   :  { %v509_v10 = vmul.f32 %v2877_v28, %v508_v51 }
 0x128   :  { %v510_v33 = vadd.f32 %v2877_v28, %v509_v10 }
 0x129   :  { %v3382_v54 = vpop.f32.mrf.mxu2 }
 0x12a   :  { %v180_v57 = vpop.f32.mrf.mxu0  ;;  %v209_v58 = vpop.f32.mrf.mxu1 }
 0x12b   :  { %v3385_v59 = vadd.f32 %v180_v57, %v3359_v21  ;;  %v3388_v60 = vadd.f32 %v209_v58, %v3364_v25  ;;  %v490_v57 = vadd.f32 %v2875_v6, %v489_v42  ;;  %v497_v58 = vand.u32 2147483648, %v485_v61 }
 0x12c   :  { %v517_v42 = vand.u32 2147483648, %v505_v4 }
 0x12d   :  { %v498_v30 = vor.u32 1.1754944e-38, %v497_v58 }
 0x131   :  { %v238_v63 = vpop.f32.mrf.mxu2 }
 0x132   :  { %v3391_v1 = vadd.f32 %v238_v63, %v3373_v40  ;;  %v3393_v2 = vpop.f32.mrf.mxu0  ;;  %v3395_v3 = vpop.f32.mrf.mxu1  ;;  %v495_v63 = vand.u32 2147483647, %v485_v61  ;;  %v514_v61 = vsel %vm513_vm15, %v2877_v28, %v510_v33 }
 0x134   :  { %vm496_vm12 = vcmp.eq.f32.partialorder %v495_v63, 8.507059e+37 }
 0x139   :  { %v3397_v7 = vpop.f32.mrf.mxu2 }
 0x13a   :  { %v185_v12 = vpop.f32.mrf.mxu0  ;;  %v214_v13 = vpop.f32.mrf.mxu1 }
 0x13b   :  { %v3400_v22 = vadd.f32 %v185_v12, %v3359_v21  ;;  %v3403_v27 = vadd.f32 %v214_v13, %v3364_v25  ;;  %v494_v12 = vsel %vm493_vm11, %v2875_v6, %v490_v57  ;;  %v518_v6 = vor.u32 1.1754944e-38, %v517_v42 }
 0x13c   :  { %v499_v0 = vsel %vm496_vm12, %v498_v30, %v494_v12 }
 0x13d   :  { %4085 = vst [vmem:[#allocation9_spill] sm:$0xff] %v3400_v22 }
 0x13e   :  { %4086 = vst [vmem:[#allocation10_spill] sm:$0xff] %v3403_v27  ;;  %v515_v27 = vand.u32 2147483647, %v505_v4 }
 0x140   :  { %vm516_vm0 = vcmp.eq.f32.partialorder %v515_v27, 8.507059e+37 }
 0x141   :  { %v243_v37 = vpop.f32.mrf.mxu2  ;;  %v519_v57 = vsel %vm516_vm0, %v518_v6, %v514_v61 }
 0x142   :  { %v3406_v43 = vadd.f32 %v243_v37, %v3373_v40  ;;  %v3408_v49 = vpop.f32.mrf.mxu0  ;;  %v525_v58 = vsub.f32 1.0, %v519_v57  ;;  %v527_v10 = vmul.f32 0.0, %v519_v57 }
 0x143   :  { %4088 = vst [vmem:[#allocation12_spill] sm:$0xff] %v3408_v49  ;;  %v229_v49 = vadd.f32 %v3353_v14, %v3373_v40 }
 0x144   :  { %4087 = vst [vmem:[#allocation11_spill] sm:$0xff] %v3406_v43 }
 0x149   :  { %v3448_v4 = vpop.f32.mrf.mxu2 }
 0x14a   :  { %v477_v13 = vpop.f32.mrf.mxu0  ;;  %4089 = vst [vmem:[#allocation13_spill] sm:$0xff] %v3448_v4 }
 0x14b   :  { %v521_v37 = vadd.f32 %v3413_v62, %v477_v13 }
 0x14d   :  { %v522_v43 = vmul.f32 %v521_v37, %v499_v0  ;;  %v3446_v0 = vpop.f32.mrf.mxu1 }
 0x14f   :  { %v523_v22 = vadd.f32 %v522_v43, %v229_v49  ;;  %v202_v49 = vadd.f32 %v3357_v18, %v3364_v25 }
 0x151   :  { %2878 = vtanh.f32 %v523_v22  ;;  %v173_v22 = vadd.f32 %v3355_v17, %v3359_v21 }
 0x152   :  { %v479_v51 = vpop.f32.mrf.mxu0 }
 0x157   :  { %v2879_v63 = vpop.eup %2878 }
 0x158   :  { %v526_v12 = vmul.f32 %v2879_v63, %v525_v58 }
 0x15a   :  { %v3418_v13 = vadd.f32 %v527_v10, %v526_v12 }
 0x15c   :  { %v536_v14 = vpack.c.bf16 %v3418_v13, %v3418_v13 }
 0x15e   :  { %545 = vmatmul.bf16.vlgmr.msrb.gmra.mxu1 %v536_v14  ;;  %558 = vmatmul.bf16.vlgmr.msrb.gmra.mxu2 %v536_v14 }
 0x15f   :  { %571 = vmatmul.bf16.vlgmr.msra.gmra.mxu3 %v536_v14  ;;  %755 = vmatpush.bf16.msrb.mxu1 %v3233_v5 }
 0x160   :  { %825 = vmatpush.bf16.msrb.mxu2 %v3148_v8  ;;  %838 = vmatpush.bf16.msra.mxu3 %v3186_v35 }
 0x163   :  { %756 = vmatpush.bf16.msrb.mxu1 %v3239_v9 }
 0x164   :  { %826 = vmatpush.bf16.msrb.mxu2 %v3157_v11  ;;  %839 = vmatpush.bf16.msra.mxu3 %v3190_v38 }
 0x167   :  { %757 = vmatpush.bf16.msrb.mxu1 %v3249_v16 }
 0x168   :  { %827 = vmatpush.bf16.msrb.mxu2 %v3163_v15  ;;  %840 = vmatpush.bf16.msra.mxu3 %v3194_v41 }
 0x16b   :  { %758 = vmatpush.bf16.msrb.mxu1 %v3254_v19 }
 0x16c   :  { %828 = vmatpush.bf16.msrb.mxu2 %v3172_v20  ;;  %841 = vmatpush.bf16.msra.mxu3 %v3197_v44 }
 0x16f   :  { %759 = vmatpush.bf16.msrb.mxu1 %v3273_v36 }
 0x170   :  { %829 = vmatpush.bf16.msrb.mxu2 %v3175_v23  ;;  %842 = vmatpush.bf16.msra.mxu3 %v3200_v47 }
 0x173   :  { %760 = vmatpush.bf16.msrb.mxu1 %v3277_v39 }
 0x174   :  { %830 = vmatpush.bf16.msrb.mxu2 %v3178_v26  ;;  %843 = vmatpush.bf16.msra.mxu3 %v3203_v50 }
 0x177   :  { %761 = vmatpush.bf16.msrb.mxu1 %v3296_v52 }
 0x178   :  { %831 = vmatpush.bf16.msrb.mxu2 %v3181_v29  ;;  %844 = vmatpush.bf16.msra.mxu3 %v3206_v53 }
 0x17b   :  { %762 = vmatpush.bf16.msrb.mxu1 %v3300_v55 }
 0x17c   :  { %832 = vmatpush.bf16.msrb.mxu2 %v3184_v34  ;;  %845 = vmatpush.bf16.msra.mxu3 %v3209_v56 }
 0x1db   :  { %v546_v27 = vpop.f32.mrf.mxu1 }
 0x1dc   :  { %v576_v28 = vadd.f32 %v546_v27, %v173_v22 }
 0x1de   :  { %v2545_v43 = vmul.f32 -1.442695, %v576_v28 }
 0x1e0   :  { %2880 = vpow2.f32 %v2545_v43 }
 0x1e1   :  { %v559_v30 = vpop.f32.mrf.mxu2 }
 0x1e2   :  { %v596_v37 = vadd.f32 %v559_v30, %v202_v49  ;;  %v572_v33 = vpop.f32.mrf.mxu3 }
 0x1e3   :  { %v548_v42 = vpop.f32.mrf.mxu1 }
 0x1e4   :  { %v2546_v61 = vmul.f32 -1.442695, %v596_v37 }
 0x1e6   :  { %v2881_v6 = vpop.eup %2880  ;;  %2882 = vpow2.f32 %v2546_v61  ;;  %v616_v61 = vadd.f32 %v3413_v62, %v572_v33 }
 0x1e7   :  { %v580_v51 = vadd.f32 1.0, %v2881_v6  ;;  %v231_v6 = vadd.f32 %v3362_v24, %v3373_v40 }
 0x1e9   :  { %2884 = vrcp.f32 %v580_v51  ;;  %v561_v57 = vpop.f32.mrf.mxu2  ;;  %v592_v22 = vand.u32 2147483648, %v580_v51  ;;  %v590_v27 = vand.u32 2147483647, %v580_v51  ;;  %vm586_vm2 = vweird.f32 %v580_v51 }
 0x1ea   :  { %v574_v58 = vpop.f32.mrf.mxu3 }
 0x1eb   :  { %v593_v30 = vor.u32 1.1754944e-38, %v592_v22  ;;  %vm591_vm4 = vcmp.eq.f32.partialorder %v590_v27, 8.507059e+37 }
 0x1ec   :  { %v2883_v63 = vpop.eup %2882 }
 0x1ed   :  { %v600_v17 = vadd.f32 1.0, %v2883_v63 }
 0x1ef   :  { %v2885_v12 = vpop.eup %2884  ;;  %2886 = vrcp.f32 %v600_v17  ;;  %v612_v63 = vand.u32 2147483648, %v600_v17  ;;  %vm606_vm6 = vweird.f32 %v600_v17 }
 0x1f0   :  { %v582_v10 = vmul.f32 %v2885_v12, %v580_v51  ;;  %vm587_vm1 = vweird.f32 %v2885_v12 }
 0x1f1   :  { %vm588_vm3 = vmor %vm586_vm2, %vm587_vm1  ;;  %v613_v51 = vor.u32 1.1754944e-38, %v612_v63 }
 0x1f2   :  { %v583_v14 = vsub.f32 1.0, %v582_v10 }
 0x1f4   :  { %v584_v18 = vmul.f32 %v2885_v12, %v583_v14  ;;  %v610_v14 = vand.u32 2147483647, %v600_v17 }
 0x1f5   :  { %v2887_v28 = vpop.eup %2886 }
 0x1f6   :  { %v602_v43 = vmul.f32 %v2887_v28, %v600_v17  ;;  %v585_v49 = vadd.f32 %v2885_v12, %v584_v18  ;;  %vm607_vm5 = vweird.f32 %v2887_v28  ;;  %vm611_vm8 = vcmp.eq.f32.partialorder %v610_v14, 8.507059e+37 }
 0x1f7   :  { %vm608_vm7 = vmor %vm606_vm6, %vm607_vm5 }
 0x1f8   :  { %v603_v37 = vsub.f32 1.0, %v602_v43  ;;  %v589_v42 = vsel %vm588_vm3, %v2885_v12, %v585_v49 }
 0x1f9   :  { %v594_v57 = vsel %vm591_vm4, %v593_v30, %v589_v42 }
 0x1fa   :  { %v604_v58 = vmul.f32 %v2887_v28, %v603_v37  ;;  %v617_v10 = vmul.f32 %v616_v61, %v594_v57 }
 0x1fc   :  { %v605_v4 = vadd.f32 %v2887_v28, %v604_v58  ;;  %v618_v18 = vadd.f32 %v617_v10, %v231_v6 }
 0x1fe   :  { %v609_v22 = vsel %vm608_vm7, %v2887_v28, %v605_v4  ;;  %2888 = vtanh.f32 %v618_v18 }
 0x1ff   :  { %v614_v12 = vsel %vm611_vm8, %v613_v51, %v609_v22 }
 0x200   :  { %v620_v27 = vsub.f32 1.0, %v614_v12  ;;  %v622_v24 = vmul.f32 %v614_v12, %v3418_v13 }
 0x204   :  { %v2889_v33 = vpop.eup %2888 }
 0x205   :  { %v621_v43 = vmul.f32 %v2889_v33, %v620_v27 }
 0x207   :  { %v3458_v49 = vadd.f32 %v622_v24, %v621_v43 }
 0x209   :  { %v632_v30 = vpack.c.bf16 %v3458_v49, %v3458_v49 }
 0x20b   :  { %641 = vmatmul.bf16.vlgmr.msra.gmra.mxu0 %v632_v30  ;;  %654 = vmatmul.bf16.vlgmr.msra.gmra.mxu1 %v632_v30 }
 0x20c   :  { %667 = vmatmul.bf16.vlgmr.msra.gmra.mxu2 %v632_v30  ;;  %851 = vmatpush.bf16.msra.mxu0 %v3233_v5 }
 0x20d   :  { %921 = vmatpush.bf16.msra.mxu1 %v3148_v8  ;;  %934 = vmatpush.bf16.msra.mxu2 %v3186_v35 }
 0x210   :  { %852 = vmatpush.bf16.msra.mxu0 %v3239_v9 }
 0x211   :  { %922 = vmatpush.bf16.msra.mxu1 %v3157_v11  ;;  %935 = vmatpush.bf16.msra.mxu2 %v3190_v38 }
 0x214   :  { %853 = vmatpush.bf16.msra.mxu0 %v3249_v16 }
 0x215   :  { %923 = vmatpush.bf16.msra.mxu1 %v3163_v15  ;;  %936 = vmatpush.bf16.msra.mxu2 %v3194_v41 }
 0x218   :  { %854 = vmatpush.bf16.msra.mxu0 %v3254_v19 }
 0x219   :  { %924 = vmatpush.bf16.msra.mxu1 %v3172_v20  ;;  %937 = vmatpush.bf16.msra.mxu2 %v3197_v44 }
 0x21c   :  { %855 = vmatpush.bf16.msra.mxu0 %v3273_v36 }
 0x21d   :  { %925 = vmatpush.bf16.msra.mxu1 %v3175_v23  ;;  %938 = vmatpush.bf16.msra.mxu2 %v3200_v47 }
 0x220   :  { %856 = vmatpush.bf16.msra.mxu0 %v3277_v39 }
 0x221   :  { %926 = vmatpush.bf16.msra.mxu1 %v3178_v26  ;;  %939 = vmatpush.bf16.msra.mxu2 %v3203_v50 }
 0x224   :  { %857 = vmatpush.bf16.msra.mxu0 %v3296_v52 }
 0x225   :  { %927 = vmatpush.bf16.msra.mxu1 %v3181_v29  ;;  %940 = vmatpush.bf16.msra.mxu2 %v3206_v53 }
 0x228   :  { %858 = vmatpush.bf16.msra.mxu0 %v3300_v55 }
 0x229   :  { %928 = vmatpush.bf16.msra.mxu1 %v3184_v34  ;;  %941 = vmatpush.bf16.msra.mxu2 %v3209_v56 }
 0x288   :  { %v642_v4 = vpop.f32.mrf.mxu0  ;;  %v655_v17 = vpop.f32.mrf.mxu1 }
 0x289   :  { %v672_v28 = vadd.f32 %v642_v4, %v3367_v31  ;;  %v692_v37 = vadd.f32 %v655_v17, %v3370_v32 }
 0x28b   :  { %v2548_v42 = vmul.f32 -1.442695, %v672_v28  ;;  %v2549_v61 = vmul.f32 -1.442695, %v692_v37 }
 0x28d   :  { %2890 = vpow2.f32 %v2548_v42 }
 0x28e   :  { %2892 = vpow2.f32 %v2549_v61 }
 0x28f   :  { %v668_v6 = vpop.f32.mrf.mxu2 }
 0x290   :  { %v644_v57 = vpop.f32.mrf.mxu0  ;;  %v657_v58 = vpop.f32.mrf.mxu1  ;;  %v712_v42 = vadd.f32 %v3413_v62, %v668_v6 }
 0x293   :  { %v2891_v63 = vpop.eup %2890 }
 0x294   :  { %v2893_v10 = vpop.eup %2892  ;;  %v676_v14 = vadd.f32 1.0, %v2891_v63 }
 0x295   :  { %v696_v18 = vadd.f32 1.0, %v2893_v10 }
 0x296   :  { %2894 = vrcp.f32 %v676_v14  ;;  %v688_v43 = vand.u32 2147483648, %v676_v14  ;;  %v686_v30 = vand.u32 2147483647, %v676_v14  ;;  %vm682_vm10 = vweird.f32 %v676_v14 }
 0x297   :  { %2896 = vrcp.f32 %v696_v18  ;;  %v670_v51 = vpop.f32.mrf.mxu2  ;;  %v708_v58 = vand.u32 2147483648, %v696_v18  ;;  %vm702_vm14 = vweird.f32 %v696_v18  ;;  %v706_v10 = vand.u32 2147483647, %v696_v18 }
 0x298   :  { %v689_v28 = vor.u32 1.1754944e-38, %v688_v43  ;;  %vm687_vm12 = vcmp.eq.f32.partialorder %v686_v30, 8.507059e+37 }
 0x299   :  { %vm707_vm0 = vcmp.eq.f32.partialorder %v706_v10, 8.507059e+37 }
 0x29c   :  { %v2895_v22 = vpop.eup %2894 }
 0x29d   :  { %v2897_v12 = vpop.eup %2896  ;;  %v678_v27 = vmul.f32 %v2895_v22, %v676_v14  ;;  %vm683_vm9 = vweird.f32 %v2895_v22 }
 0x29e   :  { %v698_v31 = vmul.f32 %v2897_v12, %v696_v18  ;;  %vm684_vm11 = vmor %vm682_vm10, %vm683_vm9  ;;  %vm703_vm13 = vweird.f32 %v2897_v12 }
 0x29f   :  { %v679_v33 = vsub.f32 1.0, %v678_v27  ;;  %vm704_vm15 = vmor %vm702_vm14, %vm703_vm13 }
 0x2a0   :  { %v699_v32 = vsub.f32 1.0, %v698_v31  ;;  %v709_v31 = vor.u32 1.1754944e-38, %v708_v58 }
 0x2a1   :  { %v680_v24 = vmul.f32 %v2895_v22, %v679_v33 }
 0x2a2   :  { %v700_v4 = vmul.f32 %v2897_v12, %v699_v32 }
 0x2a3   :  { %v681_v17 = vadd.f32 %v2895_v22, %v680_v24 }
 0x2a4   :  { %v701_v61 = vadd.f32 %v2897_v12, %v700_v4 }
 0x2a5   :  { %v685_v37 = vsel %vm684_vm11, %v2895_v22, %v681_v17  ;;  %v178_v17 = vadd.f32 %v3378_v46, %v3359_v21 }
 0x2a6   :  { %v690_v57 = vsel %vm687_vm12, %v689_v28, %v685_v37  ;;  %v705_v27 = vsel %vm704_vm15, %v2897_v12, %v701_v61 }
 0x2a7   :  { %v713_v63 = vmul.f32 %v712_v42, %v690_v57  ;;  %v710_v14 = vsel %vm707_vm0, %v709_v31, %v705_v27 }
 0x2a8   :  { %v716_v33 = vsub.f32 1.0, %v710_v14  ;;  %v718_v6 = vmul.f32 %v710_v14, %v3458_v49 }
 0x2a9   :  { %v714_v51 = vadd.f32 %v713_v63, %v3376_v45  ;;  %v207_v45 = vadd.f32 %v3380_v48, %v3364_v25 }
 0x2ab   :  { %2898 = vtanh.f32 %v714_v51 }
 0x2b1   :  { %v2899_v22 = vpop.eup %2898 }
 0x2b2   :  { %v717_v32 = vmul.f32 %v2899_v22, %v716_v33 }
 0x2b4   :  { %v3491_v43 = vadd.f32 %v718_v6, %v717_v32 }
 0x2b6   :  { %v728_v24 = vpack.c.bf16 %v3491_v43, %v3491_v43 }
 0x2b8   :  { %737 = vmatmul.bf16.vlgmr.msrb.gmra.mxu3 %v728_v24  ;;  %750 = vmatmul.bf16.vlgmr.msrb.gmra.mxu0 %v728_v24 }
 0x2b9   :  { %763 = vmatmul.bf16.vlgmr.msrb.gmra.mxu1 %v728_v24  ;;  %947 = vmatpush.bf16.msrb.mxu3 %v3233_v5 }
 0x2ba   :  { %1017 = vmatpush.bf16.msrb.mxu0 %v3148_v8  ;;  %1030 = vmatpush.bf16.msrb.mxu1 %v3186_v35 }
 0x2bd   :  { %948 = vmatpush.bf16.msrb.mxu3 %v3239_v9 }
 0x2be   :  { %1018 = vmatpush.bf16.msrb.mxu0 %v3157_v11  ;;  %1031 = vmatpush.bf16.msrb.mxu1 %v3190_v38 }
 0x2c1   :  { %949 = vmatpush.bf16.msrb.mxu3 %v3249_v16 }
 0x2c2   :  { %1019 = vmatpush.bf16.msrb.mxu0 %v3163_v15  ;;  %1032 = vmatpush.bf16.msrb.mxu1 %v3194_v41 }
 0x2c5   :  { %950 = vmatpush.bf16.msrb.mxu3 %v3254_v19 }
 0x2c6   :  { %1020 = vmatpush.bf16.msrb.mxu0 %v3172_v20  ;;  %1033 = vmatpush.bf16.msrb.mxu1 %v3197_v44 }
 0x2c9   :  { %951 = vmatpush.bf16.msrb.mxu3 %v3273_v36 }
 0x2ca   :  { %1021 = vmatpush.bf16.msrb.mxu0 %v3175_v23  ;;  %1034 = vmatpush.bf16.msrb.mxu1 %v3200_v47 }
 0x2cd   :  { %952 = vmatpush.bf16.msrb.mxu3 %v3277_v39 }
 0x2ce   :  { %1022 = vmatpush.bf16.msrb.mxu0 %v3178_v26  ;;  %1035 = vmatpush.bf16.msrb.mxu1 %v3203_v50 }
 0x2d1   :  { %953 = vmatpush.bf16.msrb.mxu3 %v3296_v52 }
 0x2d2   :  { %1023 = vmatpush.bf16.msrb.mxu0 %v3181_v29  ;;  %1036 = vmatpush.bf16.msrb.mxu1 %v3206_v53 }
 0x2d5   :  { %954 = vmatpush.bf16.msrb.mxu3 %v3300_v55 }
 0x2d6   :  { %1024 = vmatpush.bf16.msrb.mxu0 %v3184_v34  ;;  %1037 = vmatpush.bf16.msrb.mxu1 %v3209_v56 }
 0x335   :  { %v751_v18 = vpop.f32.mrf.mxu0 }
 0x336   :  { %v788_v12 = vadd.f32 %v751_v18, %v207_v45  ;;  %v764_v30 = vpop.f32.mrf.mxu1 }
 0x338   :  { %v2552_v4 = vmul.f32 -1.442695, %v788_v12 }
 0x33a   :  { %2900 = vpow2.f32 %v2552_v4  ;;  %v808_v4 = vadd.f32 %v3413_v62, %v764_v30 }
 0x33b   :  { %v738_v28 = vpop.f32.mrf.mxu3 }
 0x33c   :  { %v768_v37 = vadd.f32 %v738_v28, %v178_v17 }
 0x33d   :  { %v753_v42 = vpop.f32.mrf.mxu0 }
 0x33e   :  { %v2551_v61 = vmul.f32 -1.442695, %v768_v37  ;;  %v766_v57 = vpop.f32.mrf.mxu1  ;;  %v236_v42 = vadd.f32 %v3382_v54, %v3373_v40 }
 0x340   :  { %v2901_v58 = vpop.eup %2900  ;;  %2902 = vpow2.f32 %v2551_v61 }
 0x341   :  { %v792_v63 = vadd.f32 1.0, %v2901_v58 }
 0x343   :  { %v740_v10 = vpop.f32.mrf.mxu3  ;;  %2904 = vrcp.f32 %v792_v63  ;;  %v804_v61 = vand.u32 2147483648, %v792_v63  ;;  %vm798_vm6 = vweird.f32 %v792_v63  ;;  %v802_v58 = vand.u32 2147483647, %v792_v63 }
 0x345   :  { %vm803_vm8 = vcmp.eq.f32.partialorder %v802_v58, 8.507059e+37 }
 0x346   :  { %v2903_v51 = vpop.eup %2902 }
 0x347   :  { %v772_v48 = vadd.f32 1.0, %v2903_v51 }
 0x349   :  { %2906 = vrcp.f32 %v772_v48  ;;  %v2905_v27 = vpop.eup %2904  ;;  %v784_v32 = vand.u32 2147483648, %v772_v48  ;;  %v782_v24 = vand.u32 2147483647, %v772_v48  ;;  %vm778_vm2 = vweird.f32 %v772_v48 }
 0x34a   :  { %v794_v31 = vmul.f32 %v2905_v27, %v792_v63  ;;  %vm799_vm5 = vweird.f32 %v2905_v27 }
 0x34b   :  { %v785_v12 = vor.u32 1.1754944e-38, %v784_v32  ;;  %vm783_vm4 = vcmp.eq.f32.partialorder %v782_v24, 8.507059e+37  ;;  %vm800_vm7 = vmor %vm798_vm6, %vm799_vm5 }
 0x34c   :  { %v795_v22 = vsub.f32 1.0, %v794_v31 }
 0x34e   :  { %v796_v45 = vmul.f32 %v2905_v27, %v795_v22 }
 0x34f   :  { %v2907_v14 = vpop.eup %2906 }
 0x350   :  { %v774_v33 = vmul.f32 %v2907_v14, %v772_v48  ;;  %vm779_vm1 = vweird.f32 %v2907_v14  ;;  %v797_v28 = vadd.f32 %v2905_v27, %v796_v45  ;;  %v805_v48 = vor.u32 1.1754944e-38, %v804_v61 }
 0x351   :  { %vm780_vm3 = vmor %vm778_vm2, %vm779_vm1 }
 0x352   :  { %v775_v46 = vsub.f32 1.0, %v774_v33  ;;  %v801_v51 = vsel %vm800_vm7, %v2905_v27, %v797_v28 }
 0x353   :  { %v806_v31 = vsel %vm803_vm8, %v805_v48, %v801_v51 }
 0x354   :  { %v776_v6 = vmul.f32 %v2907_v14, %v775_v46  ;;  %v812_v30 = vsub.f32 1.0, %v806_v31  ;;  %v814_v22 = vmul.f32 %v806_v31, %v3491_v43 }
 0x356   :  { %v777_v18 = vadd.f32 %v2907_v14, %v776_v6 }
 0x358   :  { %v781_v17 = vsel %vm780_vm3, %v2907_v14, %v777_v18 }
 0x359   :  { %v786_v37 = vsel %vm783_vm4, %v785_v12, %v781_v17 }
 0x35a   :  { %v809_v57 = vmul.f32 %v808_v4, %v786_v37 }
 0x35c   :  { %v810_v10 = vadd.f32 %v809_v57, %v236_v42 }
 0x35e   :  { %2908 = vtanh.f32 %v810_v10 }
 0x364   :  { %v2909_v14 = vpop.eup %2908 }
 0x365   :  { %v813_v33 = vmul.f32 %v2909_v14, %v812_v30 }
 0x367   :  { %v3527_v46 = vadd.f32 %v814_v22, %v813_v33 }
 0x369   :  { %v824_v54 = vpack.c.bf16 %v3527_v46, %v3527_v46 }
 0x36b   :  { %833 = vmatmul.bf16.vlgmr.msrb.gmra.mxu2 %v824_v54  ;;  %846 = vmatmul.bf16.vlgmr.msra.gmra.mxu3 %v824_v54 }
 0x36c   :  { %859 = vmatmul.bf16.vlgmr.msra.gmra.mxu0 %v824_v54  ;;  %1043 = vmatpush.bf16.msrb.mxu2 %v3233_v5 }
 0x36d   :  { %1113 = vmatpush.bf16.msra.mxu3 %v3148_v8  ;;  %1126 = vmatpush.bf16.msra.mxu0 %v3186_v35 }
 0x370   :  { %1044 = vmatpush.bf16.msrb.mxu2 %v3239_v9 }
 0x371   :  { %1114 = vmatpush.bf16.msra.mxu3 %v3157_v11  ;;  %1127 = vmatpush.bf16.msra.mxu0 %v3190_v38 }
 0x374   :  { %1045 = vmatpush.bf16.msrb.mxu2 %v3249_v16 }
 0x375   :  { %1115 = vmatpush.bf16.msra.mxu3 %v3163_v15  ;;  %1128 = vmatpush.bf16.msra.mxu0 %v3194_v41 }
 0x378   :  { %1046 = vmatpush.bf16.msrb.mxu2 %v3254_v19 }
 0x379   :  { %1116 = vmatpush.bf16.msra.mxu3 %v3172_v20  ;;  %1129 = vmatpush.bf16.msra.mxu0 %v3197_v44 }
 0x37c   :  { %1047 = vmatpush.bf16.msrb.mxu2 %v3273_v36 }
 0x37d   :  { %1117 = vmatpush.bf16.msra.mxu3 %v3175_v23  ;;  %1130 = vmatpush.bf16.msra.mxu0 %v3200_v47 }
 0x380   :  { %1048 = vmatpush.bf16.msrb.mxu2 %v3277_v39 }
 0x381   :  { %1118 = vmatpush.bf16.msra.mxu3 %v3178_v26  ;;  %1131 = vmatpush.bf16.msra.mxu0 %v3203_v50 }
 0x384   :  { %1049 = vmatpush.bf16.msrb.mxu2 %v3296_v52 }
 0x385   :  { %1119 = vmatpush.bf16.msra.mxu3 %v3181_v29  ;;  %1132 = vmatpush.bf16.msra.mxu0 %v3206_v53 }
 0x388   :  { %1050 = vmatpush.bf16.msrb.mxu2 %v3300_v55 }
 0x389   :  { %1120 = vmatpush.bf16.msra.mxu3 %v3184_v34  ;;  %1133 = vmatpush.bf16.msra.mxu0 %v3209_v56 }
 0x3e9   :  { %v860_v8 = vpop.f32.mrf.mxu0 }
 0x3ea   :  { %v904_v4 = vadd.f32 %v3413_v62, %v860_v8 }
 0x3ee   :  { %v834_v11 = vpop.f32.mrf.mxu2  ;;  %v847_v15 = vpop.f32.mrf.mxu3 }
 0x3ef   :  { %v864_v20 = vadd.f32 %v834_v11, %v3385_v59  ;;  %v884_v23 = vadd.f32 %v847_v15, %v3388_v60  ;;  %v2653_v11 = vld [vmem:[#allocation3 + $0xa8] sm:$0xf] }
 0x3f1   :  { %v2554_v26 = vmul.f32 -1.442695, %v864_v20  ;;  %v2555_v35 = vmul.f32 -1.442695, %v884_v23  ;;  %v862_v38 = vpop.f32.mrf.mxu0 }
 0x3f3   :  { %2910 = vpow2.f32 %v2554_v26 }
 0x3f4   :  { %2912 = vpow2.f32 %v2555_v35  ;;  %v2827_v35 = vld [vmem:[#allocation3 + $0x80] sm:$0xf0] }
 0x3f6   :  { %v836_v29 = vpop.f32.mrf.mxu2  ;;  %v849_v41 = vpop.f32.mrf.mxu3 }
 0x3f7   :  { %v2617_v41 = vld [vmem:[#allocation3 + $0x60] sm:$0xf] }
 0x3f9   :  { %v2911_v44 = vpop.eup %2910 }
 0x3fa   :  { %v2913_v47 = vpop.eup %2912  ;;  %v868_v50 = vadd.f32 1.0, %v2911_v44  ;;  %v2824_v44 = vld [vmem:[#allocation3 + $0x68] sm:$0xf0] }
 0x3fb   :  { %v888_v34 = vadd.f32 1.0, %v2913_v47 }
 0x3fc   :  { %2914 = vrcp.f32 %v868_v50  ;;  %v880_v32 = vand.u32 2147483648, %v868_v50  ;;  %v878_v24 = vand.u32 2147483647, %v868_v50  ;;  %vm874_vm10 = vweird.f32 %v868_v50 }
 0x3fd   :  { %2916 = vrcp.f32 %v888_v34  ;;  %v900_v61 = vand.u32 2147483648, %v888_v34  ;;  %vm894_vm14 = vweird.f32 %v888_v34  ;;  %v898_v57 = vand.u32 2147483647, %v888_v34 }
 0x3fe   :  { %v881_v12 = vor.u32 1.1754944e-38, %v880_v32  ;;  %vm879_vm12 = vcmp.eq.f32.partialorder %v878_v24, 8.507059e+37  ;;  %v2593_v32 = vld [vmem:[#allocation3 + $0x30] sm:$0xf] }
 0x3ff   :  { %v901_v51 = vor.u32 1.1754944e-38, %v900_v61  ;;  %vm899_vm0 = vcmp.eq.f32.partialorder %v898_v57, 8.507059e+37  ;;  %v2812_v61 = vld [vmem:[#allocation3 + $0x8] sm:$0xf0] }
 0x402   :  { %v2915_v53 = vpop.eup %2914 }
 0x403   :  { %v2917_v56 = vpop.eup %2916  ;;  %v870_v63 = vmul.f32 %v2915_v53, %v868_v50  ;;  %vm875_vm9 = vweird.f32 %v2915_v53  ;;  %v2618_v50 = vor.u32 %v2824_v44, %v2617_v41  ;;  %v2857_v41 = vld [vmem:[#allocation5 + $0x170] sm:$0xf0] }
 0x404   :  { %v890_v27 = vmul.f32 %v2917_v56, %v888_v34  ;;  %vm876_vm11 = vmor %vm874_vm10, %vm875_vm9  ;;  %vm895_vm13 = vweird.f32 %v2917_v56 }
 0x405   :  { %v871_v59 = vsub.f32 1.0, %v870_v63  ;;  %vm896_vm15 = vmor %vm894_vm14, %vm895_vm13  ;;  %v2821_v63 = vld [vmem:[#allocation3 + $0x50] sm:$0xf0] }
 0x406   :  { %v891_v60 = vsub.f32 1.0, %v890_v27 }
 0x407   :  { %v872_v6 = vmul.f32 %v2915_v53, %v871_v59 }
 0x408   :  { %v892_v45 = vmul.f32 %v2917_v56, %v891_v60  ;;  %v2818_v60 = vld [vmem:[#allocation3 + $0x38] sm:$0xf0] }
 0x409   :  { %v873_v18 = vadd.f32 %v2915_v53, %v872_v6  ;;  %v2594_v24 = vor.u32 %v2818_v60, %v2593_v32  ;;  %v4090_v32 = vld [vmem:[#allocation9_spill] sm:$0xff] }
 0x40a   :  { %v893_v37 = vadd.f32 %v2917_v56, %v892_v45 }
 0x40b   :  { %v877_v17 = vsel %vm876_vm11, %v2915_v53, %v873_v18  ;;  %v2581_v18 = vld [vmem:[#allocation3 + $0x18] sm:$0xf] }
 0x40c   :  { %v882_v28 = vsel %vm879_vm12, %v881_v12, %v877_v17  ;;  %v897_v10 = vsel %vm896_vm15, %v2917_v56, %v893_v37  ;;  %v2605_v56 = vld [vmem:[#allocation3 + $0x48] sm:$0xf]  ;;  %v2815_v12 = vld [vmem:[#allocation3 + $0x20] sm:$0xf0] }
 0x40d   :  { %v905_v42 = vmul.f32 %v904_v4, %v882_v28  ;;  %v902_v48 = vsel %vm899_vm0, %v901_v51, %v897_v10  ;;  %v2606_v59 = vor.u32 %v2821_v63, %v2605_v56  ;;  %v2582_v28 = vor.u32 %v2815_v12, %v2581_v18  ;;  %v2832_v63 = vld [vmem:[#allocation3 + $0xac] sm:$0xf]  ;;  %v2834_v18 = vld [vmem:[#allocation3 + $0xb8] sm:$0xf0] }
 0x40e   :  { %v908_v31 = vsub.f32 1.0, %v902_v48  ;;  %v910_v33 = vmul.f32 %v902_v48, %v3527_v46 }
 0x40f   :  { %v906_v58 = vadd.f32 %v905_v42, %v3391_v1  ;;  %v183_v1 = vadd.f32 %v3393_v2, %v3359_v21  ;;  %v2629_v2 = vld [vmem:[#allocation3 + $0x78] sm:$0xf]  ;;  %v2569_v42 = vld [vmem:[#allocation3] sm:$0xf] }
 0x410   :  { %v2630_v29 = vor.u32 %v2827_v35, %v2629_v2  ;;  %v3586_v2 = vpack.c.bf16 %v3458_v49, %v3418_v13  ;;  %v3591_v35 = vpack.c.bf16 %v3527_v46, %v3491_v43  ;;  %v2738_v13 = vld [vmem:[#allocation5 + $0x150] sm:$0xf]  ;;  %v2854_v49 = vld [vmem:[#allocation5 + $0x158] sm:$0xf0]  ;;  %v2726_v43 = vld [vmem:[#allocation5 + $0x138] sm:$0xf] }
 0x411   :  { %2918 = vtanh.f32 %v906_v58  ;;  %v2851_v46 = vld [vmem:[#allocation5 + $0x140] sm:$0xf0] }
 0x417   :  { %v2919_v30 = vpop.eup %2918 }
 0x418   :  { %v909_v14 = vmul.f32 %v2919_v30, %v908_v31  ;;  %v2570_v31 = vor.u32 %v2812_v61, %v2569_v42  ;;  %v2829_v42 = vld [vmem:[#allocation3 + $0x94] sm:$0xf]  ;;  %v2643_v61 = vld [vmem:[#allocation3 + $0x9c] sm:$0xf0] }
 0x41a   :  { %v3560_v22 = vadd.f32 %v910_v33, %v909_v14 }
 0x41c   :  { %v920_v54 = vpack.c.bf16 %v3560_v22, %v3560_v22 }
 0x41e   :  { %929 = vmatmul.bf16.vlgmr.msra.gmra.mxu1 %v920_v54  ;;  %942 = vmatmul.bf16.vlgmr.msra.gmra.mxu2 %v920_v54 }
 0x41f   :  { %955 = vmatmul.bf16.vlgmr.msrb.gmra.mxu3 %v920_v54  ;;  %1139 = vmatpush.bf16.msra.mxu1 %v3233_v5  ;;  %v2833_v5 = vld [vmem:[#allocation3 + $0xb0] sm:$0xf0] }
 0x423   :  { %1140 = vmatpush.bf16.msra.mxu1 %v3239_v9  ;;  %v2654_v9 = vor.u32 %v2833_v5, %v2653_v11 }
 0x425   :  { %1384 = vmatpush.bf16.msra.mxu2 %v2654_v9 }
 0x427   :  { %1141 = vmatpush.bf16.msra.mxu1 %v3249_v16  ;;  %v2641_v16 = vld [vmem:[#allocation3 + $0x90] sm:$0xf] }
 0x42b   :  { %1142 = vmatpush.bf16.msra.mxu1 %v3254_v19  ;;  %v2830_v19 = vld [vmem:[#allocation3 + $0x98] sm:$0xf0] }
 0x42f   :  { %1143 = vmatpush.bf16.msra.mxu1 %v3273_v36  ;;  %v212_v36 = vadd.f32 %v3395_v3, %v3364_v25 }
 0x433   :  { %1144 = vmatpush.bf16.msra.mxu1 %v3277_v39  ;;  %v2642_v39 = vor.u32 %v2830_v19, %v2641_v16 }
 0x435   :  { %1385 = vmatpush.bf16.msra.mxu2 %v2642_v39 }
 0x437   :  { %1145 = vmatpush.bf16.msra.mxu1 %v3296_v52 }
 0x439   :  { %1386 = vmatpush.bf16.msra.mxu2 %v2630_v29  ;;  %v2750_v29 = vld [vmem:[#allocation5 + $0x168] sm:$0xf] }
 0x43a   :  { %v3599_v44 = vor.u32 %v2857_v41, %v2750_v29 }
 0x43b   :  { %1146 = vmatpush.bf16.msra.mxu1 %v3300_v55 }
 0x43d   :  { %1387 = vmatpush.bf16.msra.mxu2 %v2618_v50  ;;  %v3605_v50 = vor.u32 %v2851_v46, %v2726_v43  ;;  %v2666_v46 = vld [vmem:[#allocation5 + $0xc0] sm:$0xf] }
 0x441   :  { %1388 = vmatpush.bf16.msra.mxu2 %v2606_v59  ;;  %v2661_v59 = vld [vmem:[#allocation3 + $0xb0] sm:$0xf] }
 0x442   :  { %v2662_v12 = vor.u32 %v2834_v18, %v2661_v59  ;;  %v2822_v59 = vld [vmem:[#allocation3 + $0x58] sm:$0xf0] }
 0x445   :  { %1389 = vmatpush.bf16.msra.mxu2 %v2594_v24 }
 0x449   :  { %1390 = vmatpush.bf16.msra.mxu2 %v2582_v28  ;;  %v2702_v28 = vld [vmem:[#allocation5 + $0x108] sm:$0xf] }
 0x44d   :  { %1391 = vmatpush.bf16.msra.mxu2 %v2570_v31 }
 0x49b   :  { %v930_v8 = vpop.f32.mrf.mxu1 }
 0x49c   :  { %v960_v15 = vadd.f32 %v930_v8, %v183_v1  ;;  %v241_v1 = vadd.f32 %v3397_v7, %v3373_v40 }
 0x49e   :  { %v2557_v20 = vmul.f32 -1.442695, %v960_v15 }
 0x4a0   :  { %2920 = vpow2.f32 %v2557_v20 }
 0x4a1   :  { %v943_v52 = vpop.f32.mrf.mxu2 }
 0x4a2   :  { %v980_v23 = vadd.f32 %v943_v52, %v212_v36  ;;  %v956_v55 = vpop.f32.mrf.mxu3 }
 0x4a3   :  { %v932_v26 = vpop.f32.mrf.mxu1  ;;  %v1000_v54 = vadd.f32 %v3413_v62, %v956_v55 }
 0x4a4   :  { %v2558_v38 = vmul.f32 -1.442695, %v980_v23 }
 0x4a6   :  { %v2921_v47 = vpop.eup %2920  ;;  %2922 = vpow2.f32 %v2558_v38 }
 0x4a7   :  { %v964_v34 = vadd.f32 1.0, %v2921_v47  ;;  %v3602_v47 = vor.u32 %v2854_v49, %v2738_v13 }
 0x4a9   :  { %2924 = vrcp.f32 %v964_v34  ;;  %v945_v3 = vpop.f32.mrf.mxu2  ;;  %v976_v37 = vand.u32 2147483648, %v964_v34  ;;  %v974_v58 = vand.u32 2147483647, %v964_v34  ;;  %vm970_vm2 = vweird.f32 %v964_v34 }
 0x4aa   :  { %v958_v53 = vpop.f32.mrf.mxu3 }
 0x4ab   :  { %v977_v30 = vor.u32 1.1754944e-38, %v976_v37  ;;  %vm975_vm4 = vcmp.eq.f32.partialorder %v974_v58, 8.507059e+37  ;;  %v2845_v37 = vld [vmem:[#allocation5 + $0x110] sm:$0xf0]  ;;  %v2646_v58 = vor.u32 %v2829_v42, %v2643_v61 }
 0x4ac   :  { %v2923_v27 = vpop.eup %2922 }
 0x4ad   :  { %v984_v6 = vadd.f32 1.0, %v2923_v27  ;;  %v2655_v27 = vld [vmem:[#allocation3 + $0xb4] sm:$0xf0] }
 0x4af   :  { %v2925_v45 = vpop.eup %2924  ;;  %2926 = vrcp.f32 %v984_v6  ;;  %v996_v5 = vand.u32 2147483648, %v984_v6  ;;  %v994_v9 = vand.u32 2147483647, %v984_v6  ;;  %vm990_vm6 = vweird.f32 %v984_v6 }
 0x4b0   :  { %v966_v4 = vmul.f32 %v2925_v45, %v964_v34  ;;  %vm971_vm1 = vweird.f32 %v2925_v45  ;;  %v2848_v34 = vld [vmem:[#allocation5 + $0x128] sm:$0xf0] }
 0x4b1   :  { %vm972_vm3 = vmor %vm970_vm2, %vm971_vm1  ;;  %v997_v19 = vor.u32 1.1754944e-38, %v996_v5  ;;  %vm995_vm8 = vcmp.eq.f32.partialorder %v994_v9, 8.507059e+37  ;;  %v2637_v5 = vld [vmem:[#allocation3 + $0x80] sm:$0xf]  ;;  %v2828_v9 = vld [vmem:[#allocation3 + $0x88] sm:$0xf0] }
 0x4b2   :  { %v967_v17 = vsub.f32 1.0, %v966_v4 }
 0x4b4   :  { %v968_v57 = vmul.f32 %v2925_v45, %v967_v17 }
 0x4b5   :  { %v2927_v10 = vpop.eup %2926 }
 0x4b6   :  { %v986_v51 = vmul.f32 %v2927_v10, %v984_v6  ;;  %v969_v48 = vadd.f32 %v2925_v45, %v968_v57  ;;  %vm991_vm5 = vweird.f32 %v2927_v10  ;;  %v4091_v6 = vld [vmem:[#allocation10_spill] sm:$0xff]  ;;  %v3613_v57 = vor.u32 %v2845_v37, %v2702_v28 }
 0x4b7   :  { %vm992_vm7 = vmor %vm990_vm6, %vm991_vm5 }
 0x4b8   :  { %v987_v14 = vsub.f32 1.0, %v986_v51  ;;  %v973_v33 = vsel %vm972_vm3, %v2925_v45, %v969_v48  ;;  %v2658_v45 = vor.u32 %v2832_v63, %v2655_v27  ;;  %v2831_v51 = vld [vmem:[#allocation3 + $0xa0] sm:$0xf0]  ;;  %v2613_v63 = vld [vmem:[#allocation3 + $0x50] sm:$0xf] }
 0x4b9   :  { %v978_v8 = vsel %vm975_vm4, %v977_v30, %v973_v33  ;;  %v2690_v30 = vld [vmem:[#allocation5 + $0xf0] sm:$0xf] }
 0x4ba   :  { %v988_v11 = vmul.f32 %v2927_v10, %v987_v14  ;;  %v1001_v15 = vmul.f32 %v1000_v54, %v978_v8  ;;  %1413 = vmatpush.bf16.msrb.mxu3 %v2658_v45  ;;  %v2842_v14 = vld [vmem:[#allocation5 + $0xf8] sm:$0xf0] }
 0x4bb   :  { %v2826_v8 = vld [vmem:[#allocation3 + $0x7c] sm:$0xf] }
 0x4bc   :  { %v989_v20 = vadd.f32 %v2927_v10, %v988_v11  ;;  %v1002_v16 = vadd.f32 %v1001_v15, %v241_v1  ;;  %v3618_v1 = vor.u32 %v2842_v14, %v2690_v30  ;;  %v2631_v11 = vld [vmem:[#allocation3 + $0x84] sm:$0xf0] }
 0x4bd   :  { %v2634_v15 = vor.u32 %v2826_v8, %v2631_v11 }
 0x4be   :  { %v993_v36 = vsel %vm992_vm7, %v2927_v10, %v989_v20  ;;  %2928 = vtanh.f32 %v1002_v16  ;;  %v2649_v10 = vld [vmem:[#allocation3 + $0x98] sm:$0xf]  ;;  %1414 = vmatpush.bf16.msrb.mxu3 %v2646_v58  ;;  %v2638_v20 = vor.u32 %v2828_v9, %v2637_v5  ;;  %v2811_v5 = vld [vmem:[#allocation3 + $0x4] sm:$0xf] }
 0x4bf   :  { %v998_v39 = vsel %vm995_vm8, %v997_v19, %v993_v36  ;;  %v2650_v48 = vor.u32 %v2831_v51, %v2649_v10  ;;  %v2678_v16 = vld [vmem:[#allocation5 + $0xd8] sm:$0xf]  ;;  %v2839_v19 = vld [vmem:[#allocation5 + $0xe0] sm:$0xf0]  ;;  %v2814_v10 = vld [vmem:[#allocation3 + $0x1c] sm:$0xf] }
 0x4c0   :  { %v1004_v62 = vsub.f32 1.0, %v998_v39  ;;  %v1006_v7 = vmul.f32 %v998_v39, %v3560_v22  ;;  %v2823_v36 = vld [vmem:[#allocation3 + $0x64] sm:$0xf]  ;;  %v2583_v51 = vld [vmem:[#allocation3 + $0x24] sm:$0xf0] }
 0x4c1   :  { %v2586_v14 = vor.u32 %v2814_v10, %v2583_v51  ;;  %v2704_v10 = vld [vmem:[#allocation5 + $0x114] sm:$0xf0] }
 0x4c2   :  { %1415 = vmatpush.bf16.msrb.mxu3 %v2634_v15  ;;  %v2571_v15 = vld [vmem:[#allocation3 + $0xc] sm:$0xf0] }
 0x4c4   :  { %v2929_v52 = vpop.eup %2928 }
 0x4c5   :  { %v1005_v23 = vmul.f32 %v2929_v52, %v1004_v62  ;;  %v3621_v62 = vor.u32 %v2839_v19, %v2678_v16  ;;  %v2619_v52 = vld [vmem:[#allocation3 + $0x6c] sm:$0xf0]  ;;  %v2813_v16 = vld [vmem:[#allocation3 + $0x10] sm:$0xf0] }
 0x4c6   :  { %v2622_v41 = vor.u32 %v2823_v36, %v2619_v52  ;;  %v2574_v36 = vor.u32 %v2811_v5, %v2571_v15  ;;  %v3634_v52 = vld [vmem:[%s4080_s5] ss:$0 sm:$0xff]  ;;  %v2668_v5 = vld [vmem:[#allocation5 + $0xcc] sm:$0xf0] }
 0x4c7   :  { %v3580_v55 = vadd.f32 %v1006_v7, %v1005_v23  ;;  %v2625_v23 = vld [vmem:[#allocation3 + $0x68] sm:$0xf]  ;;  %v2825_v7 = vld [vmem:[#allocation3 + $0x70] sm:$0xf0] }
 0x4c8   :  { %v2626_v13 = vor.u32 %v2825_v7, %v2625_v23  ;;  %1416 = vmatpush.bf16.msrb.mxu3 %v2622_v41 }
 0x4c9   :  { %v1016_v26 = vpack.c.bf16 %v3580_v55, %v3580_v55  ;;  %v3596_v38 = vpack.c.bf16 %v3580_v55, %v3560_v22  ;;  %v2714_v22 = vld [vmem:[#allocation5 + $0x120] sm:$0xf] }
 0x4ca   :  { %v3608_v56 = vor.u32 %v2848_v34, %v2714_v22  ;;  %v2836_v22 = vld [vmem:[#allocation5 + $0xc8] sm:$0xf0] }
 0x4cb   :  { %1025 = vmatmul.bf16.vlgmr.msrb.gmra.mxu0 %v1016_v26  ;;  %1038 = vmatmul.bf16.vlgmr.msrb.gmra.mxu1 %v1016_v26  ;;  %v2820_v34 = vld [vmem:[#allocation3 + $0x4c] sm:$0xf] }
 0x4cc   :  { %1051 = vmatmul.bf16.vlgmr.msrb.gmra.mxu2 %v1016_v26  ;;  %1664 = vmatpush.bf16.msrb.mxu1 %v3599_v44 }
 0x4cd   :  { %1442 = vmatpush.bf16.msrb.mxu0 %v2662_v12  ;;  %v2819_v12 = vld [vmem:[#allocation3 + $0x40] sm:$0xf0] }
 0x4d0   :  { %1665 = vmatpush.bf16.msrb.mxu1 %v3602_v47 }
 0x4d1   :  { %1443 = vmatpush.bf16.msrb.mxu0 %v2650_v48 }
 0x4d4   :  { %1666 = vmatpush.bf16.msrb.mxu1 %v3605_v50 }
 0x4d5   :  { %1444 = vmatpush.bf16.msrb.mxu0 %v2638_v20  ;;  %v2577_v20 = vld [vmem:[#allocation3 + $0x8] sm:$0xf] }
 0x4d6   :  { %v2578_v7 = vor.u32 %v2813_v16, %v2577_v20 }
 0x4d8   :  { %1667 = vmatpush.bf16.msrb.mxu1 %v3608_v56 }
 0x4d9   :  { %1445 = vmatpush.bf16.msrb.mxu0 %v2626_v13 }
 0x4dc   :  { %1392 = vmatmul.bf16.vlgmr.msra.gmra.mxu2 %v3586_v2  ;;  %1668 = vmatpush.bf16.msrb.mxu1 %v3613_v57 }
 0x4e0   :  { %1669 = vmatpush.bf16.msrb.mxu1 %v3618_v1 }
 0x4e4   :  { %1670 = vmatpush.bf16.msrb.mxu1 %v3621_v62 }
 0x4ec   :  { %1397 = vmatmul.bf16.gmra.mxu2 %v3591_v35 }
 0x4fc   :  { %1402 = vmatmul.bf16.gmra.mxu2 %v3596_v38 }
 0x548   :  { %v1026_v3 = vpop.f32.mrf.mxu0  ;;  %v1039_v53 = vpop.f32.mrf.mxu1 }
 0x549   :  { %v1056_v60 = vadd.f32 %v1026_v3, %v4090_v32  ;;  %v1076_v24 = vadd.f32 %v1039_v53, %v4091_v6  ;;  %v3627_v3 = vor.u32 %v2836_v22, %v2666_v46  ;;  %v2607_v53 = vld [vmem:[#allocation3 + $0x54] sm:$0xf0]  ;;  %v2614_v32 = vor.u32 %v2822_v59, %v2613_v63  ;;  %v2595_v6 = vld [vmem:[#allocation3 + $0x3c] sm:$0xf0]  ;;  %v4092_v46 = vld [vmem:[#allocation11_spill] sm:$0xff] }
 0x54a   :  { %v2610_v27 = vor.u32 %v2820_v34, %v2607_v53 }
 0x54b   :  { %v2560_v4 = vmul.f32 -1.442695, %v1056_v60  ;;  %v2561_v17 = vmul.f32 -1.442695, %v1076_v24  ;;  %1671 = vmatpush.bf16.msrb.mxu1 %v3627_v3  ;;  %v2817_v60 = vld [vmem:[#allocation3 + $0x34] sm:$0xf]  ;;  %1446 = vmatpush.bf16.msrb.mxu0 %v2614_v32 }
 0x54c   :  { %v2601_v24 = vld [vmem:[#allocation3 + $0x38] sm:$0xf]  ;;  %1417 = vmatpush.bf16.msrb.mxu3 %v2610_v27  ;;  %v2598_v18 = vor.u32 %v2817_v60, %v2595_v6  ;;  %v2856_v60 = vld [vmem:[#allocation5 + $0x16c] sm:$0xf] }
 0x54d   :  { %2930 = vpow2.f32 %v2560_v4  ;;  %v2602_v28 = vor.u32 %v2819_v12, %v2601_v24  ;;  %v2752_v6 = vld [vmem:[#allocation5 + $0x174] sm:$0xf0]  ;;  %v2740_v12 = vld [vmem:[#allocation5 + $0x15c] sm:$0xf0] }
 0x54e   :  { %2932 = vpow2.f32 %v2561_v17 }
 0x54f   :  { %v3615_v31 = vpop.f32.mrf.mxu2  ;;  %1447 = vmatpush.bf16.msrb.mxu0 %v2602_v28 }
 0x550   :  { %v1028_v33 = vpop.f32.mrf.mxu0  ;;  %v1041_v54 = vpop.f32.mrf.mxu1  ;;  %1418 = vmatpush.bf16.msrb.mxu3 %v2598_v18  ;;  %v1096_v23 = vadd.f32 %v3634_v52, %v3615_v31  ;;  %v2853_v18 = vld [vmem:[#allocation5 + $0x154] sm:$0xf] }
 0x551   :  { %v2589_v33 = vld [vmem:[#allocation3 + $0x20] sm:$0xf]  ;;  %v2816_v54 = vld [vmem:[#allocation3 + $0x28] sm:$0xf0] }
 0x552   :  { %v2590_v11 = vor.u32 %v2816_v54, %v2589_v33  ;;  %v2838_v54 = vld [vmem:[#allocation5 + $0xdc] sm:$0xf] }
 0x553   :  { %v2931_v39 = vpop.eup %2930 }
 0x554   :  { %v2933_v26 = vpop.eup %2932  ;;  %v1060_v29 = vadd.f32 1.0, %v2931_v39  ;;  %1419 = vmatpush.bf16.msrb.mxu3 %v2586_v14  ;;  %1448 = vmatpush.bf16.msrb.mxu0 %v2590_v11  ;;  %v4093_v14 = vmov 0  }
 0x555   :  { %v3623_v49 = vadd.f32 1.0, %v2933_v26 }
 0x556   :  { %2934 = vrcp.f32 %v1060_v29  ;;  %v1072_v58 = vand.u32 2147483648, %v1060_v29  ;;  %v1070_v30 = vand.u32 2147483647, %v1060_v29  ;;  %vm1066_vm10 = vweird.f32 %v1060_v29 }
 0x557   :  { %2936 = vrcp.f32 %v3623_v49  ;;  %v1054_v43 = vpop.f32.mrf.mxu2  ;;  %v1092_v41 = vand.u32 2147483648, %v3623_v49  ;;  %vm1086_vm14 = vweird.f32 %v3623_v49 }
 0x558   :  { %v1073_v19 = vor.u32 1.1754944e-38, %v1072_v58  ;;  %vm1071_vm12 = vcmp.eq.f32.partialorder %v1070_v30, 8.507059e+37  ;;  %v1090_v43 = vand.u32 2147483647, %v3623_v49  ;;  %1420 = vmatpush.bf16.msrb.mxu3 %v2574_v36  ;;  %1449 = vmatpush.bf16.msrb.mxu0 %v2578_v7  ;;  %v2844_v58 = vld [vmem:[#allocation5 + $0x10c] sm:$0xf] }
 0x559   :  { %v1093_v53 = vor.u32 1.1754944e-38, %v1092_v41  ;;  %v3666_v51 = vor.u32 %v2844_v58, %v2704_v10  ;;  %v2692_v30 = vld [vmem:[#allocation5 + $0xfc] sm:$0xf0]  ;;  %v4094_v36 = vld [vmem:[#allocation12_spill] sm:$0xff] }
 0x55a   :  { %vm1091_vm0 = vcmp.eq.f32.partialorder %v1090_v43, 8.507059e+37  ;;  %v2858_v7 = vld [vmem:[#allocation5 + $0x178] sm:$0xf0]  ;;  %v2698_v10 = vld [vmem:[#allocation5 + $0xf8] sm:$0xf] }
 0x55c   :  { %v2935_v45 = vpop.eup %2934 }
 0x55d   :  { %v2937_v4 = vpop.eup %2936  ;;  %v1062_v17 = vmul.f32 %v2935_v45, %v1060_v29  ;;  %vm1067_vm9 = vweird.f32 %v2935_v45 }
 0x55e   :  { %v1082_v37 = vmul.f32 %v2937_v4, %v3623_v49  ;;  %vm1068_vm11 = vmor %vm1066_vm10, %vm1067_vm9  ;;  %vm1087_vm13 = vweird.f32 %v2937_v4 }
 0x55f   :  { %v1063_v42 = vsub.f32 1.0, %v1062_v17  ;;  %vm1088_vm15 = vmor %vm1086_vm14, %vm1087_vm13  ;;  %v2728_v17 = vld [vmem:[#allocation5 + $0x144] sm:$0xf0] }
 0x560   :  { %v1083_v61 = vsub.f32 1.0, %v1082_v37  ;;  %v2847_v37 = vld [vmem:[#allocation5 + $0x124] sm:$0xf] }
 0x561   :  { %v1064_v48 = vmul.f32 %v2935_v45, %v1063_v42  ;;  %v2716_v42 = vld [vmem:[#allocation5 + $0x12c] sm:$0xf0] }
 0x562   :  { %v1084_v8 = vmul.f32 %v2937_v4, %v1083_v61  ;;  %v3661_v61 = vor.u32 %v2847_v37, %v2716_v42 }
 0x563   :  { %v1065_v9 = vadd.f32 %v2935_v45, %v1064_v48  ;;  %v2841_v48 = vld [vmem:[#allocation5 + $0xf4] sm:$0xf] }
 0x564   :  { %v1085_v26 = vadd.f32 %v2937_v4, %v1084_v8  ;;  %v3674_v33 = vor.u32 %v2841_v48, %v2692_v30  ;;  %v2680_v8 = vld [vmem:[#allocation5 + $0xe4] sm:$0xf0]  ;;  %v2843_v48 = vld [vmem:[#allocation5 + $0x100] sm:$0xf0] }
 0x565   :  { %v1069_v39 = vsel %vm1068_vm11, %v2935_v45, %v1065_v9  ;;  %v3647_v45 = vor.u32 %v2856_v60, %v2752_v6  ;;  %v3679_v11 = vor.u32 %v2838_v54, %v2680_v8  ;;  %v2722_v60 = vld [vmem:[#allocation5 + $0x128] sm:$0xf]  ;;  %v2849_v6 = vld [vmem:[#allocation5 + $0x130] sm:$0xf0]  ;;  %v3742_v54 = vor.u32 %v2843_v48, %v2698_v10 }
 0x566   :  { %v1074_v29 = vsel %vm1071_vm12, %v1073_v19, %v1069_v39  ;;  %v1089_v34 = vsel %vm1088_vm15, %v2937_v4, %v1085_v26  ;;  %v3651_v4 = vor.u32 %v2853_v18, %v2740_v12  ;;  %v188_v39 = vadd.f32 %v4094_v36, %v3359_v21  ;;  %v2710_v12 = vld [vmem:[#allocation5 + $0x110] sm:$0xf]  ;;  %v2674_v36 = vld [vmem:[#allocation5 + $0xc8] sm:$0xf] }
 0x567   :  { %v1097_v13 = vmul.f32 %v1096_v23, %v1074_v29  ;;  %v1094_v31 = vsel %vm1091_vm0, %v1093_v53, %v1089_v34  ;;  %v2734_v53 = vld [vmem:[#allocation5 + $0x140] sm:$0xf] }
 0x568   :  { %v1100_v63 = vsub.f32 1.0, %v1094_v31  ;;  %v1102_v32 = vmul.f32 %v1094_v31, %v3580_v55  ;;  %v2850_v55 = vld [vmem:[#allocation5 + $0x13c] sm:$0xf]  ;;  %v2852_v31 = vld [vmem:[#allocation5 + $0x148] sm:$0xf0] }
 0x569   :  { %v1098_v22 = vadd.f32 %v1097_v13, %v4092_v46  ;;  %v3656_v28 = vor.u32 %v2850_v55, %v2728_v17  ;;  %v2846_v55 = vld [vmem:[#allocation5 + $0x118] sm:$0xf0] }
 0x56a   :  { %v3735_v17 = vor.u32 %v2846_v55, %v2710_v12 }
 0x56b   :  { %2938 = vtanh.f32 %v1098_v22 }
 0x571   :  { %v2939_v27 = vpop.eup %2938 }
 0x572   :  { %v1101_v59 = vmul.f32 %v2939_v27, %v1100_v63  ;;  %v3722_v63 = vor.u32 %v2852_v31, %v2734_v53 }
 0x574   :  { %v3643_v24 = vadd.f32 %v1102_v32, %v1101_v59 }
 0x576   :  { %v1112_v49 = vpack.c.bf16 %v3643_v24, %v3643_v24 }
 0x578   :  { %1121 = vmatmul.bf16.vlgmr.msra.gmra.mxu3 %v1112_v49  ;;  %1134 = vmatmul.bf16.vlgmr.msra.gmra.mxu0 %v1112_v49 }
 0x579   :  { %1147 = vmatmul.bf16.vlgmr.msra.gmra.mxu1 %v1112_v49  ;;  %1756 = vmatpush.bf16.msra.mxu3 %v3599_v44  ;;  %v3728_v49 = vor.u32 %v2849_v6, %v2722_v60 }
 0x57a   :  { %1677 = vmatpush.bf16.msra.mxu1 %v3647_v45  ;;  %1769 = vmatpush.bf16.msra.mxu0 %v3647_v45 }
 0x57d   :  { %1757 = vmatpush.bf16.msra.mxu3 %v3602_v47 }
 0x57e   :  { %1678 = vmatpush.bf16.msra.mxu1 %v3651_v4  ;;  %1770 = vmatpush.bf16.msra.mxu0 %v3651_v4 }
 0x581   :  { %1758 = vmatpush.bf16.msra.mxu3 %v3605_v50 }
 0x582   :  { %1679 = vmatpush.bf16.msra.mxu1 %v3656_v28  ;;  %1771 = vmatpush.bf16.msra.mxu0 %v3656_v28 }
 0x585   :  { %1759 = vmatpush.bf16.msra.mxu3 %v3608_v56 }
 0x586   :  { %1680 = vmatpush.bf16.msra.mxu1 %v3661_v61  ;;  %1772 = vmatpush.bf16.msra.mxu0 %v3661_v61 }
 0x588   :  { %1421 = vmatmul.bf16.vlgmr.msrb.gmra.mxu3 %v3586_v2  ;;  %1450 = vmatmul.bf16.vlgmr.msrb.gmra.mxu0 %v3586_v2  ;;  %v2835_v2 = vld [vmem:[#allocation5 + $0xc4] sm:$0xf] }
 0x589   :  { %1672 = vmatmul.bf16.vlgmr.msrb.gmra.mxu1 %v4093_v14  ;;  %1760 = vmatpush.bf16.msra.mxu3 %v3613_v57  ;;  %v3684_v15 = vor.u32 %v2835_v2, %v2668_v5 }
 0x58a   :  { %1681 = vmatpush.bf16.msra.mxu1 %v3666_v51  ;;  %1773 = vmatpush.bf16.msra.mxu0 %v3666_v51 }
 0x58d   :  { %1761 = vmatpush.bf16.msra.mxu3 %v3618_v1 }
 0x58e   :  { %1682 = vmatpush.bf16.msra.mxu1 %v3674_v33  ;;  %1774 = vmatpush.bf16.msra.mxu0 %v3674_v33 }
 0x591   :  { %1762 = vmatpush.bf16.msra.mxu3 %v3621_v62 }
 0x592   :  { %1683 = vmatpush.bf16.msra.mxu1 %v3679_v11  ;;  %1775 = vmatpush.bf16.msra.mxu0 %v3679_v11 }
 0x595   :  { %1763 = vmatpush.bf16.msra.mxu3 %v3627_v3 }
 0x596   :  { %1684 = vmatpush.bf16.msra.mxu1 %v3684_v15  ;;  %1776 = vmatpush.bf16.msra.mxu0 %v3684_v15 }
 0x598   :  { %1426 = vmatmul.bf16.gmra.mxu3 %v3591_v35  ;;  %1455 = vmatmul.bf16.gmra.mxu0 %v3591_v35  ;;  %v217_v35 = vadd.f32 %v3446_v0, %v3364_v25  ;;  %v2746_v25 = vld [vmem:[#allocation5 + $0x158] sm:$0xf]  ;;  %v2855_v0 = vld [vmem:[#allocation5 + $0x160] sm:$0xf0] }
 0x599   :  { %1861 = vmatpush.bf16.msrb.mxu3 %v3647_v45  ;;  %1685 = vmatmul.bf16.vlgmr.msra.gmra.mxu1 %v4093_v14  ;;  %v3714_v21 = vor.u32 %v2855_v0, %v2746_v25 }
 0x59d   :  { %1862 = vmatpush.bf16.msrb.mxu3 %v3651_v4 }
 0x5a1   :  { %1863 = vmatpush.bf16.msrb.mxu3 %v3656_v28 }
 0x5a5   :  { %1864 = vmatpush.bf16.msrb.mxu3 %v3661_v61 }
 0x5a8   :  { %1431 = vmatmul.bf16.gmra.mxu3 %v3596_v38  ;;  %1460 = vmatmul.bf16.gmra.mxu0 %v3596_v38  ;;  %v2758_v38 = vld [vmem:[#allocation5 + $0x170] sm:$0xf] }
 0x5a9   :  { %1865 = vmatpush.bf16.msrb.mxu3 %v3666_v51  ;;  %v3709_v29 = vor.u32 %v2858_v7, %v2758_v38 }
 0x5ab   :  { %1690 = vmatpush.bf16.msrb.mxu2 %v3709_v29  ;;  %1782 = vmatpush.bf16.msrb.mxu1 %v3709_v29 }
 0x5ac   :  { %1874 = vmatpush.bf16.msrb.mxu0 %v3709_v29 }
 0x5ad   :  { %1866 = vmatpush.bf16.msrb.mxu3 %v3674_v33 }
 0x5af   :  { %1691 = vmatpush.bf16.msrb.mxu2 %v3714_v21  ;;  %1783 = vmatpush.bf16.msrb.mxu1 %v3714_v21 }
 0x5b0   :  { %1875 = vmatpush.bf16.msrb.mxu0 %v3714_v21 }
 0x5b1   :  { %1867 = vmatpush.bf16.msrb.mxu3 %v3679_v11 }
 0x5b3   :  { %1692 = vmatpush.bf16.msrb.mxu2 %v3722_v63  ;;  %1784 = vmatpush.bf16.msrb.mxu1 %v3722_v63 }
 0x5b4   :  { %1876 = vmatpush.bf16.msrb.mxu0 %v3722_v63 }
 0x5b5   :  { %1868 = vmatpush.bf16.msrb.mxu3 %v3684_v15 }
 0x5b7   :  { %1693 = vmatpush.bf16.msrb.mxu2 %v3728_v49  ;;  %1785 = vmatpush.bf16.msrb.mxu1 %v3728_v49 }
 0x5b8   :  { %1877 = vmatpush.bf16.msrb.mxu0 %v3728_v49 }
 0x5bb   :  { %1694 = vmatpush.bf16.msrb.mxu2 %v3735_v17  ;;  %1786 = vmatpush.bf16.msrb.mxu1 %v3735_v17 }
 0x5bc   :  { %1878 = vmatpush.bf16.msrb.mxu0 %v3735_v17 }
 0x5bf   :  { %1695 = vmatpush.bf16.msrb.mxu2 %v3742_v54  ;;  %1787 = vmatpush.bf16.msrb.mxu1 %v3742_v54 }
 0x5c0   :  { %1879 = vmatpush.bf16.msrb.mxu0 %v3742_v54 }
 0x5f5   :  { %v1135_v9 = vpop.f32.mrf.mxu0 }
 0x5f6   :  { %v1172_v20 = vadd.f32 %v1135_v9, %v217_v35  ;;  %v3705_v16 = vpop.f32.mrf.mxu1  ;;  %v2686_v35 = vld [vmem:[#allocation5 + $0xe0] sm:$0xf]  ;;  %v2840_v9 = vld [vmem:[#allocation5 + $0xe8] sm:$0xf0] }
 0x5f7   :  { %v3749_v38 = vor.u32 %v2840_v9, %v2686_v35 }
 0x5f8   :  { %v2564_v19 = vmul.f32 -1.442695, %v1172_v20 }
 0x5f9   :  { %1696 = vmatpush.bf16.msrb.mxu2 %v3749_v38  ;;  %1788 = vmatpush.bf16.msrb.mxu1 %v3749_v38 }
 0x5fa   :  { %2940 = vpow2.f32 %v2564_v19  ;;  %1880 = vmatpush.bf16.msrb.mxu0 %v3749_v38 }
 0x5fb   :  { %v1122_v23 = vpop.f32.mrf.mxu3 }
 0x5fc   :  { %v1152_v26 = vadd.f32 %v1122_v23, %v188_v39  ;;  %v2837_v39 = vld [vmem:[#allocation5 + $0xd0] sm:$0xf0] }
 0x5fd   :  { %v1137_v41 = vpop.f32.mrf.mxu0 }
 0x5fe   :  { %v2563_v13 = vmul.f32 -1.442695, %v1152_v26  ;;  %v1150_v43 = vpop.f32.mrf.mxu1 }
 0x5ff   :  { %v1192_v43 = vadd.f32 %v3634_v52, %v3705_v16 }
 0x600   :  { %v2941_v46 = vpop.eup %2940  ;;  %2942 = vpow2.f32 %v2563_v13  ;;  %v3754_v13 = vor.u32 %v2837_v39, %v2674_v36 }
 0x601   :  { %v3716_v22 = vadd.f32 1.0, %v2941_v46 }
 0x602   :  { %1697 = vmatpush.bf16.msrb.mxu2 %v3754_v13  ;;  %1789 = vmatpush.bf16.msrb.mxu1 %v3754_v13 }
 0x603   :  { %v1124_v34 = vpop.f32.mrf.mxu3  ;;  %2944 = vrcp.f32 %v3716_v22  ;;  %v1188_v31 = vand.u32 2147483648, %v3716_v22  ;;  %vm1182_vm6 = vweird.f32 %v3716_v22  ;;  %1881 = vmatpush.bf16.msrb.mxu0 %v3754_v13 }
 0x604   :  { %v4095_v34 = vld [vmem:[#allocation13_spill] sm:$0xff] }
 0x605   :  { %v246_v53 = vadd.f32 %v4095_v34, %v3373_v40  ;;  %v1189_v40 = vor.u32 1.1754944e-38, %v1188_v31 }
 0x606   :  { %v2943_v27 = vpop.eup %2942  ;;  %v3724_v59 = vpop.f32.mrf.mxu1  ;;  %1848 = vmatpush.bf16.msra.mxu2 %v3599_v44  ;;  %1940 = vmatpush.bf16.msra.mxu1 %v3599_v44 }
 0x607   :  { %v1156_v32 = vadd.f32 1.0, %v2943_v27 }
 0x609   :  { %2946 = vrcp.f32 %v1156_v32  ;;  %v3731_v18 = vpop.eup %2944  ;;  %v1168_v5 = vand.u32 2147483648, %v1156_v32  ;;  %v1166_v19 = vand.u32 2147483647, %v1156_v32  ;;  %vm1162_vm2 = vweird.f32 %v1156_v32 }
 0x60a   :  { %v1178_v37 = vmul.f32 %v3731_v18, %v3716_v22  ;;  %vm1183_vm5 = vweird.f32 %v3731_v18  ;;  %1849 = vmatpush.bf16.msra.mxu2 %v3602_v47  ;;  %1941 = vmatpush.bf16.msra.mxu1 %v3602_v47 }
 0x60b   :  { %v1169_v41 = vor.u32 1.1754944e-38, %v1168_v5  ;;  %vm1167_vm4 = vcmp.eq.f32.partialorder %v1166_v19, 8.507059e+37  ;;  %vm1184_vm7 = vmor %vm1182_vm6, %vm1183_vm5  ;;  %v1422_v5 = vpop.f32.mrf.mxu3 }
 0x60c   :  { %v1179_v8 = vsub.f32 1.0, %v1178_v37 }
 0x60e   :  { %v1675_v42 = vpop.f32.mrf.mxu1  ;;  %v1180_v23 = vmul.f32 %v3731_v18, %v1179_v8  ;;  %1850 = vmatpush.bf16.msra.mxu2 %v3605_v50  ;;  %1942 = vmatpush.bf16.msra.mxu1 %v3605_v50 }
 0x60f   :  { %v2947_v58 = vpop.eup %2946 }
 0x610   :  { %v1158_v30 = vmul.f32 %v2947_v58, %v1156_v32  ;;  %vm1163_vm1 = vweird.f32 %v2947_v58  ;;  %v1181_v0 = vadd.f32 %v3731_v18, %v1180_v23  ;;  %v1186_v32 = vand.u32 2147483647, %v3716_v22 }
 0x611   :  { %vm1164_vm3 = vmor %vm1162_vm2, %vm1163_vm1 }
 0x612   :  { %v1159_v2 = vsub.f32 1.0, %v1158_v30  ;;  %v1185_v16 = vsel %vm1184_vm7, %v3731_v18, %v1181_v0  ;;  %vm1187_vm8 = vcmp.eq.f32.partialorder %v1186_v32, 8.507059e+37  ;;  %1851 = vmatpush.bf16.msra.mxu2 %v3608_v56  ;;  %1943 = vmatpush.bf16.msra.mxu1 %v3608_v56 }
 0x613   :  { %v1190_v6 = vsel %vm1187_vm8, %v1189_v40, %v1185_v16  ;;  %v3829_v40 = vld [vmem:[%s4080_s5 + $0x1] ss:$0 sm:$0xff] }
 0x614   :  { %v1160_v20 = vmul.f32 %v2947_v58, %v1159_v2  ;;  %v1196_v22 = vsub.f32 1.0, %v1190_v6  ;;  %v1198_v55 = vmul.f32 %v1190_v6, %v3643_v24 }
 0x616   :  { %v1161_v7 = vadd.f32 %v2947_v58, %v1160_v20  ;;  %v3751_v26 = vpop.f32.mrf.mxu1  ;;  %1852 = vmatpush.bf16.msra.mxu2 %v3613_v57  ;;  %1944 = vmatpush.bf16.msra.mxu1 %v3613_v57 }
 0x618   :  { %v1165_v25 = vsel %vm1164_vm3, %v2947_v58, %v1161_v7 }
 0x619   :  { %v1170_v46 = vsel %vm1167_vm4, %v1169_v41, %v1165_v25 }
 0x61a   :  { %v1193_v27 = vmul.f32 %v1192_v43, %v1170_v46  ;;  %1853 = vmatpush.bf16.msra.mxu2 %v3618_v1  ;;  %1945 = vmatpush.bf16.msra.mxu1 %v3618_v1 }
 0x61c   :  { %v1194_v52 = vadd.f32 %v1193_v27, %v246_v53 }
 0x61e   :  { %2948 = vtanh.f32 %v1194_v52  ;;  %v1688_v60 = vpop.f32.mrf.mxu1  ;;  %1854 = vmatpush.bf16.msra.mxu2 %v3621_v62  ;;  %1946 = vmatpush.bf16.msra.mxu1 %v3621_v62 }
 0x622   :  { %1855 = vmatpush.bf16.msra.mxu2 %v3627_v3  ;;  %1947 = vmatpush.bf16.msra.mxu1 %v3627_v3 }
 0x624   :  { %v2949_v12 = vpop.eup %2948 }
 0x625   :  { %v1197_v37 = vmul.f32 %v2949_v12, %v1196_v22 }
 0x627   :  { %v1199_v18 = vadd.f32 %v1198_v55, %v1197_v37  ;;  %v1451_v55 = vpop.f32.mrf.mxu0 }
 0x629   :  { %1202 = vst [vmem:[%s4082_s7] sm:$0xff] %v1199_v18  ;;  %v1214_v42 = vpack.c.bf16 %v1199_v18, %v3643_v24  ;;  %v1393_v24 = vpop.f32.mrf.mxu2 }
 0x62b   :  { %1407 = vmatmul.bf16.gmra.mxu2 %v1214_v42  ;;  %1436 = vmatmul.bf16.gmra.mxu3 %v1214_v42 }
 0x62c   :  { %1465 = vmatmul.bf16.gmra.mxu0 %v1214_v42 }
 0x631   :  { %v3801_v58 = vpop.f32.mrf.mxu2 }
 0x639   :  { %v3806_v10 = vpop.f32.mrf.mxu2 }
 0x63b   :  { %1698 = vmatmul.bf16.vlgmr.msrb.gmra.mxu2 %v4093_v14  ;;  %v2566_v14 = vld [vmem:[%s4079_s4 + $0x3] sm:$0x7] }
 0x63c   :  { %1953 = vmatpush.bf16.msrb.mxu2 %v3647_v45  ;;  %v3808_v48 = vperm.slane %v2566_v14, 0  ;;  %v3812_v2 = vperm.slane %v2566_v14, 1  ;;  %v3831_v22 = vperm.slane %v2566_v14, 2 }
 0x63e   :  { %v1394_v30 = vadd.f32 %v1393_v24, %v3808_v48  ;;  %v1423_v20 = vadd.f32 %v1422_v5, %v3812_v2 }
 0x640   :  { %1954 = vmatpush.bf16.msrb.mxu2 %v3651_v4  ;;  %v1703_v8 = vadd.f32 %v3724_v59, %v1394_v30  ;;  %v1723_v19 = vadd.f32 %v3751_v26, %v1423_v20 }
 0x641   :  { %v3814_v35 = vpop.f32.mrf.mxu2 }
 0x642   :  { %v2760_v9 = vmul.f32 -1.442695, %v1703_v8  ;;  %v2761_v36 = vmul.f32 -1.442695, %v1723_v19  ;;  %v1452_v8 = vadd.f32 %v1451_v55, %v3831_v22 }
 0x644   :  { %1955 = vmatpush.bf16.msrb.mxu2 %v3656_v28  ;;  %2950 = vpow2.f32 %v2760_v9 }
 0x645   :  { %2952 = vpow2.f32 %v2761_v36 }
 0x648   :  { %1956 = vmatpush.bf16.msrb.mxu2 %v3661_v61 }
 0x649   :  { %v3818_v39 = vpop.f32.mrf.mxu2 }
 0x64a   :  { %v2951_v23 = vpop.eup %2950 }
 0x64b   :  { %v1707_v7 = vadd.f32 1.0, %v2951_v23  ;;  %v2953_v41 = vpop.eup %2952 }
 0x64c   :  { %1957 = vmatpush.bf16.msrb.mxu2 %v3666_v51  ;;  %v1727_v43 = vadd.f32 1.0, %v2953_v41 }
 0x64d   :  { %2954 = vrcp.f32 %v1707_v7  ;;  %v1719_v16 = vand.u32 2147483648, %v1707_v7  ;;  %vm1713_vm10 = vweird.f32 %v1707_v7  ;;  %v1717_v60 = vand.u32 2147483647, %v1707_v7 }
 0x64e   :  { %2956 = vrcp.f32 %v1727_v43  ;;  %v1739_v5 = vand.u32 2147483648, %v1727_v43  ;;  %vm1733_vm14 = vweird.f32 %v1727_v43  ;;  %v1737_v20 = vand.u32 2147483647, %v1727_v43 }
 0x64f   :  { %v1720_v18 = vor.u32 1.1754944e-38, %v1719_v16  ;;  %vm1718_vm12 = vcmp.eq.f32.partialorder %v1717_v60, 8.507059e+37 }
 0x650   :  { %1958 = vmatpush.bf16.msrb.mxu2 %v3674_v33  ;;  %v1740_v36 = vor.u32 1.1754944e-38, %v1739_v5  ;;  %vm1738_vm0 = vcmp.eq.f32.partialorder %v1737_v20, 8.507059e+37 }
 0x651   :  { %v3820_v59 = vpop.f32.mrf.mxu2 }
 0x653   :  { %v2955_v25 = vpop.eup %2954 }
 0x654   :  { %1959 = vmatpush.bf16.msrb.mxu2 %v3679_v11  ;;  %v1709_v0 = vmul.f32 %v2955_v25, %v1707_v7  ;;  %v2957_v34 = vpop.eup %2956  ;;  %vm1714_vm9 = vweird.f32 %v2955_v25 }
 0x655   :  { %v1729_v26 = vmul.f32 %v2957_v34, %v1727_v43  ;;  %vm1715_vm11 = vmor %vm1713_vm10, %vm1714_vm9  ;;  %vm1734_vm13 = vweird.f32 %v2957_v34 }
 0x656   :  { %v1710_v53 = vsub.f32 1.0, %v1709_v0  ;;  %vm1735_vm15 = vmor %vm1733_vm14, %vm1734_vm13 }
 0x657   :  { %v1730_v32 = vsub.f32 1.0, %v1729_v26 }
 0x658   :  { %1960 = vmatpush.bf16.msrb.mxu2 %v3684_v15  ;;  %v1711_v31 = vmul.f32 %v2955_v25, %v1710_v53 }
 0x659   :  { %v1731_v6 = vmul.f32 %v2957_v34, %v1730_v32 }
 0x65a   :  { %v1712_v52 = vadd.f32 %v2955_v25, %v1711_v31  ;;  %v1424_v31 = vpop.f32.mrf.mxu3 }
 0x65b   :  { %v1732_v24 = vadd.f32 %v2957_v34, %v1731_v6 }
 0x65c   :  { %v1716_v12 = vsel %vm1715_vm11, %v2955_v25, %v1712_v52 }
 0x65d   :  { %v1721_v30 = vsel %vm1718_vm12, %v1720_v18, %v1716_v12  ;;  %v1736_v14 = vsel %vm1735_vm15, %v2957_v34, %v1732_v24  ;;  %v1453_v34 = vpop.f32.mrf.mxu0 }
 0x65e   :  { %v1741_v7 = vsel %vm1738_vm0, %v1740_v36, %v1736_v14  ;;  %v1396_v14 = vadd.f32 %v3801_v58, %v3808_v48 }
 0x65f   :  { %v1747_v41 = vsub.f32 1.0, %v1741_v7  ;;  %v1749_v53 = vmul.f32 0.0, %v1741_v7 }
 0x662   :  { %v3869_v52 = vpop.f32.mrf.mxu3 }
 0x665   :  { %v3867_v32 = vpop.f32.mrf.mxu0 }
 0x66a   :  { %v3873_v60 = vpop.f32.mrf.mxu3 }
 0x66d   :  { %v3871_v16 = vpop.f32.mrf.mxu0 }
 0x672   :  { %v3877_v12 = vpop.f32.mrf.mxu3 }
 0x675   :  { %v3875_v6 = vpop.f32.mrf.mxu0 }
 0x67d   :  { %v3879_v55 = vpop.f32.mrf.mxu0 }
 0x6a9   :  { %v3883_v18 = vpop.f32.mrf.mxu0 }
 0x6aa   :  { %4097 = vst [vmem:[#allocation10_spill] sm:$0xff] %v3883_v18 }
 0x6ae   :  { %v3822_v46 = vpop.f32.mrf.mxu2 }
 0x6b1   :  { %v3887_v24 = vpop.f32.mrf.mxu0 }
 0x6b2   :  { %4099 = vst [vmem:[#allocation12_spill] sm:$0xff] %v3887_v24 }
 0x6b6   :  { %v3824_v27 = vpop.f32.mrf.mxu2 }
 0x6b7   :  { %4096 = vst [vmem:[#allocation9_spill] sm:$0xff] %v3824_v27 }
 0x6be   :  { %v1699_v37 = vpop.f32.mrf.mxu2 }
 0x6bf   :  { %v1743_v42 = vadd.f32 %v3829_v40, %v1699_v37  ;;  %v3881_v37 = vpop.f32.mrf.mxu3 }
 0x6c1   :  { %v1744_v9 = vmul.f32 %v1743_v42, %v1721_v30 }
 0x6c3   :  { %v1745_v19 = vadd.f32 %v1744_v9, %v1452_v8  ;;  %v1425_v8 = vadd.f32 %v1424_v31, %v3812_v2 }
 0x6c5   :  { %2958 = vtanh.f32 %v1745_v19 }
 0x6c6   :  { %v1701_v23 = vpop.f32.mrf.mxu2 }
 0x6c7   :  { %v3885_v42 = vpop.f32.mrf.mxu3 }
 0x6c8   :  { %4098 = vst [vmem:[#allocation11_spill] sm:$0xff] %v3885_v42 }
 0x6cb   :  { %v2959_v25 = vpop.eup %2958 }
 0x6cc   :  { %v1748_v0 = vmul.f32 %v2959_v25, %v1747_v41 }
 0x6ce   :  { %v3835_v26 = vadd.f32 %v1749_v53, %v1748_v0 }
 0x6cf   :  { %v3889_v30 = vpop.f32.mrf.mxu3 }
 0x6d0   :  { %1751 = vst [vmem:[%s4081_s6] sm:$0xff] %v3835_v26  ;;  %v1755_v43 = vpack.c.bf16 %v3835_v26, %v3835_v26 }
 0x6d1   :  { %4100 = vst [vmem:[#allocation13_spill] sm:$0xff] %v3889_v30 }
 0x6d2   :  { %1764 = vmatmul.bf16.vlgmr.msra.gmra.mxu3 %v1755_v43  ;;  %1777 = vmatmul.bf16.vlgmr.msra.gmra.mxu0 %v1755_v43 }
 0x6d3   :  { %1790 = vmatmul.bf16.vlgmr.msrb.gmra.mxu1 %v1755_v43  ;;  %1966 = vmatpush.bf16.msra.mxu3 %v3709_v29 }
 0x6d4   :  { %2032 = vmatpush.bf16.msra.mxu0 %v3599_v44  ;;  %2045 = vmatpush.bf16.msrb.mxu1 %v3647_v45 }
 0x6d7   :  { %1967 = vmatpush.bf16.msra.mxu3 %v3714_v21 }
 0x6d8   :  { %2033 = vmatpush.bf16.msra.mxu0 %v3602_v47  ;;  %2046 = vmatpush.bf16.msrb.mxu1 %v3651_v4 }
 0x6db   :  { %1968 = vmatpush.bf16.msra.mxu3 %v3722_v63 }
 0x6dc   :  { %2034 = vmatpush.bf16.msra.mxu0 %v3605_v50  ;;  %2047 = vmatpush.bf16.msrb.mxu1 %v3656_v28 }
 0x6df   :  { %1969 = vmatpush.bf16.msra.mxu3 %v3728_v49 }
 0x6e0   :  { %2035 = vmatpush.bf16.msra.mxu0 %v3608_v56  ;;  %2048 = vmatpush.bf16.msrb.mxu1 %v3661_v61 }
 0x6e3   :  { %1970 = vmatpush.bf16.msra.mxu3 %v3735_v17 }
 0x6e4   :  { %2036 = vmatpush.bf16.msra.mxu0 %v3613_v57  ;;  %2049 = vmatpush.bf16.msrb.mxu1 %v3666_v51 }
 0x6e7   :  { %1971 = vmatpush.bf16.msra.mxu3 %v3742_v54 }
 0x6e8   :  { %2037 = vmatpush.bf16.msra.mxu0 %v3618_v1  ;;  %2050 = vmatpush.bf16.msrb.mxu1 %v3674_v33 }
 0x6eb   :  { %1972 = vmatpush.bf16.msra.mxu3 %v3749_v38 }
 0x6ec   :  { %2038 = vmatpush.bf16.msra.mxu0 %v3621_v62  ;;  %2051 = vmatpush.bf16.msrb.mxu1 %v3679_v11 }
 0x6ef   :  { %1973 = vmatpush.bf16.msra.mxu3 %v3754_v13 }
 0x6f0   :  { %2039 = vmatpush.bf16.msra.mxu0 %v3627_v3  ;;  %2052 = vmatpush.bf16.msrb.mxu1 %v3684_v15 }
 0x74f   :  { %v1778_v5 = vpop.f32.mrf.mxu0 }
 0x750   :  { %v1815_v9 = vadd.f32 %v1778_v5, %v1425_v8  ;;  %v1791_v20 = vpop.f32.mrf.mxu1 }
 0x752   :  { %v2763_v19 = vmul.f32 -1.442695, %v1815_v9 }
 0x754   :  { %2960 = vpow2.f32 %v2763_v19 }
 0x755   :  { %v1765_v36 = vpop.f32.mrf.mxu3 }
 0x756   :  { %v1795_v23 = vadd.f32 %v1765_v36, %v1396_v14 }
 0x757   :  { %v1780_v7 = vpop.f32.mrf.mxu0 }
 0x758   :  { %v2762_v41 = vmul.f32 -1.442695, %v1795_v23  ;;  %v1793_v25 = vpop.f32.mrf.mxu1 }
 0x75a   :  { %v2961_v0 = vpop.eup %2960  ;;  %2962 = vpow2.f32 %v2762_v41  ;;  %v1835_v41 = vadd.f32 %v3829_v40, %v1791_v20 }
 0x75b   :  { %v1819_v53 = vadd.f32 1.0, %v2961_v0 }
 0x75d   :  { %v1767_v43 = vpop.f32.mrf.mxu3  ;;  %2964 = vrcp.f32 %v1819_v53  ;;  %vm1825_vm6 = vweird.f32 %v1819_v53 }
 0x75e   :  { %v1454_v43 = vadd.f32 %v1453_v34, %v3831_v22 }
 0x760   :  { %v2963_v24 = vpop.eup %2962 }
 0x761   :  { %v1799_v31 = vadd.f32 1.0, %v2963_v24 }
 0x763   :  { %2966 = vrcp.f32 %v1799_v31  ;;  %v2965_v8 = vpop.eup %2964  ;;  %v1811_v19 = vand.u32 2147483648, %v1799_v31  ;;  %v1809_v14 = vand.u32 2147483647, %v1799_v31  ;;  %vm1805_vm2 = vweird.f32 %v1799_v31 }
 0x764   :  { %v1821_v5 = vmul.f32 %v2965_v8, %v1819_v53  ;;  %vm1826_vm5 = vweird.f32 %v2965_v8 }
 0x765   :  { %v1812_v7 = vor.u32 1.1754944e-38, %v1811_v19  ;;  %vm1810_vm4 = vcmp.eq.f32.partialorder %v1809_v14, 8.507059e+37  ;;  %vm1827_vm7 = vmor %vm1825_vm6, %vm1826_vm5 }
 0x766   :  { %v1822_v27 = vsub.f32 1.0, %v1821_v5  ;;  %v1831_v5 = vand.u32 2147483648, %v1819_v53 }
 0x768   :  { %v1823_v36 = vmul.f32 %v2965_v8, %v1822_v27 }
 0x769   :  { %v2967_v9 = vpop.eup %2966 }
 0x76a   :  { %v1801_v30 = vmul.f32 %v2967_v9, %v1799_v31  ;;  %vm1806_vm1 = vweird.f32 %v2967_v9  ;;  %v1824_v24 = vadd.f32 %v2965_v8, %v1823_v36 }
 0x76b   :  { %vm1807_vm3 = vmor %vm1805_vm2, %vm1806_vm1 }
 0x76c   :  { %v1802_v58 = vsub.f32 1.0, %v1801_v30  ;;  %v1828_v27 = vsel %vm1827_vm7, %v2965_v8, %v1824_v24 }
 0x76e   :  { %v1803_v18 = vmul.f32 %v2967_v9, %v1802_v58  ;;  %v1829_v58 = vand.u32 2147483647, %v1819_v53  ;;  %v1428_v53 = vadd.f32 %v3869_v52, %v3812_v2 }
 0x770   :  { %v1804_v23 = vadd.f32 %v2967_v9, %v1803_v18  ;;  %v1832_v18 = vor.u32 1.1754944e-38, %v1831_v5  ;;  %vm1830_vm8 = vcmp.eq.f32.partialorder %v1829_v58, 8.507059e+37 }
 0x772   :  { %v1808_v25 = vsel %vm1807_vm3, %v2967_v9, %v1804_v23  ;;  %v1833_v31 = vsel %vm1830_vm8, %v1832_v18, %v1828_v27 }
 0x773   :  { %v1813_v0 = vsel %vm1810_vm4, %v1812_v7, %v1808_v25  ;;  %v1839_v19 = vsub.f32 1.0, %v1833_v31  ;;  %v1841_v14 = vmul.f32 %v1833_v31, %v3835_v26 }
 0x774   :  { %v1836_v30 = vmul.f32 %v1835_v41, %v1813_v0 }
 0x776   :  { %v1837_v42 = vadd.f32 %v1836_v30, %v1454_v43 }
 0x778   :  { %2968 = vtanh.f32 %v1837_v42  ;;  %v1399_v42 = vadd.f32 %v3806_v10, %v3808_v48 }
 0x77e   :  { %v2969_v20 = vpop.eup %2968 }
 0x77f   :  { %v1840_v9 = vmul.f32 %v2969_v20, %v1839_v19 }
 0x781   :  { %v3897_v36 = vadd.f32 %v1841_v14, %v1840_v9 }
 0x783   :  { %2764 = vst [vmem:[%s4081_s6 + $0x8] sm:$0xff] %v3897_v36  ;;  %v1847_v34 = vpack.c.bf16 %v3897_v36, %v3897_v36 }
 0x785   :  { %1856 = vmatmul.bf16.vlgmr.msra.gmra.mxu2 %v1847_v34  ;;  %1869 = vmatmul.bf16.vlgmr.msrb.gmra.mxu3 %v1847_v34 }
 0x786   :  { %1882 = vmatmul.bf16.vlgmr.msrb.gmra.mxu0 %v1847_v34  ;;  %2058 = vmatpush.bf16.msra.mxu2 %v3709_v29 }
 0x787   :  { %2124 = vmatpush.bf16.msrb.mxu3 %v3599_v44  ;;  %2137 = vmatpush.bf16.msrb.mxu0 %v3647_v45 }
 0x78a   :  { %2059 = vmatpush.bf16.msra.mxu2 %v3714_v21 }
 0x78b   :  { %2125 = vmatpush.bf16.msrb.mxu3 %v3602_v47  ;;  %2138 = vmatpush.bf16.msrb.mxu0 %v3651_v4 }
 0x78e   :  { %2060 = vmatpush.bf16.msra.mxu2 %v3722_v63 }
 0x78f   :  { %2126 = vmatpush.bf16.msrb.mxu3 %v3605_v50  ;;  %2139 = vmatpush.bf16.msrb.mxu0 %v3656_v28 }
 0x792   :  { %2061 = vmatpush.bf16.msra.mxu2 %v3728_v49 }
 0x793   :  { %2127 = vmatpush.bf16.msrb.mxu3 %v3608_v56  ;;  %2140 = vmatpush.bf16.msrb.mxu0 %v3661_v61 }
 0x796   :  { %2062 = vmatpush.bf16.msra.mxu2 %v3735_v17 }
 0x797   :  { %2128 = vmatpush.bf16.msrb.mxu3 %v3613_v57  ;;  %2141 = vmatpush.bf16.msrb.mxu0 %v3666_v51 }
 0x79a   :  { %2063 = vmatpush.bf16.msra.mxu2 %v3742_v54 }
 0x79b   :  { %2129 = vmatpush.bf16.msrb.mxu3 %v3618_v1  ;;  %2142 = vmatpush.bf16.msrb.mxu0 %v3674_v33 }
 0x79e   :  { %2064 = vmatpush.bf16.msra.mxu2 %v3749_v38 }
 0x79f   :  { %2130 = vmatpush.bf16.msrb.mxu3 %v3621_v62  ;;  %2143 = vmatpush.bf16.msrb.mxu0 %v3679_v11 }
 0x7a2   :  { %2065 = vmatpush.bf16.msra.mxu2 %v3754_v13 }
 0x7a3   :  { %2131 = vmatpush.bf16.msrb.mxu3 %v3627_v3  ;;  %2144 = vmatpush.bf16.msrb.mxu0 %v3684_v15 }
 0x803   :  { %v1883_v26 = vpop.f32.mrf.mxu0 }
 0x808   :  { %v1857_v8 = vpop.f32.mrf.mxu2  ;;  %v1870_v23 = vpop.f32.mrf.mxu3 }
 0x809   :  { %v1887_v7 = vadd.f32 %v1857_v8, %v1399_v42  ;;  %v1907_v41 = vadd.f32 %v1870_v23, %v1428_v53 }
 0x80b   :  { %v2765_v25 = vmul.f32 -1.442695, %v1887_v7  ;;  %v2766_v24 = vmul.f32 -1.442695, %v1907_v41  ;;  %v1885_v0 = vpop.f32.mrf.mxu0  ;;  %v1927_v7 = vadd.f32 %v3829_v40, %v1883_v26 }
 0x80c   :  { %v1457_v0 = vadd.f32 %v3867_v32, %v3831_v22 }
 0x80d   :  { %2970 = vpow2.f32 %v2765_v25 }
 0x80e   :  { %2972 = vpow2.f32 %v2766_v24 }
 0x810   :  { %v1859_v43 = vpop.f32.mrf.mxu2  ;;  %v1872_v5 = vpop.f32.mrf.mxu3 }
 0x813   :  { %v2971_v30 = vpop.eup %2970 }
 0x814   :  { %v2973_v58 = vpop.eup %2972  ;;  %v1891_v27 = vadd.f32 1.0, %v2971_v30 }
 0x815   :  { %v1911_v18 = vadd.f32 1.0, %v2973_v58 }
 0x816   :  { %2974 = vrcp.f32 %v1891_v27  ;;  %v1903_v9 = vand.u32 2147483648, %v1891_v27  ;;  %v1901_v42 = vand.u32 2147483647, %v1891_v27  ;;  %vm1897_vm10 = vweird.f32 %v1891_v27 }
 0x817   :  { %2976 = vrcp.f32 %v1911_v18  ;;  %v1923_v5 = vand.u32 2147483648, %v1911_v18  ;;  %vm1917_vm14 = vweird.f32 %v1911_v18  ;;  %v1921_v30 = vand.u32 2147483647, %v1911_v18 }
 0x818   :  { %v1904_v23 = vor.u32 1.1754944e-38, %v1903_v9  ;;  %vm1902_vm12 = vcmp.eq.f32.partialorder %v1901_v42, 8.507059e+37  ;;  %v1430_v42 = vadd.f32 %v3873_v60, %v3812_v2 }
 0x819   :  { %vm1922_vm0 = vcmp.eq.f32.partialorder %v1921_v30, 8.507059e+37 }
 0x81c   :  { %v2975_v10 = vpop.eup %2974 }
 0x81d   :  { %v2977_v31 = vpop.eup %2976  ;;  %v1893_v52 = vmul.f32 %v2975_v10, %v1891_v27  ;;  %vm1898_vm9 = vweird.f32 %v2975_v10  ;;  %v1924_v27 = vor.u32 1.1754944e-38, %v1923_v5 }
 0x81e   :  { %v1913_v19 = vmul.f32 %v2977_v31, %v1911_v18  ;;  %vm1899_vm11 = vmor %vm1897_vm10, %vm1898_vm9  ;;  %vm1918_vm13 = vweird.f32 %v2977_v31 }
 0x81f   :  { %v1894_v20 = vsub.f32 1.0, %v1893_v52  ;;  %vm1919_vm15 = vmor %vm1917_vm14, %vm1918_vm13 }
 0x820   :  { %v1914_v14 = vsub.f32 1.0, %v1913_v19 }
 0x821   :  { %v1895_v34 = vmul.f32 %v2975_v10, %v1894_v20 }
 0x822   :  { %v1915_v53 = vmul.f32 %v2977_v31, %v1914_v14 }
 0x823   :  { %v1896_v8 = vadd.f32 %v2975_v10, %v1895_v34 }
 0x824   :  { %v1916_v24 = vadd.f32 %v2977_v31, %v1915_v53 }
 0x825   :  { %v1900_v41 = vsel %vm1899_vm11, %v2975_v10, %v1896_v8 }
 0x826   :  { %v1905_v25 = vsel %vm1902_vm12, %v1904_v23, %v1900_v41  ;;  %v1920_v52 = vsel %vm1919_vm15, %v2977_v31, %v1916_v24 }
 0x827   :  { %v1928_v43 = vmul.f32 %v1927_v7, %v1905_v25  ;;  %v1925_v19 = vsel %vm1922_vm0, %v1924_v27, %v1920_v52 }
 0x828   :  { %v1931_v26 = vsub.f32 1.0, %v1925_v19  ;;  %v1933_v9 = vmul.f32 %v1925_v19, %v3897_v36  ;;  %v1401_v36 = vadd.f32 %v3814_v35, %v3808_v48 }
 0x829   :  { %v1929_v58 = vadd.f32 %v1928_v43, %v1457_v0 }
 0x82b   :  { %2978 = vtanh.f32 %v1929_v58 }
 0x831   :  { %v2979_v10 = vpop.eup %2978 }
 0x832   :  { %v1932_v20 = vmul.f32 %v2979_v10, %v1931_v26 }
 0x834   :  { %v3937_v14 = vadd.f32 %v1933_v9, %v1932_v20 }
 0x836   :  { %2767 = vst [vmem:[%s4081_s6 + $0x10] sm:$0xff] %v3937_v14  ;;  %v1939_v32 = vpack.c.bf16 %v3937_v14, %v3937_v14 }
 0x838   :  { %1948 = vmatmul.bf16.vlgmr.msra.gmra.mxu1 %v1939_v32  ;;  %1961 = vmatmul.bf16.vlgmr.msrb.gmra.mxu2 %v1939_v32 }
 0x839   :  { %1974 = vmatmul.bf16.vlgmr.msra.gmra.mxu3 %v1939_v32  ;;  %2150 = vmatpush.bf16.msra.mxu1 %v3709_v29 }
 0x83a   :  { %2216 = vmatpush.bf16.msrb.mxu2 %v3599_v44  ;;  %2229 = vmatpush.bf16.msra.mxu3 %v3647_v45 }
 0x83d   :  { %2151 = vmatpush.bf16.msra.mxu1 %v3714_v21 }
 0x83e   :  { %2217 = vmatpush.bf16.msrb.mxu2 %v3602_v47  ;;  %2230 = vmatpush.bf16.msra.mxu3 %v3651_v4 }
 0x841   :  { %2152 = vmatpush.bf16.msra.mxu1 %v3722_v63 }
 0x842   :  { %2218 = vmatpush.bf16.msrb.mxu2 %v3605_v50  ;;  %2231 = vmatpush.bf16.msra.mxu3 %v3656_v28 }
 0x845   :  { %2153 = vmatpush.bf16.msra.mxu1 %v3728_v49 }
 0x846   :  { %2219 = vmatpush.bf16.msrb.mxu2 %v3608_v56  ;;  %2232 = vmatpush.bf16.msra.mxu3 %v3661_v61 }
 0x849   :  { %2154 = vmatpush.bf16.msra.mxu1 %v3735_v17 }
 0x84a   :  { %2220 = vmatpush.bf16.msrb.mxu2 %v3613_v57  ;;  %2233 = vmatpush.bf16.msra.mxu3 %v3666_v51 }
 0x84d   :  { %2155 = vmatpush.bf16.msra.mxu1 %v3742_v54 }
 0x84e   :  { %2221 = vmatpush.bf16.msrb.mxu2 %v3618_v1  ;;  %2234 = vmatpush.bf16.msra.mxu3 %v3674_v33 }
 0x851   :  { %2156 = vmatpush.bf16.msra.mxu1 %v3749_v38 }
 0x852   :  { %2222 = vmatpush.bf16.msrb.mxu2 %v3621_v62  ;;  %2235 = vmatpush.bf16.msra.mxu3 %v3679_v11 }
 0x855   :  { %2157 = vmatpush.bf16.msra.mxu1 %v3754_v13 }
 0x856   :  { %2223 = vmatpush.bf16.msrb.mxu2 %v3627_v3  ;;  %2236 = vmatpush.bf16.msra.mxu3 %v3684_v15 }
 0x8b5   :  { %v1949_v18 = vpop.f32.mrf.mxu1 }
 0x8b6   :  { %v1979_v31 = vadd.f32 %v1949_v18, %v1401_v36 }
 0x8b8   :  { %v2768_v34 = vmul.f32 -1.442695, %v1979_v31  ;;  %v1459_v31 = vadd.f32 %v3871_v16, %v3831_v22 }
 0x8ba   :  { %2980 = vpow2.f32 %v2768_v34 }
 0x8bb   :  { %v1962_v53 = vpop.f32.mrf.mxu2 }
 0x8bc   :  { %v1999_v8 = vadd.f32 %v1962_v53, %v1430_v42  ;;  %v1975_v23 = vpop.f32.mrf.mxu3 }
 0x8bd   :  { %v1951_v7 = vpop.f32.mrf.mxu1  ;;  %v2019_v18 = vadd.f32 %v3829_v40, %v1975_v23 }
 0x8be   :  { %v2769_v41 = vmul.f32 -1.442695, %v1999_v8 }
 0x8c0   :  { %v2981_v25 = vpop.eup %2980  ;;  %2982 = vpow2.f32 %v2769_v41 }
 0x8c1   :  { %v1983_v24 = vadd.f32 1.0, %v2981_v25 }
 0x8c3   :  { %2984 = vrcp.f32 %v1983_v24  ;;  %v1964_v0 = vpop.f32.mrf.mxu2  ;;  %v1995_v27 = vand.u32 2147483648, %v1983_v24  ;;  %v1993_v19 = vand.u32 2147483647, %v1983_v24  ;;  %vm1989_vm2 = vweird.f32 %v1983_v24 }
 0x8c4   :  { %v1977_v43 = vpop.f32.mrf.mxu3 }
 0x8c5   :  { %v1996_v9 = vor.u32 1.1754944e-38, %v1995_v27  ;;  %vm1994_vm4 = vcmp.eq.f32.partialorder %v1993_v19, 8.507059e+37 }
 0x8c6   :  { %v2983_v5 = vpop.eup %2982 }
 0x8c7   :  { %v2003_v35 = vadd.f32 1.0, %v2983_v5 }
 0x8c9   :  { %v2985_v30 = vpop.eup %2984  ;;  %2986 = vrcp.f32 %v2003_v35  ;;  %v2015_v53 = vand.u32 2147483648, %v2003_v35  ;;  %v2013_v7 = vand.u32 2147483647, %v2003_v35  ;;  %vm2009_vm6 = vweird.f32 %v2003_v35 }
 0x8ca   :  { %v1985_v58 = vmul.f32 %v2985_v30, %v1983_v24  ;;  %vm1990_vm1 = vweird.f32 %v2985_v30 }
 0x8cb   :  { %vm1991_vm3 = vmor %vm1989_vm2, %vm1990_vm1  ;;  %v2016_v24 = vor.u32 1.1754944e-38, %v2015_v53  ;;  %vm2014_vm8 = vcmp.eq.f32.partialorder %v2013_v7, 8.507059e+37 }
 0x8cc   :  { %v1986_v52 = vsub.f32 1.0, %v1985_v58 }
 0x8ce   :  { %v1987_v60 = vmul.f32 %v2985_v30, %v1986_v52 }
 0x8cf   :  { %v2987_v26 = vpop.eup %2986 }
 0x8d0   :  { %v2005_v10 = vmul.f32 %v2987_v26, %v2003_v35  ;;  %v1988_v20 = vadd.f32 %v2985_v30, %v1987_v60  ;;  %vm2010_vm5 = vweird.f32 %v2987_v26 }
 0x8d1   :  { %vm2011_vm7 = vmor %vm2009_vm6, %vm2010_vm5 }
 0x8d2   :  { %v2006_v32 = vsub.f32 1.0, %v2005_v10  ;;  %v1992_v36 = vsel %vm1991_vm3, %v2985_v30, %v1988_v20 }
 0x8d3   :  { %v1997_v34 = vsel %vm1994_vm4, %v1996_v9, %v1992_v36 }
 0x8d4   :  { %v2007_v42 = vmul.f32 %v2987_v26, %v2006_v32  ;;  %v2020_v8 = vmul.f32 %v2019_v18, %v1997_v34 }
 0x8d6   :  { %v2008_v41 = vadd.f32 %v2987_v26, %v2007_v42  ;;  %v2021_v25 = vadd.f32 %v2020_v8, %v1459_v31  ;;  %v1462_v42 = vadd.f32 %v3875_v6, %v3831_v22 }
 0x8d8   :  { %v2012_v0 = vsel %vm2011_vm7, %v2987_v26, %v2008_v41  ;;  %2988 = vtanh.f32 %v2021_v25 }
 0x8d9   :  { %v2017_v43 = vsel %vm2014_vm8, %v2016_v24, %v2012_v0 }
 0x8da   :  { %v2023_v5 = vsub.f32 1.0, %v2017_v43  ;;  %v2025_v16 = vmul.f32 %v2017_v43, %v3937_v14 }
 0x8de   :  { %v2989_v23 = vpop.eup %2988 }
 0x8df   :  { %v2024_v30 = vmul.f32 %v2989_v23, %v2023_v5 }
 0x8e1   :  { %v3977_v58 = vadd.f32 %v2025_v16, %v2024_v30 }
 0x8e3   :  { %2770 = vst [vmem:[%s4081_s6 + $0x18] sm:$0xff] %v3977_v58  ;;  %v2031_v35 = vpack.c.bf16 %v3977_v58, %v3977_v58 }
 0x8e5   :  { %2040 = vmatmul.bf16.vlgmr.msra.gmra.mxu0 %v2031_v35  ;;  %2053 = vmatmul.bf16.vlgmr.msrb.gmra.mxu1 %v2031_v35 }
 0x8e6   :  { %2066 = vmatmul.bf16.vlgmr.msra.gmra.mxu2 %v2031_v35  ;;  %2242 = vmatpush.bf16.msra.mxu0 %v3709_v29 }
 0x8e7   :  { %2308 = vmatpush.bf16.msrb.mxu1 %v3599_v44  ;;  %2321 = vmatpush.bf16.msra.mxu2 %v3647_v45  ;;  %v1404_v44 = vadd.f32 %v3818_v39, %v3808_v48 }
 0x8ea   :  { %2243 = vmatpush.bf16.msra.mxu0 %v3714_v21 }
 0x8eb   :  { %2309 = vmatpush.bf16.msrb.mxu1 %v3602_v47  ;;  %2322 = vmatpush.bf16.msra.mxu2 %v3651_v4  ;;  %v1433_v47 = vadd.f32 %v3877_v12, %v3812_v2 }
 0x8ee   :  { %2244 = vmatpush.bf16.msra.mxu0 %v3722_v63 }
 0x8ef   :  { %2310 = vmatpush.bf16.msrb.mxu1 %v3605_v50  ;;  %2323 = vmatpush.bf16.msra.mxu2 %v3656_v28 }
 0x8f2   :  { %2245 = vmatpush.bf16.msra.mxu0 %v3728_v49 }
 0x8f3   :  { %2311 = vmatpush.bf16.msrb.mxu1 %v3608_v56  ;;  %2324 = vmatpush.bf16.msra.mxu2 %v3661_v61 }
 0x8f6   :  { %2246 = vmatpush.bf16.msra.mxu0 %v3735_v17 }
 0x8f7   :  { %2312 = vmatpush.bf16.msrb.mxu1 %v3613_v57  ;;  %2325 = vmatpush.bf16.msra.mxu2 %v3666_v51 }
 0x8fa   :  { %2247 = vmatpush.bf16.msra.mxu0 %v3742_v54 }
 0x8fb   :  { %2313 = vmatpush.bf16.msrb.mxu1 %v3618_v1  ;;  %2326 = vmatpush.bf16.msra.mxu2 %v3674_v33 }
 0x8fe   :  { %2248 = vmatpush.bf16.msra.mxu0 %v3749_v38 }
 0x8ff   :  { %2314 = vmatpush.bf16.msrb.mxu1 %v3621_v62  ;;  %2327 = vmatpush.bf16.msra.mxu2 %v3679_v11 }
 0x902   :  { %2249 = vmatpush.bf16.msra.mxu0 %v3754_v13 }
 0x903   :  { %2315 = vmatpush.bf16.msrb.mxu1 %v3627_v3  ;;  %2328 = vmatpush.bf16.msra.mxu2 %v3684_v15 }
 0x962   :  { %v2041_v50 = vpop.f32.mrf.mxu0  ;;  %v2054_v56 = vpop.f32.mrf.mxu1 }
 0x963   :  { %v2071_v57 = vadd.f32 %v2041_v50, %v1404_v44  ;;  %v2091_v1 = vadd.f32 %v2054_v56, %v1433_v47 }
 0x965   :  { %v2771_v45 = vmul.f32 -1.442695, %v2071_v57  ;;  %v2772_v62 = vmul.f32 -1.442695, %v2091_v1 }
 0x967   :  { %2990 = vpow2.f32 %v2771_v45 }
 0x968   :  { %2992 = vpow2.f32 %v2772_v62 }
 0x969   :  { %v2067_v4 = vpop.f32.mrf.mxu2 }
 0x96a   :  { %v2043_v28 = vpop.f32.mrf.mxu0  ;;  %v2056_v61 = vpop.f32.mrf.mxu1  ;;  %v2111_v18 = vadd.f32 %v3829_v40, %v2067_v4 }
 0x96d   :  { %v2991_v3 = vpop.eup %2990 }
 0x96e   :  { %v2993_v51 = vpop.eup %2992  ;;  %v2075_v33 = vadd.f32 1.0, %v2991_v3 }
 0x96f   :  { %v2095_v11 = vadd.f32 1.0, %v2993_v51 }
 0x970   :  { %2994 = vrcp.f32 %v2075_v33  ;;  %v2087_v19 = vand.u32 2147483648, %v2075_v33  ;;  %v2085_v10 = vand.u32 2147483647, %v2075_v33  ;;  %vm2081_vm10 = vweird.f32 %v2075_v33 }
 0x971   :  { %2996 = vrcp.f32 %v2095_v11  ;;  %v2069_v15 = vpop.f32.mrf.mxu2  ;;  %v2107_v53 = vand.u32 2147483648, %v2095_v11  ;;  %vm2101_vm14 = vweird.f32 %v2095_v11  ;;  %v2105_v7 = vand.u32 2147483647, %v2095_v11 }
 0x972   :  { %v2088_v32 = vor.u32 1.1754944e-38, %v2087_v19  ;;  %vm2086_vm12 = vcmp.eq.f32.partialorder %v2085_v10, 8.507059e+37 }
 0x973   :  { %v2108_v24 = vor.u32 1.1754944e-38, %v2107_v53  ;;  %vm2106_vm0 = vcmp.eq.f32.partialorder %v2105_v7, 8.507059e+37  ;;  %v4101_v7 = vld [vmem:[#allocation11_spill] sm:$0xff] }
 0x976   :  { %v2995_v39 = vpop.eup %2994 }
 0x977   :  { %v2997_v12 = vpop.eup %2996  ;;  %v2077_v14 = vmul.f32 %v2995_v39, %v2075_v33  ;;  %vm2082_vm9 = vweird.f32 %v2995_v39 }
 0x978   :  { %v2097_v52 = vmul.f32 %v2997_v12, %v2095_v11  ;;  %vm2083_vm11 = vmor %vm2081_vm10, %vm2082_vm9  ;;  %vm2102_vm13 = vweird.f32 %v2997_v12 }
 0x979   :  { %v2078_v27 = vsub.f32 1.0, %v2077_v14  ;;  %vm2103_vm15 = vmor %vm2101_vm14, %vm2102_vm13 }
 0x97a   :  { %v2098_v60 = vsub.f32 1.0, %v2097_v52 }
 0x97b   :  { %v2079_v26 = vmul.f32 %v2995_v39, %v2078_v27  ;;  %v1464_v27 = vadd.f32 %v3879_v55, %v3831_v22 }
 0x97c   :  { %v2099_v20 = vmul.f32 %v2997_v12, %v2098_v60 }
 0x97d   :  { %v2080_v9 = vadd.f32 %v2995_v39, %v2079_v26 }
 0x97e   :  { %v2100_v31 = vadd.f32 %v2997_v12, %v2099_v20 }
 0x97f   :  { %v2084_v36 = vsel %vm2083_vm11, %v2995_v39, %v2080_v9 }
 0x980   :  { %v2089_v34 = vsel %vm2086_vm12, %v2088_v32, %v2084_v36  ;;  %v2104_v25 = vsel %vm2103_vm15, %v2997_v12, %v2100_v31 }
 0x981   :  { %v2112_v8 = vmul.f32 %v2111_v18, %v2089_v34  ;;  %v2109_v0 = vsel %vm2106_vm0, %v2108_v24, %v2104_v25 }
 0x982   :  { %v2115_v43 = vsub.f32 1.0, %v2109_v0  ;;  %v2117_v30 = vmul.f32 %v2109_v0, %v3977_v58  ;;  %v1435_v58 = vadd.f32 %v3881_v37, %v3812_v2 }
 0x983   :  { %v2113_v41 = vadd.f32 %v2112_v8, %v1462_v42  ;;  %v1409_v8 = vadd.f32 %v3822_v46, %v3808_v48 }
 0x985   :  { %2998 = vtanh.f32 %v2113_v41  ;;  %v1438_v41 = vadd.f32 %v4101_v7, %v3812_v2 }
 0x98b   :  { %v2999_v5 = vpop.eup %2998 }
 0x98c   :  { %v2116_v23 = vmul.f32 %v2999_v5, %v2115_v43 }
 0x98e   :  { %v4017_v16 = vadd.f32 %v2117_v30, %v2116_v23 }
 0x990   :  { %2773 = vst [vmem:[%s4081_s6 + $0x20] sm:$0xff] %v4017_v16  ;;  %v2123_v6 = vpack.c.bf16 %v4017_v16, %v4017_v16 }
 0x992   :  { %2132 = vmatmul.bf16.vlgmr.msrb.gmra.mxu3 %v2123_v6  ;;  %2145 = vmatmul.bf16.vlgmr.msrb.gmra.mxu0 %v2123_v6 }
 0x993   :  { %2158 = vmatmul.bf16.vlgmr.msra.gmra.mxu1 %v2123_v6  ;;  %2334 = vmatpush.bf16.msrb.mxu3 %v3709_v29 }
 0x997   :  { %2335 = vmatpush.bf16.msrb.mxu3 %v3714_v21  ;;  %v1406_v21 = vadd.f32 %v3820_v59, %v3808_v48 }
 0x99b   :  { %2336 = vmatpush.bf16.msrb.mxu3 %v3722_v63 }
 0x99f   :  { %2337 = vmatpush.bf16.msrb.mxu3 %v3728_v49 }
 0x9a3   :  { %2338 = vmatpush.bf16.msrb.mxu3 %v3735_v17 }
 0x9a7   :  { %2339 = vmatpush.bf16.msrb.mxu3 %v3742_v54 }
 0x9ab   :  { %2340 = vmatpush.bf16.msrb.mxu3 %v3749_v38 }
 0x9af   :  { %2341 = vmatpush.bf16.msrb.mxu3 %v3754_v13 }
 0xa0f   :  { %v2146_v35 = vpop.f32.mrf.mxu0 }
 0xa10   :  { %v2183_v44 = vadd.f32 %v2146_v35, %v1435_v58  ;;  %v2159_v29 = vpop.f32.mrf.mxu1 }
 0xa11   :  { %v2203_v39 = vadd.f32 %v3829_v40, %v2159_v29 }
 0xa12   :  { %v2775_v47 = vmul.f32 -1.442695, %v2183_v44 }
 0xa14   :  { %3000 = vpow2.f32 %v2775_v47 }
 0xa15   :  { %v2133_v63 = vpop.f32.mrf.mxu3 }
 0xa16   :  { %v2163_v49 = vadd.f32 %v2133_v63, %v1406_v21 }
 0xa17   :  { %v2148_v17 = vpop.f32.mrf.mxu0 }
 0xa18   :  { %v2774_v50 = vmul.f32 -1.442695, %v2163_v49  ;;  %v2161_v54 = vpop.f32.mrf.mxu1 }
 0xa1a   :  { %v3001_v56 = vpop.eup %3000  ;;  %3002 = vpow2.f32 %v2774_v50 }
 0xa1b   :  { %v2187_v38 = vadd.f32 1.0, %v3001_v56 }
 0xa1d   :  { %v2135_v13 = vpop.f32.mrf.mxu3  ;;  %3004 = vrcp.f32 %v2187_v38  ;;  %v2199_v60 = vand.u32 2147483648, %v2187_v38  ;;  %vm2193_vm6 = vweird.f32 %v2187_v38  ;;  %v2197_v26 = vand.u32 2147483647, %v2187_v38 }
 0xa1f   :  { %v2200_v9 = vor.u32 1.1754944e-38, %v2199_v60  ;;  %vm2198_vm8 = vcmp.eq.f32.partialorder %v2197_v26, 8.507059e+37  ;;  %v4103_v60 = vld [vmem:[#allocation9_spill] sm:$0xff] }
 0xa20   :  { %v3003_v57 = vpop.eup %3002 }
 0xa21   :  { %v2167_v37 = vadd.f32 1.0, %v3003_v57 }
 0xa23   :  { %3006 = vrcp.f32 %v2167_v37  ;;  %v3005_v1 = vpop.eup %3004  ;;  %v2179_v61 = vand.u32 2147483648, %v2167_v37  ;;  %v2177_v51 = vand.u32 2147483647, %v2167_v37  ;;  %vm2173_vm2 = vweird.f32 %v2167_v37 }
 0xa24   :  { %v2189_v45 = vmul.f32 %v3005_v1, %v2187_v38  ;;  %vm2194_vm5 = vweird.f32 %v3005_v1 }
 0xa25   :  { %v2180_v15 = vor.u32 1.1754944e-38, %v2179_v61  ;;  %vm2178_vm4 = vcmp.eq.f32.partialorder %v2177_v51, 8.507059e+37  ;;  %vm2195_vm7 = vmor %vm2193_vm6, %vm2194_vm5 }
 0xa26   :  { %v2190_v28 = vsub.f32 1.0, %v2189_v45 }
 0xa28   :  { %v2191_v33 = vmul.f32 %v3005_v1, %v2190_v28 }
 0xa29   :  { %v3007_v62 = vpop.eup %3006 }
 0xa2a   :  { %v2169_v4 = vmul.f32 %v3007_v62, %v2167_v37  ;;  %vm2174_vm1 = vweird.f32 %v3007_v62  ;;  %v2192_v14 = vadd.f32 %v3005_v1, %v2191_v33 }
 0xa2b   :  { %vm2175_vm3 = vmor %vm2173_vm2, %vm2174_vm1 }
 0xa2c   :  { %v2170_v59 = vsub.f32 1.0, %v2169_v4  ;;  %v2196_v20 = vsel %vm2195_vm7, %v3005_v1, %v2192_v14  ;;  %v4102_v4 = vld [vmem:[#allocation10_spill] sm:$0xff] }
 0xa2d   :  { %v2201_v32 = vsel %vm2198_vm8, %v2200_v9, %v2196_v20  ;;  %v1467_v28 = vadd.f32 %v4102_v4, %v3831_v22  ;;  %v4104_v9 = vld [vmem:[#allocation13_spill] sm:$0xff] }
 0xa2e   :  { %v2171_v3 = vmul.f32 %v3007_v62, %v2170_v59  ;;  %v2207_v36 = vsub.f32 1.0, %v2201_v32  ;;  %v2209_v34 = vmul.f32 %v2201_v32, %v4017_v16  ;;  %v1440_v32 = vadd.f32 %v4104_v9, %v3812_v2 }
 0xa30   :  { %v2172_v11 = vadd.f32 %v3007_v62, %v2171_v3 }
 0xa32   :  { %v2176_v12 = vsel %vm2175_vm3, %v3007_v62, %v2172_v11 }
 0xa33   :  { %v2181_v52 = vsel %vm2178_vm4, %v2180_v15, %v2176_v12 }
 0xa34   :  { %v2204_v19 = vmul.f32 %v2203_v39, %v2181_v52 }
 0xa36   :  { %v2205_v10 = vadd.f32 %v2204_v19, %v1464_v27  ;;  %v1411_v19 = vadd.f32 %v4103_v60, %v3808_v48 }
 0xa38   :  { %3008 = vtanh.f32 %v2205_v10 }
 0xa3e   :  { %v3009_v18 = vpop.eup %3008 }
 0xa3f   :  { %v2208_v31 = vmul.f32 %v3009_v18, %v2207_v36 }
 0xa41   :  { %v2210_v42 = vadd.f32 %v2209_v34, %v2208_v31 }
 0xa43   :  { %2776 = vst [vmem:[%s4081_s6 + $0x28] sm:$0xff] %v2210_v42  ;;  %v2215_v55 = vpack.c.bf16 %v2210_v42, %v2210_v42 }
 0xa45   :  { %2224 = vmatmul.bf16.vlgmr.msrb.gmra.mxu2 %v2215_v55  ;;  %2237 = vmatmul.bf16.vlgmr.msra.gmra.mxu3 %v2215_v55 }
 0xa46   :  { %2250 = vmatmul.bf16.vlgmr.msra.gmra.mxu0 %v2215_v55 }
 0xac3   :  { %v2251_v53 = vpop.f32.mrf.mxu0 }
 0xac4   :  { %v2295_v37 = vadd.f32 %v3829_v40, %v2251_v53 }
 0xac8   :  { %v2225_v25 = vpop.f32.mrf.mxu2  ;;  %v2238_v24 = vpop.f32.mrf.mxu3 }
 0xac9   :  { %v2255_v0 = vadd.f32 %v2225_v25, %v1409_v8  ;;  %v2275_v43 = vadd.f32 %v2238_v24, %v1438_v41 }
 0xacb   :  { %v2777_v5 = vmul.f32 -1.442695, %v2255_v0  ;;  %v2778_v23 = vmul.f32 -1.442695, %v2275_v43  ;;  %v2253_v30 = vpop.f32.mrf.mxu0 }
 0xacd   :  { %3010 = vpow2.f32 %v2777_v5 }
 0xace   :  { %3012 = vpow2.f32 %v2778_v23 }
 0xad0   :  { %v2227_v16 = vpop.f32.mrf.mxu2  ;;  %v2240_v6 = vpop.f32.mrf.mxu3 }
 0xad3   :  { %v3011_v58 = vpop.eup %3010 }
 0xad4   :  { %v3013_v35 = vpop.eup %3012  ;;  %v2259_v44 = vadd.f32 1.0, %v3011_v58 }
 0xad5   :  { %v2279_v29 = vadd.f32 1.0, %v3013_v35 }
 0xad6   :  { %3014 = vrcp.f32 %v2259_v44  ;;  %v2271_v17 = vand.u32 2147483648, %v2259_v44  ;;  %v2269_v56 = vand.u32 2147483647, %v2259_v44  ;;  %vm2265_vm10 = vweird.f32 %v2259_v44 }
 0xad7   :  { %3016 = vrcp.f32 %v2279_v29  ;;  %v2291_v61 = vand.u32 2147483648, %v2279_v29  ;;  %vm2285_vm14 = vweird.f32 %v2279_v29  ;;  %v2289_v3 = vand.u32 2147483647, %v2279_v29 }
 0xad8   :  { %v2272_v57 = vor.u32 1.1754944e-38, %v2271_v17  ;;  %vm2270_vm12 = vcmp.eq.f32.partialorder %v2269_v56, 8.507059e+37 }
 0xad9   :  { %v2292_v11 = vor.u32 1.1754944e-38, %v2291_v61  ;;  %vm2290_vm0 = vcmp.eq.f32.partialorder %v2289_v3, 8.507059e+37 }
 0xadc   :  { %v3015_v46 = vpop.eup %3014 }
 0xadd   :  { %v3017_v47 = vpop.eup %3016  ;;  %v2261_v21 = vmul.f32 %v3015_v46, %v2259_v44  ;;  %vm2266_vm9 = vweird.f32 %v3015_v46  ;;  %v3031_v44 = vld [vmem:[%s4080_s5 + $0x1] ss:$0 sm:$0xff] }
 0xade   :  { %v2281_v63 = vmul.f32 %v3017_v47, %v2279_v29  ;;  %vm2267_vm11 = vmor %vm2265_vm10, %vm2266_vm9  ;;  %vm2286_vm13 = vweird.f32 %v3017_v47 }
 0xadf   :  { %v2262_v49 = vsub.f32 1.0, %v2261_v21  ;;  %vm2287_vm15 = vmor %vm2285_vm14, %vm2286_vm13 }
 0xae0   :  { %v2282_v50 = vsub.f32 1.0, %v2281_v63 }
 0xae1   :  { %v2263_v54 = vmul.f32 %v3015_v46, %v2262_v49 }
 0xae2   :  { %v2283_v38 = vmul.f32 %v3017_v47, %v2282_v50 }
 0xae3   :  { %v2264_v13 = vadd.f32 %v3015_v46, %v2263_v54 }
 0xae4   :  { %v2284_v62 = vadd.f32 %v3017_v47, %v2283_v38 }
 0xae5   :  { %v2268_v1 = vsel %vm2267_vm11, %v3015_v46, %v2264_v13  ;;  %v4105_v46 = vld [vmem:[#allocation12_spill] sm:$0xff] }
 0xae6   :  { %v2273_v45 = vsel %vm2270_vm12, %v2272_v57, %v2268_v1  ;;  %v2288_v33 = vsel %vm2287_vm15, %v3017_v47, %v2284_v62  ;;  %v1469_v47 = vadd.f32 %v4105_v46, %v3831_v22 }
 0xae7   :  { %v2296_v59 = vmul.f32 %v2295_v37, %v2273_v45  ;;  %v2293_v15 = vsel %vm2290_vm0, %v2292_v11, %v2288_v33 }
 0xae8   :  { %v2299_v40 = vsub.f32 1.0, %v2293_v15  ;;  %v2301_v14 = vmul.f32 %v2293_v15, %v2210_v42 }
 0xae9   :  { %v2297_v51 = vadd.f32 %v2296_v59, %v1467_v28 }
 0xaeb   :  { %3018 = vtanh.f32 %v2297_v51 }
 0xaf1   :  { %v3019_v39 = vpop.eup %3018 }
 0xaf2   :  { %v2300_v12 = vmul.f32 %v3019_v39, %v2299_v40 }
 0xaf4   :  { %v4051_v52 = vadd.f32 %v2301_v14, %v2300_v12 }
 0xaf6   :  { %2779 = vst [vmem:[%s4081_s6 + $0x30] sm:$0xff] %v4051_v52  ;;  %v2307_v27 = vpack.c.bf16 %v4051_v52, %v4051_v52 }
 0xaf8   :  { %2316 = vmatmul.bf16.vlgmr.msrb.gmra.mxu1 %v2307_v27  ;;  %2329 = vmatmul.bf16.vlgmr.msra.gmra.mxu2 %v2307_v27 }
 0xaf9   :  { %2342 = vmatmul.bf16.vlgmr.msrb.gmra.mxu3 %v2307_v27 }
 0xb75   :  { %v2317_v26 = vpop.f32.mrf.mxu1 }
 0xb76   :  { %v2347_v10 = vadd.f32 %v2317_v26, %v1411_v19 }
 0xb78   :  { %v2780_v20 = vmul.f32 -1.442695, %v2347_v10 }
 0xb7a   :  { %3020 = vpow2.f32 %v2780_v20 }
 0xb7b   :  { %v2330_v36 = vpop.f32.mrf.mxu2 }
 0xb7c   :  { %v2367_v18 = vadd.f32 %v2330_v36, %v1440_v32  ;;  %v2343_v31 = vpop.f32.mrf.mxu3 }
 0xb7d   :  { %v2319_v34 = vpop.f32.mrf.mxu1  ;;  %v2387_v29 = vadd.f32 %v3031_v44, %v2343_v31 }
 0xb7e   :  { %v2781_v42 = vmul.f32 -1.442695, %v2367_v18 }
 0xb80   :  { %v3021_v55 = vpop.eup %3020  ;;  %3022 = vpow2.f32 %v2781_v42 }
 0xb81   :  { %v2351_v53 = vadd.f32 1.0, %v3021_v55 }
 0xb83   :  { %3024 = vrcp.f32 %v2351_v53  ;;  %v2332_v8 = vpop.f32.mrf.mxu2  ;;  %v2363_v43 = vand.u32 2147483648, %v2351_v53  ;;  %v2361_v5 = vand.u32 2147483647, %v2351_v53  ;;  %vm2357_vm2 = vweird.f32 %v2351_v53 }
 0xb84   :  { %v2345_v7 = vpop.f32.mrf.mxu3 }
 0xb85   :  { %v2364_v6 = vor.u32 1.1754944e-38, %v2363_v43  ;;  %vm2362_vm4 = vcmp.eq.f32.partialorder %v2361_v5, 8.507059e+37 }
 0xb86   :  { %v3023_v41 = vpop.eup %3022 }
 0xb87   :  { %v2371_v48 = vadd.f32 1.0, %v3023_v41 }
 0xb89   :  { %v3025_v25 = vpop.eup %3024  ;;  %3026 = vrcp.f32 %v2371_v48  ;;  %v2383_v49 = vand.u32 2147483648, %v2371_v48  ;;  %v2381_v50 = vand.u32 2147483647, %v2371_v48  ;;  %vm2377_vm6 = vweird.f32 %v2371_v48 }
 0xb8a   :  { %v2353_v24 = vmul.f32 %v3025_v25, %v2351_v53  ;;  %vm2358_vm1 = vweird.f32 %v3025_v25 }
 0xb8b   :  { %vm2359_vm3 = vmor %vm2357_vm2, %vm2358_vm1  ;;  %v2384_v38 = vor.u32 1.1754944e-38, %v2383_v49  ;;  %vm2382_vm8 = vcmp.eq.f32.partialorder %v2381_v50, 8.507059e+37 }
 0xb8c   :  { %v2354_v0 = vsub.f32 1.0, %v2353_v24 }
 0xb8e   :  { %v2355_v2 = vmul.f32 %v3025_v25, %v2354_v0 }
 0xb8f   :  { %v3027_v23 = vpop.eup %3026 }
 0xb90   :  { %v2373_v30 = vmul.f32 %v3027_v23, %v2371_v48  ;;  %v2356_v16 = vadd.f32 %v3025_v25, %v2355_v2  ;;  %vm2378_vm5 = vweird.f32 %v3027_v23 }
 0xb91   :  { %vm2379_vm7 = vmor %vm2377_vm6, %vm2378_vm5 }
 0xb92   :  { %v2374_v58 = vsub.f32 1.0, %v2373_v30  ;;  %v2360_v35 = vsel %vm2359_vm3, %v3025_v25, %v2356_v16 }
 0xb93   :  { %v2365_v21 = vsel %vm2362_vm4, %v2364_v6, %v2360_v35 }
 0xb94   :  { %v2375_v63 = vmul.f32 %v3027_v23, %v2374_v58  ;;  %v2388_v17 = vmul.f32 %v2387_v29, %v2365_v21 }
 0xb96   :  { %v2376_v54 = vadd.f32 %v3027_v23, %v2375_v63  ;;  %v2389_v56 = vadd.f32 %v2388_v17, %v1469_v47 }
 0xb98   :  { %v2380_v13 = vsel %vm2379_vm7, %v3027_v23, %v2376_v54  ;;  %3028 = vtanh.f32 %v2389_v56 }
 0xb99   :  { %v2385_v57 = vsel %vm2382_vm8, %v2384_v38, %v2380_v13 }
 0xb9a   :  { %v2391_v37 = vsub.f32 1.0, %v2385_v57  ;;  %v2393_v22 = vmul.f32 %v2385_v57, %v4051_v52 }
 0xb9e   :  { %v3029_v1 = vpop.eup %3028 }
 0xb9f   :  { %v2392_v45 = vmul.f32 %v3029_v1, %v2391_v37 }
 0xba1   :  { %v2394_v62 = vadd.f32 %v2393_v22, %v2392_v45 }
 0xba3   :  { %2782 = vst [vmem:[%s4081_s6 + $0x38] sm:$0xff] %v2394_v62 }
 0xba4   :  { %2783 = vst [vmem:[%s4082_s7 + $0x8] sm:$0xff] %v2394_v62 }
 0xba5   :  { %2406 = vsyncpa [#allocation4], 1 }
 0xba6   :  { %2407 = vsyncpa [#allocation6], 1 }

</bundles_post_ra>
